<compile_context>
chip_gen: v7x
topology: tpu7x:2x2x1
jax: 0.10.0
libtpu: 0.0.40
codegen_flags: <defaults>
</compile_context>

<pallas_src>
import math
from functools import partial

import jax
import jax.numpy as jnp
from jax import lax
from jax.experimental import pallas as pl
from jax.experimental.pallas import tpu as pltpu


def _input_attention_kernel(
    x_ref,      # [num_inputs, input_size, Nb]
    h_ref,      # [num_hidden, hidden_size, Nb]
    wk_ref,     # [num_heads*kdim, input_size]
    wvm_ref,    # [vdim, input_size]  (value weight pre-averaged over heads)
    wq_ref,     # [num_heads*kdim, hidden_size]
    inp_ref,    # [num_hidden, vdim, Nb]
    mask_ref,   # [num_hidden, Nb]
    probs_ref,  # [num_hidden, num_inputs, Nb]
    *, num_heads, kdim, vdim, num_hidden, num_inputs, k, epsilon, cell_switch,
):
    wk = wk_ref[...]
    wvm = wvm_ref[...]
    wq = wq_ref[...]

    # --- projections (MXU), batch on the lane axis ------------------------
    keys, vals = [], []
    for i in range(num_inputs):
        xi = x_ref[i]                                                   # [in, Nb]
        keys.append(jnp.dot(wk, xi, preferred_element_type=jnp.float32))   # [H*kd, Nb]
        vals.append(jnp.dot(wvm, xi, preferred_element_type=jnp.float32))  # [vd,  Nb]
    qrys = []
    for q in range(num_hidden):
        hq = h_ref[q]                                                   # [hid, Nb]
        qrys.append(jnp.dot(wq, hq, preferred_element_type=jnp.float32))   # [H*kd, Nb]

    # --- scores: mean over heads of per-head q.k == flat dot / num_heads ---
    scale = 1.0 / (num_heads * math.sqrt(kdim))
    scores = [
        [jnp.sum(qrys[q] * keys[i], axis=0, keepdims=True) * scale        # [1, Nb]
         for i in range(num_inputs)]
        for q in range(num_hidden)
    ]

    # optional cell switch: selected hidden rows forced to -inf pre-softmax
    if cell_switch:
        neg = jnp.full_like(scores[0][0], -jnp.inf)
        for c in cell_switch:
            scores[c] = [neg for _ in range(num_inputs)]

    # --- softmax over the hidden axis (torch dim=1), per input slot --------
    probs = [[None] * num_inputs for _ in range(num_hidden)]
    for i in range(num_inputs):
        col = [scores[q][i] for q in range(num_hidden)]
        m = col[0]
        for q in range(1, num_hidden):
            m = jnp.maximum(m, col[q])
        e = [jnp.exp(c - m) for c in col]
        s = e[0]
        for q in range(1, num_hidden):
            s = s + e[q]
        inv = 1.0 / s                       # single divide, then multiplies
        for q in range(num_hidden):
            probs[q][i] = e[q] * inv

    # --- key_norm: add epsilon, renormalise each hidden row over inputs ----
    for q in range(num_hidden):
        row = [probs[q][i] + epsilon for i in range(num_inputs)]
        s = row[0]
        for i in range(1, num_inputs):
            s = s + row[i]
        inv = 1.0 / s
        probs[q] = [r * inv for r in row]

    # TODO(synk): hard_argmax straight-through path not implemented (default False).

    # --- top-k active hidden units by 1 - p(null input), lanes = batch -----
    not_null = [1.0 - probs[q][num_inputs - 1] for q in range(num_hidden)]   # [1, Nb]
    masks = [jnp.zeros_like(not_null[0]) for _ in range(num_hidden)]
    for _ in range(k):                                                       # k static
        cur = [jnp.where(masks[q] > 0.0, -jnp.inf, not_null[q])
               for q in range(num_hidden)]
        best = cur[0]
        for q in range(1, num_hidden):
            best = jnp.maximum(best, cur[q])
        chosen = jnp.full_like(best, float(num_hidden))
        for q in range(num_hidden - 1, -1, -1):      # lowest index wins ties
            chosen = jnp.where(cur[q] == best, float(q), chosen)
        for q in range(num_hidden):
            masks[q] = jnp.where(chosen == float(q), 1.0, masks[q])

    # --- read-out: (probs @ value_mean) * mask  (dropout == identity) ------
    for q in range(num_hidden):
        acc = probs[q][0] * vals[0]                  # (1,Nb)*(vdim,Nb) broadcast
        for i in range(1, num_inputs):
            acc = acc + probs[q][i] * vals[i]
        inp_ref[q] = (acc * masks[q]).astype(inp_ref.dtype)
        mask_ref[pl.ds(q, 1), :] = masks[q].astype(mask_ref.dtype)
        for i in range(num_inputs):
            probs_ref[q, pl.ds(i, 1), :] = probs[q][i].astype(probs_ref.dtype)


def input_attention(x, h, wk, wv, wq, *, num_heads, kdim, vdim, num_hidden,
                    k, epsilon=1e-8, cell_switch=(), batch_block=256):
    """x: [N, num_inputs, input_size], h: [N, num_hidden, hidden_size].
    Weights in torch nn.Linear layout [out_features, in_features]."""
    N, num_inputs, input_size = x.shape
    Nh, nh, hidden_size = h.shape
    assert Nh == N and nh == num_hidden
    assert wk.shape == (num_heads * kdim, input_size)
    assert wv.shape == (num_heads * vdim, input_size)
    assert wq.shape == (num_heads * kdim, hidden_size)

    x = x.astype(jnp.float32)
    h = h.astype(jnp.float32)
    wk = wk.astype(jnp.float32)
    wq = wq.astype(jnp.float32)
    # mean over heads folded into the value weight (algebraically exact)
    wv_mean = wv.astype(jnp.float32).reshape(num_heads, vdim, input_size).mean(axis=0)

    # batch blocking (block last dim must be a multiple of 128 or the full dim)
    if N <= batch_block:
        nb, npad = N, N
    else:
        nb = batch_block
        npad = ((N + nb - 1) // nb) * nb
    if npad != N:
        x = jnp.pad(x, ((0, npad - N), (0, 0), (0, 0)))
        h = jnp.pad(h, ((0, npad - N), (0, 0), (0, 0)))

    # batch on the lane (last) axis for lane-dense loads/stores in the kernel
    xt = jnp.transpose(x, (1, 2, 0))      # [ni, in, Npad]
    ht = jnp.transpose(h, (1, 2, 0))      # [nh, hid, Npad]

    hk = num_heads * kdim
    kernel = partial(
        _input_attention_kernel,
        num_heads=num_heads, kdim=kdim, vdim=vdim,
        num_hidden=num_hidden, num_inputs=num_inputs, k=k,
        epsilon=epsilon, cell_switch=tuple(cell_switch),
    )

    flops = 2 * npad * (num_inputs * input_size * (hk + vdim)
                        + num_hidden * hidden_size * hk
                        + num_hidden * num_inputs * (hk + vdim))
    bytes_accessed = 4 * (npad * (num_inputs * input_size
                                  + num_hidden * hidden_size
                                  + num_hidden * (vdim + 1 + num_inputs))
                          + hk * input_size + vdim * input_size + hk * hidden_size)
    cost = pl.CostEstimate(flops=int(flops),
                           transcendentals=int(npad * num_hidden * num_inputs),
                           bytes_accessed=int(bytes_accessed))

    grid_spec = pltpu.PrefetchScalarGridSpec(
        num_scalar_prefetch=0,
        grid=(npad // nb,),
        in_specs=[
            pl.BlockSpec((num_inputs, input_size, nb), lambda n: (0, 0, n)),
            pl.BlockSpec((num_hidden, hidden_size, nb), lambda n: (0, 0, n)),
            pl.BlockSpec((hk, input_size), lambda n: (0, 0)),
            pl.BlockSpec((vdim, input_size), lambda n: (0, 0)),
            pl.BlockSpec((hk, hidden_size), lambda n: (0, 0)),
        ],
        out_specs=[
            pl.BlockSpec((num_hidden, vdim, nb), lambda n: (0, 0, n)),
            pl.BlockSpec((num_hidden, nb), lambda n: (0, n)),
            pl.BlockSpec((num_hidden, num_inputs, nb), lambda n: (0, 0, n)),
        ],
    )
    out_shapes = (
        jax.ShapeDtypeStruct((num_hidden, vdim, npad), jnp.float32),
        jax.ShapeDtypeStruct((num_hidden, npad), jnp.float32),
        jax.ShapeDtypeStruct((num_hidden, num_inputs, npad), jnp.float32),
    )

    inp_t, mask_t, probs_t = pl.pallas_call(
        kernel,
        out_shape=out_shapes,
        grid_spec=grid_spec,
        compiler_params=pltpu.CompilerParams(
            dimension_semantics=("parallel",),
            vmem_limit_bytes=32 * 1024 * 1024),
        cost_estimate=cost,
    )(xt, ht, wk, wv_mean, wq)

    inputs = jnp.transpose(inp_t, (2, 0, 1))[:N]     # [N, nh, vdim]
    mask_ = jnp.transpose(mask_t, (1, 0))[:N]        # [N, nh]
    probs = jnp.transpose(probs_t, (2, 0, 1))[:N]    # [N, nh, ni]
    return inputs, mask_, probs


def reference(x, h, wk, wv, wq, *, num_heads, kdim, vdim, num_hidden, k,
              epsilon, cell_switch=()):
    """Pure-JAX mirror of the PyTorch forward (eval mode, no dropout)."""
    N, ni, _ = x.shape
    key = jnp.einsum('bnd,od->bno', x, wk)
    val = jnp.einsum('bnd,od->bno', x, wv)
    qry = jnp.einsum('bnd,od->bno', h, wq)
    key = key.reshape(N, ni, num_heads, kdim).transpose(0, 2, 1, 3)
    val = val.reshape(N, ni, num_heads, vdim).transpose(0, 2, 1, 3).mean(axis=1)
    qry = qry.reshape(N, num_hidden, num_heads, kdim).transpose(0, 2, 1, 3)
    scores = jnp.einsum('bhqd,bhkd->bhqk', qry, key) / math.sqrt(kdim)
    scores = scores.mean(axis=1)                          # [N, nh, ni]
    for c in cell_switch:
        scores = scores.at[:, c, :].set(-jnp.inf)
    probs = jax.nn.softmax(scores, axis=1)
    probs = probs + epsilon
    probs = probs / probs.sum(axis=2, keepdims=True)
    not_null = 1.0 - probs[:, :, -1]
    _, idxs = lax.top_k(not_null, k)
    mask = jnp.zeros((N, num_hidden)).at[jnp.arange(N)[:, None], idxs].set(1.0)
    out = (probs @ val) * mask[:, :, None]
    return out, mask, probs


if __name__ == "__main__":
    # small, module-consistent shapes
    N, num_inputs, input_size = 2, 5, 16
    num_hidden, hidden_size = 6, 32
    num_heads, kdim, vdim, k = 4, 16, 16, 3
    epsilon = 1e-8

    root = jax.random.PRNGKey(0)
    kx, kh, kk, kv, kq = jax.random.split(root, 5)
    x = jax.random.normal(kx, (N, num_inputs, input_size), jnp.float32)
    h = jax.random.normal(kh, (N, num_hidden, hidden_size), jnp.float32)
    # nn.Linear-style uniform init, torch layout [out_features, in_features]
    bk = 1.0 / math.sqrt(input_size)
    bq = 1.0 / math.sqrt(hidden_size)
    wk = jax.random.uniform(kk, (num_heads * kdim, input_size), jnp.float32, -bk, bk)
    wv = jax.random.uniform(kv, (num_heads * vdim, input_size), jnp.float32, -bk, bk)
    wq = jax.random.uniform(kq, (num_heads * kdim, hidden_size), jnp.float32, -bq, bq)

    cfg = dict(num_heads=num_heads, kdim=kdim, vdim=vdim,
               num_hidden=num_hidden, k=k, epsilon=epsilon)

    inputs, mask_, probs = input_attention(x, h, wk, wv, wq, **cfg)
    jax.block_until_ready((inputs, mask_, probs))

    ref_inputs, ref_mask, ref_probs = reference(x, h, wk, wv, wq, **cfg)
    assert jnp.allclose(probs, ref_probs, atol=1e-4, rtol=1e-4)
    assert jnp.allclose(mask_, ref_mask)
    assert jnp.allclose(inputs, ref_inputs, atol=1e-4, rtol=1e-4)

    print("KERNEL_OK")
</pallas_src>

<mosaic_0001>
module attributes {stable_mosaic.version = 11 : i64} {
  func.func @_input_attention_kernel(%arg0: i32, %arg1: memref<5x16x2xf32, #tpu.memory_space<vmem>>, %arg2: memref<6x32x2xf32, #tpu.memory_space<vmem>>, %arg3: memref<64x16xf32, #tpu.memory_space<vmem>>, %arg4: memref<16x16xf32, #tpu.memory_space<vmem>>, %arg5: memref<64x32xf32, #tpu.memory_space<vmem>>, %arg6: memref<6x16x2xf32, #tpu.memory_space<vmem>>, %arg7: memref<6x2xf32, #tpu.memory_space<vmem>>, %arg8: memref<6x5x2xf32, #tpu.memory_space<vmem>>) attributes {dimension_semantics = [#tpu.dimension_semantics<parallel>], iteration_bounds = array<i64: 1>, scalar_prefetch = 0 : i64, scratch_operands = 0 : i64, tpu.core_type = #tpu.core_type<tc>, window_params = [{transform_indices = @transform_0, window_bounds = array<i64: 5, 16, 2>}, {transform_indices = @transform_1, window_bounds = array<i64: 6, 32, 2>}, {pipeline_mode = #tpu.pipeline_mode<synchronous>, transform_indices = @transform_2, window_bounds = array<i64: 64, 16>}, {pipeline_mode = #tpu.pipeline_mode<synchronous>, transform_indices = @transform_3, window_bounds = array<i64: 16, 16>}, {pipeline_mode = #tpu.pipeline_mode<synchronous>, transform_indices = @transform_4, window_bounds = array<i64: 64, 32>}, {transform_indices = @transform_5, window_bounds = array<i64: 6, 16, 2>}, {transform_indices = @transform_6, window_bounds = array<i64: 6, 2>}, {transform_indices = @transform_7, window_bounds = array<i64: 6, 5, 2>}]} {
    %c0 = arith.constant 0 : index
    %c0_0 = arith.constant 0 : index
    %0 = vector.load %arg3[%c0, %c0_0] : memref<64x16xf32, #tpu.memory_space<vmem>>, vector<64x16xf32>
    %c0_1 = arith.constant 0 : index
    %c0_2 = arith.constant 0 : index
    %1 = vector.load %arg4[%c0_1, %c0_2] : memref<16x16xf32, #tpu.memory_space<vmem>>, vector<16x16xf32>
    %c0_3 = arith.constant 0 : index
    %c0_4 = arith.constant 0 : index
    %2 = vector.load %arg5[%c0_3, %c0_4] : memref<64x32xf32, #tpu.memory_space<vmem>>, vector<64x32xf32>
    %c0_5 = arith.constant 0 : index
    %c0_6 = arith.constant 0 : index
    %c0_7 = arith.constant 0 : index
    %3 = vector.load %arg1[%c0_5, %c0_6, %c0_7] : memref<5x16x2xf32, #tpu.memory_space<vmem>>, vector<1x16x2xf32>
    %4 = vector.shape_cast %3 : vector<1x16x2xf32> to vector<16x2xf32>
    %cst = arith.constant dense<0.000000e+00> : vector<64x2xf32>
    %5 = tpu.matmul %0, %4, %cst {dimension_numbers = #tpu.dot_dimension_numbers<[1], [0], [0], [1], [0, 0, 1, 1], [], []>} : vector<64x16xf32>, vector<16x2xf32>, vector<64x2xf32> -> vector<64x2xf32>
    %cst_8 = arith.constant dense<0.000000e+00> : vector<16x2xf32>
    %6 = tpu.matmul %1, %4, %cst_8 {dimension_numbers = #tpu.dot_dimension_numbers<[1], [0], [0], [1], [0, 0, 1, 1], [], []>} : vector<16x16xf32>, vector<16x2xf32>, vector<16x2xf32> -> vector<16x2xf32>
    %c1 = arith.constant 1 : index
    %c0_9 = arith.constant 0 : index
    %c0_10 = arith.constant 0 : index
    %7 = vector.load %arg1[%c1, %c0_9, %c0_10] : memref<5x16x2xf32, #tpu.memory_space<vmem>>, vector<1x16x2xf32>
    %8 = vector.shape_cast %7 : vector<1x16x2xf32> to vector<16x2xf32>
    %cst_11 = arith.constant dense<0.000000e+00> : vector<64x2xf32>
    %9 = tpu.matmul %0, %8, %cst_11 {dimension_numbers = #tpu.dot_dimension_numbers<[1], [0], [0], [1], [0, 0, 1, 1], [], []>} : vector<64x16xf32>, vector<16x2xf32>, vector<64x2xf32> -> vector<64x2xf32>
    %cst_12 = arith.constant dense<0.000000e+00> : vector<16x2xf32>
    %10 = tpu.matmul %1, %8, %cst_12 {dimension_numbers = #tpu.dot_dimension_numbers<[1], [0], [0], [1], [0, 0, 1, 1], [], []>} : vector<16x16xf32>, vector<16x2xf32>, vector<16x2xf32> -> vector<16x2xf32>
    %c2 = arith.constant 2 : index
    %c0_13 = arith.constant 0 : index
    %c0_14 = arith.constant 0 : index
    %11 = vector.load %arg1[%c2, %c0_13, %c0_14] : memref<5x16x2xf32, #tpu.memory_space<vmem>>, vector<1x16x2xf32>
    %12 = vector.shape_cast %11 : vector<1x16x2xf32> to vector<16x2xf32>
    %cst_15 = arith.constant dense<0.000000e+00> : vector<64x2xf32>
    %13 = tpu.matmul %0, %12, %cst_15 {dimension_numbers = #tpu.dot_dimension_numbers<[1], [0], [0], [1], [0, 0, 1, 1], [], []>} : vector<64x16xf32>, vector<16x2xf32>, vector<64x2xf32> -> vector<64x2xf32>
    %cst_16 = arith.constant dense<0.000000e+00> : vector<16x2xf32>
    %14 = tpu.matmul %1, %12, %cst_16 {dimension_numbers = #tpu.dot_dimension_numbers<[1], [0], [0], [1], [0, 0, 1, 1], [], []>} : vector<16x16xf32>, vector<16x2xf32>, vector<16x2xf32> -> vector<16x2xf32>
    %c3 = arith.constant 3 : index
    %c0_17 = arith.constant 0 : index
    %c0_18 = arith.constant 0 : index
    %15 = vector.load %arg1[%c3, %c0_17, %c0_18] : memref<5x16x2xf32, #tpu.memory_space<vmem>>, vector<1x16x2xf32>
    %16 = vector.shape_cast %15 : vector<1x16x2xf32> to vector<16x2xf32>
    %cst_19 = arith.constant dense<0.000000e+00> : vector<64x2xf32>
    %17 = tpu.matmul %0, %16, %cst_19 {dimension_numbers = #tpu.dot_dimension_numbers<[1], [0], [0], [1], [0, 0, 1, 1], [], []>} : vector<64x16xf32>, vector<16x2xf32>, vector<64x2xf32> -> vector<64x2xf32>
    %cst_20 = arith.constant dense<0.000000e+00> : vector<16x2xf32>
    %18 = tpu.matmul %1, %16, %cst_20 {dimension_numbers = #tpu.dot_dimension_numbers<[1], [0], [0], [1], [0, 0, 1, 1], [], []>} : vector<16x16xf32>, vector<16x2xf32>, vector<16x2xf32> -> vector<16x2xf32>
    %c4 = arith.constant 4 : index
    %c0_21 = arith.constant 0 : index
    %c0_22 = arith.constant 0 : index
    %19 = vector.load %arg1[%c4, %c0_21, %c0_22] : memref<5x16x2xf32, #tpu.memory_space<vmem>>, vector<1x16x2xf32>
    %20 = vector.shape_cast %19 : vector<1x16x2xf32> to vector<16x2xf32>
    %cst_23 = arith.constant dense<0.000000e+00> : vector<64x2xf32>
    %21 = tpu.matmul %0, %20, %cst_23 {dimension_numbers = #tpu.dot_dimension_numbers<[1], [0], [0], [1], [0, 0, 1, 1], [], []>} : vector<64x16xf32>, vector<16x2xf32>, vector<64x2xf32> -> vector<64x2xf32>
    %cst_24 = arith.constant dense<0.000000e+00> : vector<16x2xf32>
    %22 = tpu.matmul %1, %20, %cst_24 {dimension_numbers = #tpu.dot_dimension_numbers<[1], [0], [0], [1], [0, 0, 1, 1], [], []>} : vector<16x16xf32>, vector<16x2xf32>, vector<16x2xf32> -> vector<16x2xf32>
    %c0_25 = arith.constant 0 : index
    %c0_26 = arith.constant 0 : index
    %c0_27 = arith.constant 0 : index
    %23 = vector.load %arg2[%c0_25, %c0_26, %c0_27] : memref<6x32x2xf32, #tpu.memory_space<vmem>>, vector<1x32x2xf32>
    %24 = vector.shape_cast %23 : vector<1x32x2xf32> to vector<32x2xf32>
    %cst_28 = arith.constant dense<0.000000e+00> : vector<64x2xf32>
    %25 = tpu.matmul %2, %24, %cst_28 {dimension_numbers = #tpu.dot_dimension_numbers<[1], [0], [0], [1], [0, 0, 1, 1], [], []>} : vector<64x32xf32>, vector<32x2xf32>, vector<64x2xf32> -> vector<64x2xf32>
    %c1_29 = arith.constant 1 : index
    %c0_30 = arith.constant 0 : index
    %c0_31 = arith.constant 0 : index
    %26 = vector.load %arg2[%c1_29, %c0_30, %c0_31] : memref<6x32x2xf32, #tpu.memory_space<vmem>>, vector<1x32x2xf32>
    %27 = vector.shape_cast %26 : vector<1x32x2xf32> to vector<32x2xf32>
    %cst_32 = arith.constant dense<0.000000e+00> : vector<64x2xf32>
    %28 = tpu.matmul %2, %27, %cst_32 {dimension_numbers = #tpu.dot_dimension_numbers<[1], [0], [0], [1], [0, 0, 1, 1], [], []>} : vector<64x32xf32>, vector<32x2xf32>, vector<64x2xf32> -> vector<64x2xf32>
    %c2_33 = arith.constant 2 : index
    %c0_34 = arith.constant 0 : index
    %c0_35 = arith.constant 0 : index
    %29 = vector.load %arg2[%c2_33, %c0_34, %c0_35] : memref<6x32x2xf32, #tpu.memory_space<vmem>>, vector<1x32x2xf32>
    %30 = vector.shape_cast %29 : vector<1x32x2xf32> to vector<32x2xf32>
    %cst_36 = arith.constant dense<0.000000e+00> : vector<64x2xf32>
    %31 = tpu.matmul %2, %30, %cst_36 {dimension_numbers = #tpu.dot_dimension_numbers<[1], [0], [0], [1], [0, 0, 1, 1], [], []>} : vector<64x32xf32>, vector<32x2xf32>, vector<64x2xf32> -> vector<64x2xf32>
    %c3_37 = arith.constant 3 : index
    %c0_38 = arith.constant 0 : index
    %c0_39 = arith.constant 0 : index
    %32 = vector.load %arg2[%c3_37, %c0_38, %c0_39] : memref<6x32x2xf32, #tpu.memory_space<vmem>>, vector<1x32x2xf32>
    %33 = vector.shape_cast %32 : vector<1x32x2xf32> to vector<32x2xf32>
    %cst_40 = arith.constant dense<0.000000e+00> : vector<64x2xf32>
    %34 = tpu.matmul %2, %33, %cst_40 {dimension_numbers = #tpu.dot_dimension_numbers<[1], [0], [0], [1], [0, 0, 1, 1], [], []>} : vector<64x32xf32>, vector<32x2xf32>, vector<64x2xf32> -> vector<64x2xf32>
    %c4_41 = arith.constant 4 : index
    %c0_42 = arith.constant 0 : index
    %c0_43 = arith.constant 0 : index
    %35 = vector.load %arg2[%c4_41, %c0_42, %c0_43] : memref<6x32x2xf32, #tpu.memory_space<vmem>>, vector<1x32x2xf32>
    %36 = vector.shape_cast %35 : vector<1x32x2xf32> to vector<32x2xf32>
    %cst_44 = arith.constant dense<0.000000e+00> : vector<64x2xf32>
    %37 = tpu.matmul %2, %36, %cst_44 {dimension_numbers = #tpu.dot_dimension_numbers<[1], [0], [0], [1], [0, 0, 1, 1], [], []>} : vector<64x32xf32>, vector<32x2xf32>, vector<64x2xf32> -> vector<64x2xf32>
    %c5 = arith.constant 5 : index
    %c0_45 = arith.constant 0 : index
    %c0_46 = arith.constant 0 : index
    %38 = vector.load %arg2[%c5, %c0_45, %c0_46] : memref<6x32x2xf32, #tpu.memory_space<vmem>>, vector<1x32x2xf32>
    %39 = vector.shape_cast %38 : vector<1x32x2xf32> to vector<32x2xf32>
    %cst_47 = arith.constant dense<0.000000e+00> : vector<64x2xf32>
    %40 = tpu.matmul %2, %39, %cst_47 {dimension_numbers = #tpu.dot_dimension_numbers<[1], [0], [0], [1], [0, 0, 1, 1], [], []>} : vector<64x32xf32>, vector<32x2xf32>, vector<64x2xf32> -> vector<64x2xf32>
    %41 = arith.mulf %25, %5 : vector<64x2xf32>
    %cst_48 = arith.constant dense<0.000000e+00> : vector<2xf32>
    %42 = vector.multi_reduction <add>, %41, %cst_48 [0] : vector<64x2xf32> to vector<2xf32>
    %43 = vector.shape_cast %42 : vector<2xf32> to vector<1x2xf32>
    %cst_49 = arith.constant 6.250000e-02 : f32
    %44 = vector.broadcast %cst_49 : f32 to vector<1x2xf32>
    %45 = arith.mulf %43, %44 : vector<1x2xf32>
    %46 = arith.mulf %25, %9 : vector<64x2xf32>
    %cst_50 = arith.constant dense<0.000000e+00> : vector<2xf32>
    %47 = vector.multi_reduction <add>, %46, %cst_50 [0] : vector<64x2xf32> to vector<2xf32>
    %48 = vector.shape_cast %47 : vector<2xf32> to vector<1x2xf32>
    %cst_51 = arith.constant 6.250000e-02 : f32
    %49 = vector.broadcast %cst_51 : f32 to vector<1x2xf32>
    %50 = arith.mulf %48, %49 : vector<1x2xf32>
    %51 = arith.mulf %25, %13 : vector<64x2xf32>
    %cst_52 = arith.constant dense<0.000000e+00> : vector<2xf32>
    %52 = vector.multi_reduction <add>, %51, %cst_52 [0] : vector<64x2xf32> to vector<2xf32>
    %53 = vector.shape_cast %52 : vector<2xf32> to vector<1x2xf32>
    %cst_53 = arith.constant 6.250000e-02 : f32
    %54 = vector.broadcast %cst_53 : f32 to vector<1x2xf32>
    %55 = arith.mulf %53, %54 : vector<1x2xf32>
    %56 = arith.mulf %25, %17 : vector<64x2xf32>
    %cst_54 = arith.constant dense<0.000000e+00> : vector<2xf32>
    %57 = vector.multi_reduction <add>, %56, %cst_54 [0] : vector<64x2xf32> to vector<2xf32>
    %58 = vector.shape_cast %57 : vector<2xf32> to vector<1x2xf32>
    %cst_55 = arith.constant 6.250000e-02 : f32
    %59 = vector.broadcast %cst_55 : f32 to vector<1x2xf32>
    %60 = arith.mulf %58, %59 : vector<1x2xf32>
    %61 = arith.mulf %25, %21 : vector<64x2xf32>
    %cst_56 = arith.constant dense<0.000000e+00> : vector<2xf32>
    %62 = vector.multi_reduction <add>, %61, %cst_56 [0] : vector<64x2xf32> to vector<2xf32>
    %63 = vector.shape_cast %62 : vector<2xf32> to vector<1x2xf32>
    %cst_57 = arith.constant 6.250000e-02 : f32
    %64 = vector.broadcast %cst_57 : f32 to vector<1x2xf32>
    %65 = arith.mulf %63, %64 : vector<1x2xf32>
    %66 = arith.mulf %28, %5 : vector<64x2xf32>
    %cst_58 = arith.constant dense<0.000000e+00> : vector<2xf32>
    %67 = vector.multi_reduction <add>, %66, %cst_58 [0] : vector<64x2xf32> to vector<2xf32>
    %68 = vector.shape_cast %67 : vector<2xf32> to vector<1x2xf32>
    %cst_59 = arith.constant 6.250000e-02 : f32
    %69 = vector.broadcast %cst_59 : f32 to vector<1x2xf32>
    %70 = arith.mulf %68, %69 : vector<1x2xf32>
    %71 = arith.mulf %28, %9 : vector<64x2xf32>
    %cst_60 = arith.constant dense<0.000000e+00> : vector<2xf32>
    %72 = vector.multi_reduction <add>, %71, %cst_60 [0] : vector<64x2xf32> to vector<2xf32>
    %73 = vector.shape_cast %72 : vector<2xf32> to vector<1x2xf32>
    %cst_61 = arith.constant 6.250000e-02 : f32
    %74 = vector.broadcast %cst_61 : f32 to vector<1x2xf32>
    %75 = arith.mulf %73, %74 : vector<1x2xf32>
    %76 = arith.mulf %28, %13 : vector<64x2xf32>
    %cst_62 = arith.constant dense<0.000000e+00> : vector<2xf32>
    %77 = vector.multi_reduction <add>, %76, %cst_62 [0] : vector<64x2xf32> to vector<2xf32>
    %78 = vector.shape_cast %77 : vector<2xf32> to vector<1x2xf32>
    %cst_63 = arith.constant 6.250000e-02 : f32
    %79 = vector.broadcast %cst_63 : f32 to vector<1x2xf32>
    %80 = arith.mulf %78, %79 : vector<1x2xf32>
    %81 = arith.mulf %28, %17 : vector<64x2xf32>
    %cst_64 = arith.constant dense<0.000000e+00> : vector<2xf32>
    %82 = vector.multi_reduction <add>, %81, %cst_64 [0] : vector<64x2xf32> to vector<2xf32>
    %83 = vector.shape_cast %82 : vector<2xf32> to vector<1x2xf32>
    %cst_65 = arith.constant 6.250000e-02 : f32
    %84 = vector.broadcast %cst_65 : f32 to vector<1x2xf32>
    %85 = arith.mulf %83, %84 : vector<1x2xf32>
    %86 = arith.mulf %28, %21 : vector<64x2xf32>
    %cst_66 = arith.constant dense<0.000000e+00> : vector<2xf32>
    %87 = vector.multi_reduction <add>, %86, %cst_66 [0] : vector<64x2xf32> to vector<2xf32>
    %88 = vector.shape_cast %87 : vector<2xf32> to vector<1x2xf32>
    %cst_67 = arith.constant 6.250000e-02 : f32
    %89 = vector.broadcast %cst_67 : f32 to vector<1x2xf32>
    %90 = arith.mulf %88, %89 : vector<1x2xf32>
    %91 = arith.mulf %31, %5 : vector<64x2xf32>
    %cst_68 = arith.constant dense<0.000000e+00> : vector<2xf32>
    %92 = vector.multi_reduction <add>, %91, %cst_68 [0] : vector<64x2xf32> to vector<2xf32>
    %93 = vector.shape_cast %92 : vector<2xf32> to vector<1x2xf32>
    %cst_69 = arith.constant 6.250000e-02 : f32
    %94 = vector.broadcast %cst_69 : f32 to vector<1x2xf32>
    %95 = arith.mulf %93, %94 : vector<1x2xf32>
    %96 = arith.mulf %31, %9 : vector<64x2xf32>
    %cst_70 = arith.constant dense<0.000000e+00> : vector<2xf32>
    %97 = vector.multi_reduction <add>, %96, %cst_70 [0] : vector<64x2xf32> to vector<2xf32>
    %98 = vector.shape_cast %97 : vector<2xf32> to vector<1x2xf32>
    %cst_71 = arith.constant 6.250000e-02 : f32
    %99 = vector.broadcast %cst_71 : f32 to vector<1x2xf32>
    %100 = arith.mulf %98, %99 : vector<1x2xf32>
    %101 = arith.mulf %31, %13 : vector<64x2xf32>
    %cst_72 = arith.constant dense<0.000000e+00> : vector<2xf32>
    %102 = vector.multi_reduction <add>, %101, %cst_72 [0] : vector<64x2xf32> to vector<2xf32>
    %103 = vector.shape_cast %102 : vector<2xf32> to vector<1x2xf32>
    %cst_73 = arith.constant 6.250000e-02 : f32
    %104 = vector.broadcast %cst_73 : f32 to vector<1x2xf32>
    %105 = arith.mulf %103, %104 : vector<1x2xf32>
    %106 = arith.mulf %31, %17 : vector<64x2xf32>
    %cst_74 = arith.constant dense<0.000000e+00> : vector<2xf32>
    %107 = vector.multi_reduction <add>, %106, %cst_74 [0] : vector<64x2xf32> to vector<2xf32>
    %108 = vector.shape_cast %107 : vector<2xf32> to vector<1x2xf32>
    %cst_75 = arith.constant 6.250000e-02 : f32
    %109 = vector.broadcast %cst_75 : f32 to vector<1x2xf32>
    %110 = arith.mulf %108, %109 : vector<1x2xf32>
    %111 = arith.mulf %31, %21 : vector<64x2xf32>
    %cst_76 = arith.constant dense<0.000000e+00> : vector<2xf32>
    %112 = vector.multi_reduction <add>, %111, %cst_76 [0] : vector<64x2xf32> to vector<2xf32>
    %113 = vector.shape_cast %112 : vector<2xf32> to vector<1x2xf32>
    %cst_77 = arith.constant 6.250000e-02 : f32
    %114 = vector.broadcast %cst_77 : f32 to vector<1x2xf32>
    %115 = arith.mulf %113, %114 : vector<1x2xf32>
    %116 = arith.mulf %34, %5 : vector<64x2xf32>
    %cst_78 = arith.constant dense<0.000000e+00> : vector<2xf32>
    %117 = vector.multi_reduction <add>, %116, %cst_78 [0] : vector<64x2xf32> to vector<2xf32>
    %118 = vector.shape_cast %117 : vector<2xf32> to vector<1x2xf32>
    %cst_79 = arith.constant 6.250000e-02 : f32
    %119 = vector.broadcast %cst_79 : f32 to vector<1x2xf32>
    %120 = arith.mulf %118, %119 : vector<1x2xf32>
    %121 = arith.mulf %34, %9 : vector<64x2xf32>
    %cst_80 = arith.constant dense<0.000000e+00> : vector<2xf32>
    %122 = vector.multi_reduction <add>, %121, %cst_80 [0] : vector<64x2xf32> to vector<2xf32>
    %123 = vector.shape_cast %122 : vector<2xf32> to vector<1x2xf32>
    %cst_81 = arith.constant 6.250000e-02 : f32
    %124 = vector.broadcast %cst_81 : f32 to vector<1x2xf32>
    %125 = arith.mulf %123, %124 : vector<1x2xf32>
    %126 = arith.mulf %34, %13 : vector<64x2xf32>
    %cst_82 = arith.constant dense<0.000000e+00> : vector<2xf32>
    %127 = vector.multi_reduction <add>, %126, %cst_82 [0] : vector<64x2xf32> to vector<2xf32>
    %128 = vector.shape_cast %127 : vector<2xf32> to vector<1x2xf32>
    %cst_83 = arith.constant 6.250000e-02 : f32
    %129 = vector.broadcast %cst_83 : f32 to vector<1x2xf32>
    %130 = arith.mulf %128, %129 : vector<1x2xf32>
    %131 = arith.mulf %34, %17 : vector<64x2xf32>
    %cst_84 = arith.constant dense<0.000000e+00> : vector<2xf32>
    %132 = vector.multi_reduction <add>, %131, %cst_84 [0] : vector<64x2xf32> to vector<2xf32>
    %133 = vector.shape_cast %132 : vector<2xf32> to vector<1x2xf32>
    %cst_85 = arith.constant 6.250000e-02 : f32
    %134 = vector.broadcast %cst_85 : f32 to vector<1x2xf32>
    %135 = arith.mulf %133, %134 : vector<1x2xf32>
    %136 = arith.mulf %34, %21 : vector<64x2xf32>
    %cst_86 = arith.constant dense<0.000000e+00> : vector<2xf32>
    %137 = vector.multi_reduction <add>, %136, %cst_86 [0] : vector<64x2xf32> to vector<2xf32>
    %138 = vector.shape_cast %137 : vector<2xf32> to vector<1x2xf32>
    %cst_87 = arith.constant 6.250000e-02 : f32
    %139 = vector.broadcast %cst_87 : f32 to vector<1x2xf32>
    %140 = arith.mulf %138, %139 : vector<1x2xf32>
    %141 = arith.mulf %37, %5 : vector<64x2xf32>
    %cst_88 = arith.constant dense<0.000000e+00> : vector<2xf32>
    %142 = vector.multi_reduction <add>, %141, %cst_88 [0] : vector<64x2xf32> to vector<2xf32>
    %143 = vector.shape_cast %142 : vector<2xf32> to vector<1x2xf32>
    %cst_89 = arith.constant 6.250000e-02 : f32
    %144 = vector.broadcast %cst_89 : f32 to vector<1x2xf32>
    %145 = arith.mulf %143, %144 : vector<1x2xf32>
    %146 = arith.mulf %37, %9 : vector<64x2xf32>
    %cst_90 = arith.constant dense<0.000000e+00> : vector<2xf32>
    %147 = vector.multi_reduction <add>, %146, %cst_90 [0] : vector<64x2xf32> to vector<2xf32>
    %148 = vector.shape_cast %147 : vector<2xf32> to vector<1x2xf32>
    %cst_91 = arith.constant 6.250000e-02 : f32
    %149 = vector.broadcast %cst_91 : f32 to vector<1x2xf32>
    %150 = arith.mulf %148, %149 : vector<1x2xf32>
    %151 = arith.mulf %37, %13 : vector<64x2xf32>
    %cst_92 = arith.constant dense<0.000000e+00> : vector<2xf32>
    %152 = vector.multi_reduction <add>, %151, %cst_92 [0] : vector<64x2xf32> to vector<2xf32>
    %153 = vector.shape_cast %152 : vector<2xf32> to vector<1x2xf32>
    %cst_93 = arith.constant 6.250000e-02 : f32
    %154 = vector.broadcast %cst_93 : f32 to vector<1x2xf32>
    %155 = arith.mulf %153, %154 : vector<1x2xf32>
    %156 = arith.mulf %37, %17 : vector<64x2xf32>
    %cst_94 = arith.constant dense<0.000000e+00> : vector<2xf32>
    %157 = vector.multi_reduction <add>, %156, %cst_94 [0] : vector<64x2xf32> to vector<2xf32>
    %158 = vector.shape_cast %157 : vector<2xf32> to vector<1x2xf32>
    %cst_95 = arith.constant 6.250000e-02 : f32
    %159 = vector.broadcast %cst_95 : f32 to vector<1x2xf32>
    %160 = arith.mulf %158, %159 : vector<1x2xf32>
    %161 = arith.mulf %37, %21 : vector<64x2xf32>
    %cst_96 = arith.constant dense<0.000000e+00> : vector<2xf32>
    %162 = vector.multi_reduction <add>, %161, %cst_96 [0] : vector<64x2xf32> to vector<2xf32>
    %163 = vector.shape_cast %162 : vector<2xf32> to vector<1x2xf32>
    %cst_97 = arith.constant 6.250000e-02 : f32
    %164 = vector.broadcast %cst_97 : f32 to vector<1x2xf32>
    %165 = arith.mulf %163, %164 : vector<1x2xf32>
    %166 = arith.mulf %40, %5 : vector<64x2xf32>
    %cst_98 = arith.constant dense<0.000000e+00> : vector<2xf32>
    %167 = vector.multi_reduction <add>, %166, %cst_98 [0] : vector<64x2xf32> to vector<2xf32>
    %168 = vector.shape_cast %167 : vector<2xf32> to vector<1x2xf32>
    %cst_99 = arith.constant 6.250000e-02 : f32
    %169 = vector.broadcast %cst_99 : f32 to vector<1x2xf32>
    %170 = arith.mulf %168, %169 : vector<1x2xf32>
    %171 = arith.mulf %40, %9 : vector<64x2xf32>
    %cst_100 = arith.constant dense<0.000000e+00> : vector<2xf32>
    %172 = vector.multi_reduction <add>, %171, %cst_100 [0] : vector<64x2xf32> to vector<2xf32>
    %173 = vector.shape_cast %172 : vector<2xf32> to vector<1x2xf32>
    %cst_101 = arith.constant 6.250000e-02 : f32
    %174 = vector.broadcast %cst_101 : f32 to vector<1x2xf32>
    %175 = arith.mulf %173, %174 : vector<1x2xf32>
    %176 = arith.mulf %40, %13 : vector<64x2xf32>
    %cst_102 = arith.constant dense<0.000000e+00> : vector<2xf32>
    %177 = vector.multi_reduction <add>, %176, %cst_102 [0] : vector<64x2xf32> to vector<2xf32>
    %178 = vector.shape_cast %177 : vector<2xf32> to vector<1x2xf32>
    %cst_103 = arith.constant 6.250000e-02 : f32
    %179 = vector.broadcast %cst_103 : f32 to vector<1x2xf32>
    %180 = arith.mulf %178, %179 : vector<1x2xf32>
    %181 = arith.mulf %40, %17 : vector<64x2xf32>
    %cst_104 = arith.constant dense<0.000000e+00> : vector<2xf32>
    %182 = vector.multi_reduction <add>, %181, %cst_104 [0] : vector<64x2xf32> to vector<2xf32>
    %183 = vector.shape_cast %182 : vector<2xf32> to vector<1x2xf32>
    %cst_105 = arith.constant 6.250000e-02 : f32
    %184 = vector.broadcast %cst_105 : f32 to vector<1x2xf32>
    %185 = arith.mulf %183, %184 : vector<1x2xf32>
    %186 = arith.mulf %40, %21 : vector<64x2xf32>
    %cst_106 = arith.constant dense<0.000000e+00> : vector<2xf32>
    %187 = vector.multi_reduction <add>, %186, %cst_106 [0] : vector<64x2xf32> to vector<2xf32>
    %188 = vector.shape_cast %187 : vector<2xf32> to vector<1x2xf32>
    %cst_107 = arith.constant 6.250000e-02 : f32
    %189 = vector.broadcast %cst_107 : f32 to vector<1x2xf32>
    %190 = arith.mulf %188, %189 : vector<1x2xf32>
    %191 = arith.maximumf %45, %70 : vector<1x2xf32>
    %192 = arith.maximumf %191, %95 : vector<1x2xf32>
    %193 = arith.maximumf %192, %120 : vector<1x2xf32>
    %194 = arith.maximumf %193, %145 : vector<1x2xf32>
    %195 = arith.maximumf %194, %170 : vector<1x2xf32>
    %196 = arith.subf %45, %195 : vector<1x2xf32>
    %197 = math.exp %196 : vector<1x2xf32>
    %198 = arith.subf %70, %195 : vector<1x2xf32>
    %199 = math.exp %198 : vector<1x2xf32>
    %200 = arith.subf %95, %195 : vector<1x2xf32>
    %201 = math.exp %200 : vector<1x2xf32>
    %202 = arith.subf %120, %195 : vector<1x2xf32>
    %203 = math.exp %202 : vector<1x2xf32>
    %204 = arith.subf %145, %195 : vector<1x2xf32>
    %205 = math.exp %204 : vector<1x2xf32>
    %206 = arith.subf %170, %195 : vector<1x2xf32>
    %207 = math.exp %206 : vector<1x2xf32>
    %208 = arith.addf %197, %199 : vector<1x2xf32>
    %209 = arith.addf %208, %201 : vector<1x2xf32>
    %210 = arith.addf %209, %203 : vector<1x2xf32>
    %211 = arith.addf %210, %205 : vector<1x2xf32>
    %212 = arith.addf %211, %207 : vector<1x2xf32>
    %cst_108 = arith.constant 1.000000e+00 : f32
    %213 = vector.broadcast %cst_108 : f32 to vector<1x2xf32>
    %214 = arith.divf %213, %212 : vector<1x2xf32>
    %215 = arith.mulf %197, %214 : vector<1x2xf32>
    %216 = arith.mulf %199, %214 : vector<1x2xf32>
    %217 = arith.mulf %201, %214 : vector<1x2xf32>
    %218 = arith.mulf %203, %214 : vector<1x2xf32>
    %219 = arith.mulf %205, %214 : vector<1x2xf32>
    %220 = arith.mulf %207, %214 : vector<1x2xf32>
    %221 = arith.maximumf %50, %75 : vector<1x2xf32>
    %222 = arith.maximumf %221, %100 : vector<1x2xf32>
    %223 = arith.maximumf %222, %125 : vector<1x2xf32>
    %224 = arith.maximumf %223, %150 : vector<1x2xf32>
    %225 = arith.maximumf %224, %175 : vector<1x2xf32>
    %226 = arith.subf %50, %225 : vector<1x2xf32>
    %227 = math.exp %226 : vector<1x2xf32>
    %228 = arith.subf %75, %225 : vector<1x2xf32>
    %229 = math.exp %228 : vector<1x2xf32>
    %230 = arith.subf %100, %225 : vector<1x2xf32>
    %231 = math.exp %230 : vector<1x2xf32>
    %232 = arith.subf %125, %225 : vector<1x2xf32>
    %233 = math.exp %232 : vector<1x2xf32>
    %234 = arith.subf %150, %225 : vector<1x2xf32>
    %235 = math.exp %234 : vector<1x2xf32>
    %236 = arith.subf %175, %225 : vector<1x2xf32>
    %237 = math.exp %236 : vector<1x2xf32>
    %238 = arith.addf %227, %229 : vector<1x2xf32>
    %239 = arith.addf %238, %231 : vector<1x2xf32>
    %240 = arith.addf %239, %233 : vector<1x2xf32>
    %241 = arith.addf %240, %235 : vector<1x2xf32>
    %242 = arith.addf %241, %237 : vector<1x2xf32>
    %cst_109 = arith.constant 1.000000e+00 : f32
    %243 = vector.broadcast %cst_109 : f32 to vector<1x2xf32>
    %244 = arith.divf %243, %242 : vector<1x2xf32>
    %245 = arith.mulf %227, %244 : vector<1x2xf32>
    %246 = arith.mulf %229, %244 : vector<1x2xf32>
    %247 = arith.mulf %231, %244 : vector<1x2xf32>
    %248 = arith.mulf %233, %244 : vector<1x2xf32>
    %249 = arith.mulf %235, %244 : vector<1x2xf32>
    %250 = arith.mulf %237, %244 : vector<1x2xf32>
    %251 = arith.maximumf %55, %80 : vector<1x2xf32>
    %252 = arith.maximumf %251, %105 : vector<1x2xf32>
    %253 = arith.maximumf %252, %130 : vector<1x2xf32>
    %254 = arith.maximumf %253, %155 : vector<1x2xf32>
    %255 = arith.maximumf %254, %180 : vector<1x2xf32>
    %256 = arith.subf %55, %255 : vector<1x2xf32>
    %257 = math.exp %256 : vector<1x2xf32>
    %258 = arith.subf %80, %255 : vector<1x2xf32>
    %259 = math.exp %258 : vector<1x2xf32>
    %260 = arith.subf %105, %255 : vector<1x2xf32>
    %261 = math.exp %260 : vector<1x2xf32>
    %262 = arith.subf %130, %255 : vector<1x2xf32>
    %263 = math.exp %262 : vector<1x2xf32>
    %264 = arith.subf %155, %255 : vector<1x2xf32>
    %265 = math.exp %264 : vector<1x2xf32>
    %266 = arith.subf %180, %255 : vector<1x2xf32>
    %267 = math.exp %266 : vector<1x2xf32>
    %268 = arith.addf %257, %259 : vector<1x2xf32>
    %269 = arith.addf %268, %261 : vector<1x2xf32>
    %270 = arith.addf %269, %263 : vector<1x2xf32>
    %271 = arith.addf %270, %265 : vector<1x2xf32>
    %272 = arith.addf %271, %267 : vector<1x2xf32>
    %cst_110 = arith.constant 1.000000e+00 : f32
    %273 = vector.broadcast %cst_110 : f32 to vector<1x2xf32>
    %274 = arith.divf %273, %272 : vector<1x2xf32>
    %275 = arith.mulf %257, %274 : vector<1x2xf32>
    %276 = arith.mulf %259, %274 : vector<1x2xf32>
    %277 = arith.mulf %261, %274 : vector<1x2xf32>
    %278 = arith.mulf %263, %274 : vector<1x2xf32>
    %279 = arith.mulf %265, %274 : vector<1x2xf32>
    %280 = arith.mulf %267, %274 : vector<1x2xf32>
    %281 = arith.maximumf %60, %85 : vector<1x2xf32>
    %282 = arith.maximumf %281, %110 : vector<1x2xf32>
    %283 = arith.maximumf %282, %135 : vector<1x2xf32>
    %284 = arith.maximumf %283, %160 : vector<1x2xf32>
    %285 = arith.maximumf %284, %185 : vector<1x2xf32>
    %286 = arith.subf %60, %285 : vector<1x2xf32>
    %287 = math.exp %286 : vector<1x2xf32>
    %288 = arith.subf %85, %285 : vector<1x2xf32>
    %289 = math.exp %288 : vector<1x2xf32>
    %290 = arith.subf %110, %285 : vector<1x2xf32>
    %291 = math.exp %290 : vector<1x2xf32>
    %292 = arith.subf %135, %285 : vector<1x2xf32>
    %293 = math.exp %292 : vector<1x2xf32>
    %294 = arith.subf %160, %285 : vector<1x2xf32>
    %295 = math.exp %294 : vector<1x2xf32>
    %296 = arith.subf %185, %285 : vector<1x2xf32>
    %297 = math.exp %296 : vector<1x2xf32>
    %298 = arith.addf %287, %289 : vector<1x2xf32>
    %299 = arith.addf %298, %291 : vector<1x2xf32>
    %300 = arith.addf %299, %293 : vector<1x2xf32>
    %301 = arith.addf %300, %295 : vector<1x2xf32>
    %302 = arith.addf %301, %297 : vector<1x2xf32>
    %cst_111 = arith.constant 1.000000e+00 : f32
    %303 = vector.broadcast %cst_111 : f32 to vector<1x2xf32>
    %304 = arith.divf %303, %302 : vector<1x2xf32>
    %305 = arith.mulf %287, %304 : vector<1x2xf32>
    %306 = arith.mulf %289, %304 : vector<1x2xf32>
    %307 = arith.mulf %291, %304 : vector<1x2xf32>
    %308 = arith.mulf %293, %304 : vector<1x2xf32>
    %309 = arith.mulf %295, %304 : vector<1x2xf32>
    %310 = arith.mulf %297, %304 : vector<1x2xf32>
    %311 = arith.maximumf %65, %90 : vector<1x2xf32>
    %312 = arith.maximumf %311, %115 : vector<1x2xf32>
    %313 = arith.maximumf %312, %140 : vector<1x2xf32>
    %314 = arith.maximumf %313, %165 : vector<1x2xf32>
    %315 = arith.maximumf %314, %190 : vector<1x2xf32>
    %316 = arith.subf %65, %315 : vector<1x2xf32>
    %317 = math.exp %316 : vector<1x2xf32>
    %318 = arith.subf %90, %315 : vector<1x2xf32>
    %319 = math.exp %318 : vector<1x2xf32>
    %320 = arith.subf %115, %315 : vector<1x2xf32>
    %321 = math.exp %320 : vector<1x2xf32>
    %322 = arith.subf %140, %315 : vector<1x2xf32>
    %323 = math.exp %322 : vector<1x2xf32>
    %324 = arith.subf %165, %315 : vector<1x2xf32>
    %325 = math.exp %324 : vector<1x2xf32>
    %326 = arith.subf %190, %315 : vector<1x2xf32>
    %327 = math.exp %326 : vector<1x2xf32>
    %328 = arith.addf %317, %319 : vector<1x2xf32>
    %329 = arith.addf %328, %321 : vector<1x2xf32>
    %330 = arith.addf %329, %323 : vector<1x2xf32>
    %331 = arith.addf %330, %325 : vector<1x2xf32>
    %332 = arith.addf %331, %327 : vector<1x2xf32>
    %cst_112 = arith.constant 1.000000e+00 : f32
    %333 = vector.broadcast %cst_112 : f32 to vector<1x2xf32>
    %334 = arith.divf %333, %332 : vector<1x2xf32>
    %335 = arith.mulf %317, %334 : vector<1x2xf32>
    %336 = arith.mulf %319, %334 : vector<1x2xf32>
    %337 = arith.mulf %321, %334 : vector<1x2xf32>
    %338 = arith.mulf %323, %334 : vector<1x2xf32>
    %339 = arith.mulf %325, %334 : vector<1x2xf32>
    %340 = arith.mulf %327, %334 : vector<1x2xf32>
    %cst_113 = arith.constant 9.99999993E-9 : f32
    %341 = vector.broadcast %cst_113 : f32 to vector<1x2xf32>
    %342 = arith.addf %215, %341 : vector<1x2xf32>
    %cst_114 = arith.constant 9.99999993E-9 : f32
    %343 = vector.broadcast %cst_114 : f32 to vector<1x2xf32>
    %344 = arith.addf %245, %343 : vector<1x2xf32>
    %cst_115 = arith.constant 9.99999993E-9 : f32
    %345 = vector.broadcast %cst_115 : f32 to vector<1x2xf32>
    %346 = arith.addf %275, %345 : vector<1x2xf32>
    %cst_116 = arith.constant 9.99999993E-9 : f32
    %347 = vector.broadcast %cst_116 : f32 to vector<1x2xf32>
    %348 = arith.addf %305, %347 : vector<1x2xf32>
    %cst_117 = arith.constant 9.99999993E-9 : f32
    %349 = vector.broadcast %cst_117 : f32 to vector<1x2xf32>
    %350 = arith.addf %335, %349 : vector<1x2xf32>
    %351 = arith.addf %342, %344 : vector<1x2xf32>
    %352 = arith.addf %351, %346 : vector<1x2xf32>
    %353 = arith.addf %352, %348 : vector<1x2xf32>
    %354 = arith.addf %353, %350 : vector<1x2xf32>
    %cst_118 = arith.constant 1.000000e+00 : f32
    %355 = vector.broadcast %cst_118 : f32 to vector<1x2xf32>
    %356 = arith.divf %355, %354 : vector<1x2xf32>
    %357 = arith.mulf %342, %356 : vector<1x2xf32>
    %358 = arith.mulf %344, %356 : vector<1x2xf32>
    %359 = arith.mulf %346, %356 : vector<1x2xf32>
    %360 = arith.mulf %348, %356 : vector<1x2xf32>
    %361 = arith.mulf %350, %356 : vector<1x2xf32>
    %cst_119 = arith.constant 9.99999993E-9 : f32
    %362 = vector.broadcast %cst_119 : f32 to vector<1x2xf32>
    %363 = arith.addf %216, %362 : vector<1x2xf32>
    %cst_120 = arith.constant 9.99999993E-9 : f32
    %364 = vector.broadcast %cst_120 : f32 to vector<1x2xf32>
    %365 = arith.addf %246, %364 : vector<1x2xf32>
    %cst_121 = arith.constant 9.99999993E-9 : f32
    %366 = vector.broadcast %cst_121 : f32 to vector<1x2xf32>
    %367 = arith.addf %276, %366 : vector<1x2xf32>
    %cst_122 = arith.constant 9.99999993E-9 : f32
    %368 = vector.broadcast %cst_122 : f32 to vector<1x2xf32>
    %369 = arith.addf %306, %368 : vector<1x2xf32>
    %cst_123 = arith.constant 9.99999993E-9 : f32
    %370 = vector.broadcast %cst_123 : f32 to vector<1x2xf32>
    %371 = arith.addf %336, %370 : vector<1x2xf32>
    %372 = arith.addf %363, %365 : vector<1x2xf32>
    %373 = arith.addf %372, %367 : vector<1x2xf32>
    %374 = arith.addf %373, %369 : vector<1x2xf32>
    %375 = arith.addf %374, %371 : vector<1x2xf32>
    %cst_124 = arith.constant 1.000000e+00 : f32
    %376 = vector.broadcast %cst_124 : f32 to vector<1x2xf32>
    %377 = arith.divf %376, %375 : vector<1x2xf32>
    %378 = arith.mulf %363, %377 : vector<1x2xf32>
    %379 = arith.mulf %365, %377 : vector<1x2xf32>
    %380 = arith.mulf %367, %377 : vector<1x2xf32>
    %381 = arith.mulf %369, %377 : vector<1x2xf32>
    %382 = arith.mulf %371, %377 : vector<1x2xf32>
    %cst_125 = arith.constant 9.99999993E-9 : f32
    %383 = vector.broadcast %cst_125 : f32 to vector<1x2xf32>
    %384 = arith.addf %217, %383 : vector<1x2xf32>
    %cst_126 = arith.constant 9.99999993E-9 : f32
    %385 = vector.broadcast %cst_126 : f32 to vector<1x2xf32>
    %386 = arith.addf %247, %385 : vector<1x2xf32>
    %cst_127 = arith.constant 9.99999993E-9 : f32
    %387 = vector.broadcast %cst_127 : f32 to vector<1x2xf32>
    %388 = arith.addf %277, %387 : vector<1x2xf32>
    %cst_128 = arith.constant 9.99999993E-9 : f32
    %389 = vector.broadcast %cst_128 : f32 to vector<1x2xf32>
    %390 = arith.addf %307, %389 : vector<1x2xf32>
    %cst_129 = arith.constant 9.99999993E-9 : f32
    %391 = vector.broadcast %cst_129 : f32 to vector<1x2xf32>
    %392 = arith.addf %337, %391 : vector<1x2xf32>
    %393 = arith.addf %384, %386 : vector<1x2xf32>
    %394 = arith.addf %393, %388 : vector<1x2xf32>
    %395 = arith.addf %394, %390 : vector<1x2xf32>
    %396 = arith.addf %395, %392 : vector<1x2xf32>
    %cst_130 = arith.constant 1.000000e+00 : f32
    %397 = vector.broadcast %cst_130 : f32 to vector<1x2xf32>
    %398 = arith.divf %397, %396 : vector<1x2xf32>
    %399 = arith.mulf %384, %398 : vector<1x2xf32>
    %400 = arith.mulf %386, %398 : vector<1x2xf32>
    %401 = arith.mulf %388, %398 : vector<1x2xf32>
    %402 = arith.mulf %390, %398 : vector<1x2xf32>
    %403 = arith.mulf %392, %398 : vector<1x2xf32>
    %cst_131 = arith.constant 9.99999993E-9 : f32
    %404 = vector.broadcast %cst_131 : f32 to vector<1x2xf32>
    %405 = arith.addf %218, %404 : vector<1x2xf32>
    %cst_132 = arith.constant 9.99999993E-9 : f32
    %406 = vector.broadcast %cst_132 : f32 to vector<1x2xf32>
    %407 = arith.addf %248, %406 : vector<1x2xf32>
    %cst_133 = arith.constant 9.99999993E-9 : f32
    %408 = vector.broadcast %cst_133 : f32 to vector<1x2xf32>
    %409 = arith.addf %278, %408 : vector<1x2xf32>
    %cst_134 = arith.constant 9.99999993E-9 : f32
    %410 = vector.broadcast %cst_134 : f32 to vector<1x2xf32>
    %411 = arith.addf %308, %410 : vector<1x2xf32>
    %cst_135 = arith.constant 9.99999993E-9 : f32
    %412 = vector.broadcast %cst_135 : f32 to vector<1x2xf32>
    %413 = arith.addf %338, %412 : vector<1x2xf32>
    %414 = arith.addf %405, %407 : vector<1x2xf32>
    %415 = arith.addf %414, %409 : vector<1x2xf32>
    %416 = arith.addf %415, %411 : vector<1x2xf32>
    %417 = arith.addf %416, %413 : vector<1x2xf32>
    %cst_136 = arith.constant 1.000000e+00 : f32
    %418 = vector.broadcast %cst_136 : f32 to vector<1x2xf32>
    %419 = arith.divf %418, %417 : vector<1x2xf32>
    %420 = arith.mulf %405, %419 : vector<1x2xf32>
    %421 = arith.mulf %407, %419 : vector<1x2xf32>
    %422 = arith.mulf %409, %419 : vector<1x2xf32>
    %423 = arith.mulf %411, %419 : vector<1x2xf32>
    %424 = arith.mulf %413, %419 : vector<1x2xf32>
    %cst_137 = arith.constant 9.99999993E-9 : f32
    %425 = vector.broadcast %cst_137 : f32 to vector<1x2xf32>
    %426 = arith.addf %219, %425 : vector<1x2xf32>
    %cst_138 = arith.constant 9.99999993E-9 : f32
    %427 = vector.broadcast %cst_138 : f32 to vector<1x2xf32>
    %428 = arith.addf %249, %427 : vector<1x2xf32>
    %cst_139 = arith.constant 9.99999993E-9 : f32
    %429 = vector.broadcast %cst_139 : f32 to vector<1x2xf32>
    %430 = arith.addf %279, %429 : vector<1x2xf32>
    %cst_140 = arith.constant 9.99999993E-9 : f32
    %431 = vector.broadcast %cst_140 : f32 to vector<1x2xf32>
    %432 = arith.addf %309, %431 : vector<1x2xf32>
    %cst_141 = arith.constant 9.99999993E-9 : f32
    %433 = vector.broadcast %cst_141 : f32 to vector<1x2xf32>
    %434 = arith.addf %339, %433 : vector<1x2xf32>
    %435 = arith.addf %426, %428 : vector<1x2xf32>
    %436 = arith.addf %435, %430 : vector<1x2xf32>
    %437 = arith.addf %436, %432 : vector<1x2xf32>
    %438 = arith.addf %437, %434 : vector<1x2xf32>
    %cst_142 = arith.constant 1.000000e+00 : f32
    %439 = vector.broadcast %cst_142 : f32 to vector<1x2xf32>
    %440 = arith.divf %439, %438 : vector<1x2xf32>
    %441 = arith.mulf %426, %440 : vector<1x2xf32>
    %442 = arith.mulf %428, %440 : vector<1x2xf32>
    %443 = arith.mulf %430, %440 : vector<1x2xf32>
    %444 = arith.mulf %432, %440 : vector<1x2xf32>
    %445 = arith.mulf %434, %440 : vector<1x2xf32>
    %cst_143 = arith.constant 9.99999993E-9 : f32
    %446 = vector.broadcast %cst_143 : f32 to vector<1x2xf32>
    %447 = arith.addf %220, %446 : vector<1x2xf32>
    %cst_144 = arith.constant 9.99999993E-9 : f32
    %448 = vector.broadcast %cst_144 : f32 to vector<1x2xf32>
    %449 = arith.addf %250, %448 : vector<1x2xf32>
    %cst_145 = arith.constant 9.99999993E-9 : f32
    %450 = vector.broadcast %cst_145 : f32 to vector<1x2xf32>
    %451 = arith.addf %280, %450 : vector<1x2xf32>
    %cst_146 = arith.constant 9.99999993E-9 : f32
    %452 = vector.broadcast %cst_146 : f32 to vector<1x2xf32>
    %453 = arith.addf %310, %452 : vector<1x2xf32>
    %cst_147 = arith.constant 9.99999993E-9 : f32
    %454 = vector.broadcast %cst_147 : f32 to vector<1x2xf32>
    %455 = arith.addf %340, %454 : vector<1x2xf32>
    %456 = arith.addf %447, %449 : vector<1x2xf32>
    %457 = arith.addf %456, %451 : vector<1x2xf32>
    %458 = arith.addf %457, %453 : vector<1x2xf32>
    %459 = arith.addf %458, %455 : vector<1x2xf32>
    %cst_148 = arith.constant 1.000000e+00 : f32
    %460 = vector.broadcast %cst_148 : f32 to vector<1x2xf32>
    %461 = arith.divf %460, %459 : vector<1x2xf32>
    %462 = arith.mulf %447, %461 : vector<1x2xf32>
    %463 = arith.mulf %449, %461 : vector<1x2xf32>
    %464 = arith.mulf %451, %461 : vector<1x2xf32>
    %465 = arith.mulf %453, %461 : vector<1x2xf32>
    %466 = arith.mulf %455, %461 : vector<1x2xf32>
    %cst_149 = arith.constant 1.000000e+00 : f32
    %467 = vector.broadcast %cst_149 : f32 to vector<1x2xf32>
    %468 = arith.subf %467, %361 : vector<1x2xf32>
    %cst_150 = arith.constant 1.000000e+00 : f32
    %469 = vector.broadcast %cst_150 : f32 to vector<1x2xf32>
    %470 = arith.subf %469, %382 : vector<1x2xf32>
    %cst_151 = arith.constant 1.000000e+00 : f32
    %471 = vector.broadcast %cst_151 : f32 to vector<1x2xf32>
    %472 = arith.subf %471, %403 : vector<1x2xf32>
    %cst_152 = arith.constant 1.000000e+00 : f32
    %473 = vector.broadcast %cst_152 : f32 to vector<1x2xf32>
    %474 = arith.subf %473, %424 : vector<1x2xf32>
    %cst_153 = arith.constant 1.000000e+00 : f32
    %475 = vector.broadcast %cst_153 : f32 to vector<1x2xf32>
    %476 = arith.subf %475, %445 : vector<1x2xf32>
    %cst_154 = arith.constant 1.000000e+00 : f32
    %477 = vector.broadcast %cst_154 : f32 to vector<1x2xf32>
    %478 = arith.subf %477, %466 : vector<1x2xf32>
    %cst_155 = arith.constant 0.000000e+00 : f32
    %479 = vector.broadcast %cst_155 : f32 to vector<1x2xf32>
    %cst_156 = arith.constant 0.000000e+00 : f32
    %480 = vector.broadcast %cst_156 : f32 to vector<1x2xf32>
    %cst_157 = arith.constant 0.000000e+00 : f32
    %481 = vector.broadcast %cst_157 : f32 to vector<1x2xf32>
    %cst_158 = arith.constant 0.000000e+00 : f32
    %482 = vector.broadcast %cst_158 : f32 to vector<1x2xf32>
    %cst_159 = arith.constant 0.000000e+00 : f32
    %483 = vector.broadcast %cst_159 : f32 to vector<1x2xf32>
    %cst_160 = arith.constant 0.000000e+00 : f32
    %484 = vector.broadcast %cst_160 : f32 to vector<1x2xf32>
    %cst_161 = arith.constant 0.000000e+00 : f32
    %485 = vector.broadcast %cst_161 : f32 to vector<1x2xf32>
    %486 = arith.cmpf ogt, %479, %485 : vector<1x2xf32>
    %cst_162 = arith.constant 0xFF800000 : f32
    %487 = vector.broadcast %cst_162 : f32 to vector<1x2xf32>
    %488 = arith.select %486, %487, %468 : vector<1x2xi1>, vector<1x2xf32>
    %cst_163 = arith.constant 0.000000e+00 : f32
    %489 = vector.broadcast %cst_163 : f32 to vector<1x2xf32>
    %490 = arith.cmpf ogt, %480, %489 : vector<1x2xf32>
    %cst_164 = arith.constant 0xFF800000 : f32
    %491 = vector.broadcast %cst_164 : f32 to vector<1x2xf32>
    %492 = arith.select %490, %491, %470 : vector<1x2xi1>, vector<1x2xf32>
    %cst_165 = arith.constant 0.000000e+00 : f32
    %493 = vector.broadcast %cst_165 : f32 to vector<1x2xf32>
    %494 = arith.cmpf ogt, %481, %493 : vector<1x2xf32>
    %cst_166 = arith.constant 0xFF800000 : f32
    %495 = vector.broadcast %cst_166 : f32 to vector<1x2xf32>
    %496 = arith.select %494, %495, %472 : vector<1x2xi1>, vector<1x2xf32>
    %cst_167 = arith.constant 0.000000e+00 : f32
    %497 = vector.broadcast %cst_167 : f32 to vector<1x2xf32>
    %498 = arith.cmpf ogt, %482, %497 : vector<1x2xf32>
    %cst_168 = arith.constant 0xFF800000 : f32
    %499 = vector.broadcast %cst_168 : f32 to vector<1x2xf32>
    %500 = arith.select %498, %499, %474 : vector<1x2xi1>, vector<1x2xf32>
    %cst_169 = arith.constant 0.000000e+00 : f32
    %501 = vector.broadcast %cst_169 : f32 to vector<1x2xf32>
    %502 = arith.cmpf ogt, %483, %501 : vector<1x2xf32>
    %cst_170 = arith.constant 0xFF800000 : f32
    %503 = vector.broadcast %cst_170 : f32 to vector<1x2xf32>
    %504 = arith.select %502, %503, %476 : vector<1x2xi1>, vector<1x2xf32>
    %cst_171 = arith.constant 0.000000e+00 : f32
    %505 = vector.broadcast %cst_171 : f32 to vector<1x2xf32>
    %506 = arith.cmpf ogt, %484, %505 : vector<1x2xf32>
    %cst_172 = arith.constant 0xFF800000 : f32
    %507 = vector.broadcast %cst_172 : f32 to vector<1x2xf32>
    %508 = arith.select %506, %507, %478 : vector<1x2xi1>, vector<1x2xf32>
    %509 = arith.maximumf %488, %492 : vector<1x2xf32>
    %510 = arith.maximumf %509, %496 : vector<1x2xf32>
    %511 = arith.maximumf %510, %500 : vector<1x2xf32>
    %512 = arith.maximumf %511, %504 : vector<1x2xf32>
    %513 = arith.maximumf %512, %508 : vector<1x2xf32>
    %cst_173 = arith.constant 6.000000e+00 : f32
    %514 = vector.broadcast %cst_173 : f32 to vector<1x2xf32>
    %515 = arith.cmpf oeq, %508, %513 : vector<1x2xf32>
    %cst_174 = arith.constant 5.000000e+00 : f32
    %516 = vector.broadcast %cst_174 : f32 to vector<1x2xf32>
    %517 = arith.select %515, %516, %514 : vector<1x2xi1>, vector<1x2xf32>
    %518 = arith.cmpf oeq, %504, %513 : vector<1x2xf32>
    %cst_175 = arith.constant 4.000000e+00 : f32
    %519 = vector.broadcast %cst_175 : f32 to vector<1x2xf32>
    %520 = arith.select %518, %519, %517 : vector<1x2xi1>, vector<1x2xf32>
    %521 = arith.cmpf oeq, %500, %513 : vector<1x2xf32>
    %cst_176 = arith.constant 3.000000e+00 : f32
    %522 = vector.broadcast %cst_176 : f32 to vector<1x2xf32>
    %523 = arith.select %521, %522, %520 : vector<1x2xi1>, vector<1x2xf32>
    %524 = arith.cmpf oeq, %496, %513 : vector<1x2xf32>
    %cst_177 = arith.constant 2.000000e+00 : f32
    %525 = vector.broadcast %cst_177 : f32 to vector<1x2xf32>
    %526 = arith.select %524, %525, %523 : vector<1x2xi1>, vector<1x2xf32>
    %527 = arith.cmpf oeq, %492, %513 : vector<1x2xf32>
    %cst_178 = arith.constant 1.000000e+00 : f32
    %528 = vector.broadcast %cst_178 : f32 to vector<1x2xf32>
    %529 = arith.select %527, %528, %526 : vector<1x2xi1>, vector<1x2xf32>
    %530 = arith.cmpf oeq, %488, %513 : vector<1x2xf32>
    %cst_179 = arith.constant 0.000000e+00 : f32
    %531 = vector.broadcast %cst_179 : f32 to vector<1x2xf32>
    %532 = arith.select %530, %531, %529 : vector<1x2xi1>, vector<1x2xf32>
    %cst_180 = arith.constant 0.000000e+00 : f32
    %533 = vector.broadcast %cst_180 : f32 to vector<1x2xf32>
    %534 = arith.cmpf oeq, %532, %533 : vector<1x2xf32>
    %cst_181 = arith.constant 1.000000e+00 : f32
    %535 = vector.broadcast %cst_181 : f32 to vector<1x2xf32>
    %536 = arith.select %534, %535, %479 : vector<1x2xi1>, vector<1x2xf32>
    %cst_182 = arith.constant 1.000000e+00 : f32
    %537 = vector.broadcast %cst_182 : f32 to vector<1x2xf32>
    %538 = arith.cmpf oeq, %532, %537 : vector<1x2xf32>
    %cst_183 = arith.constant 1.000000e+00 : f32
    %539 = vector.broadcast %cst_183 : f32 to vector<1x2xf32>
    %540 = arith.select %538, %539, %480 : vector<1x2xi1>, vector<1x2xf32>
    %cst_184 = arith.constant 2.000000e+00 : f32
    %541 = vector.broadcast %cst_184 : f32 to vector<1x2xf32>
    %542 = arith.cmpf oeq, %532, %541 : vector<1x2xf32>
    %cst_185 = arith.constant 1.000000e+00 : f32
    %543 = vector.broadcast %cst_185 : f32 to vector<1x2xf32>
    %544 = arith.select %542, %543, %481 : vector<1x2xi1>, vector<1x2xf32>
    %cst_186 = arith.constant 3.000000e+00 : f32
    %545 = vector.broadcast %cst_186 : f32 to vector<1x2xf32>
    %546 = arith.cmpf oeq, %532, %545 : vector<1x2xf32>
    %cst_187 = arith.constant 1.000000e+00 : f32
    %547 = vector.broadcast %cst_187 : f32 to vector<1x2xf32>
    %548 = arith.select %546, %547, %482 : vector<1x2xi1>, vector<1x2xf32>
    %cst_188 = arith.constant 4.000000e+00 : f32
    %549 = vector.broadcast %cst_188 : f32 to vector<1x2xf32>
    %550 = arith.cmpf oeq, %532, %549 : vector<1x2xf32>
    %cst_189 = arith.constant 1.000000e+00 : f32
    %551 = vector.broadcast %cst_189 : f32 to vector<1x2xf32>
    %552 = arith.select %550, %551, %483 : vector<1x2xi1>, vector<1x2xf32>
    %cst_190 = arith.constant 5.000000e+00 : f32
    %553 = vector.broadcast %cst_190 : f32 to vector<1x2xf32>
    %554 = arith.cmpf oeq, %532, %553 : vector<1x2xf32>
    %cst_191 = arith.constant 1.000000e+00 : f32
    %555 = vector.broadcast %cst_191 : f32 to vector<1x2xf32>
    %556 = arith.select %554, %555, %484 : vector<1x2xi1>, vector<1x2xf32>
    %cst_192 = arith.constant 0.000000e+00 : f32
    %557 = vector.broadcast %cst_192 : f32 to vector<1x2xf32>
    %558 = arith.cmpf ogt, %536, %557 : vector<1x2xf32>
    %cst_193 = arith.constant 0xFF800000 : f32
    %559 = vector.broadcast %cst_193 : f32 to vector<1x2xf32>
    %560 = arith.select %558, %559, %468 : vector<1x2xi1>, vector<1x2xf32>
    %cst_194 = arith.constant 0.000000e+00 : f32
    %561 = vector.broadcast %cst_194 : f32 to vector<1x2xf32>
    %562 = arith.cmpf ogt, %540, %561 : vector<1x2xf32>
    %cst_195 = arith.constant 0xFF800000 : f32
    %563 = vector.broadcast %cst_195 : f32 to vector<1x2xf32>
    %564 = arith.select %562, %563, %470 : vector<1x2xi1>, vector<1x2xf32>
    %cst_196 = arith.constant 0.000000e+00 : f32
    %565 = vector.broadcast %cst_196 : f32 to vector<1x2xf32>
    %566 = arith.cmpf ogt, %544, %565 : vector<1x2xf32>
    %cst_197 = arith.constant 0xFF800000 : f32
    %567 = vector.broadcast %cst_197 : f32 to vector<1x2xf32>
    %568 = arith.select %566, %567, %472 : vector<1x2xi1>, vector<1x2xf32>
    %cst_198 = arith.constant 0.000000e+00 : f32
    %569 = vector.broadcast %cst_198 : f32 to vector<1x2xf32>
    %570 = arith.cmpf ogt, %548, %569 : vector<1x2xf32>
    %cst_199 = arith.constant 0xFF800000 : f32
    %571 = vector.broadcast %cst_199 : f32 to vector<1x2xf32>
    %572 = arith.select %570, %571, %474 : vector<1x2xi1>, vector<1x2xf32>
    %cst_200 = arith.constant 0.000000e+00 : f32
    %573 = vector.broadcast %cst_200 : f32 to vector<1x2xf32>
    %574 = arith.cmpf ogt, %552, %573 : vector<1x2xf32>
    %cst_201 = arith.constant 0xFF800000 : f32
    %575 = vector.broadcast %cst_201 : f32 to vector<1x2xf32>
    %576 = arith.select %574, %575, %476 : vector<1x2xi1>, vector<1x2xf32>
    %cst_202 = arith.constant 0.000000e+00 : f32
    %577 = vector.broadcast %cst_202 : f32 to vector<1x2xf32>
    %578 = arith.cmpf ogt, %556, %577 : vector<1x2xf32>
    %cst_203 = arith.constant 0xFF800000 : f32
    %579 = vector.broadcast %cst_203 : f32 to vector<1x2xf32>
    %580 = arith.select %578, %579, %478 : vector<1x2xi1>, vector<1x2xf32>
    %581 = arith.maximumf %560, %564 : vector<1x2xf32>
    %582 = arith.maximumf %581, %568 : vector<1x2xf32>
    %583 = arith.maximumf %582, %572 : vector<1x2xf32>
    %584 = arith.maximumf %583, %576 : vector<1x2xf32>
    %585 = arith.maximumf %584, %580 : vector<1x2xf32>
    %cst_204 = arith.constant 6.000000e+00 : f32
    %586 = vector.broadcast %cst_204 : f32 to vector<1x2xf32>
    %587 = arith.cmpf oeq, %580, %585 : vector<1x2xf32>
    %cst_205 = arith.constant 5.000000e+00 : f32
    %588 = vector.broadcast %cst_205 : f32 to vector<1x2xf32>
    %589 = arith.select %587, %588, %586 : vector<1x2xi1>, vector<1x2xf32>
    %590 = arith.cmpf oeq, %576, %585 : vector<1x2xf32>
    %cst_206 = arith.constant 4.000000e+00 : f32
    %591 = vector.broadcast %cst_206 : f32 to vector<1x2xf32>
    %592 = arith.select %590, %591, %589 : vector<1x2xi1>, vector<1x2xf32>
    %593 = arith.cmpf oeq, %572, %585 : vector<1x2xf32>
    %cst_207 = arith.constant 3.000000e+00 : f32
    %594 = vector.broadcast %cst_207 : f32 to vector<1x2xf32>
    %595 = arith.select %593, %594, %592 : vector<1x2xi1>, vector<1x2xf32>
    %596 = arith.cmpf oeq, %568, %585 : vector<1x2xf32>
    %cst_208 = arith.constant 2.000000e+00 : f32
    %597 = vector.broadcast %cst_208 : f32 to vector<1x2xf32>
    %598 = arith.select %596, %597, %595 : vector<1x2xi1>, vector<1x2xf32>
    %599 = arith.cmpf oeq, %564, %585 : vector<1x2xf32>
    %cst_209 = arith.constant 1.000000e+00 : f32
    %600 = vector.broadcast %cst_209 : f32 to vector<1x2xf32>
    %601 = arith.select %599, %600, %598 : vector<1x2xi1>, vector<1x2xf32>
    %602 = arith.cmpf oeq, %560, %585 : vector<1x2xf32>
    %cst_210 = arith.constant 0.000000e+00 : f32
    %603 = vector.broadcast %cst_210 : f32 to vector<1x2xf32>
    %604 = arith.select %602, %603, %601 : vector<1x2xi1>, vector<1x2xf32>
    %cst_211 = arith.constant 0.000000e+00 : f32
    %605 = vector.broadcast %cst_211 : f32 to vector<1x2xf32>
    %606 = arith.cmpf oeq, %604, %605 : vector<1x2xf32>
    %cst_212 = arith.constant 1.000000e+00 : f32
    %607 = vector.broadcast %cst_212 : f32 to vector<1x2xf32>
    %608 = arith.select %606, %607, %536 : vector<1x2xi1>, vector<1x2xf32>
    %cst_213 = arith.constant 1.000000e+00 : f32
    %609 = vector.broadcast %cst_213 : f32 to vector<1x2xf32>
    %610 = arith.cmpf oeq, %604, %609 : vector<1x2xf32>
    %cst_214 = arith.constant 1.000000e+00 : f32
    %611 = vector.broadcast %cst_214 : f32 to vector<1x2xf32>
    %612 = arith.select %610, %611, %540 : vector<1x2xi1>, vector<1x2xf32>
    %cst_215 = arith.constant 2.000000e+00 : f32
    %613 = vector.broadcast %cst_215 : f32 to vector<1x2xf32>
    %614 = arith.cmpf oeq, %604, %613 : vector<1x2xf32>
    %cst_216 = arith.constant 1.000000e+00 : f32
    %615 = vector.broadcast %cst_216 : f32 to vector<1x2xf32>
    %616 = arith.select %614, %615, %544 : vector<1x2xi1>, vector<1x2xf32>
    %cst_217 = arith.constant 3.000000e+00 : f32
    %617 = vector.broadcast %cst_217 : f32 to vector<1x2xf32>
    %618 = arith.cmpf oeq, %604, %617 : vector<1x2xf32>
    %cst_218 = arith.constant 1.000000e+00 : f32
    %619 = vector.broadcast %cst_218 : f32 to vector<1x2xf32>
    %620 = arith.select %618, %619, %548 : vector<1x2xi1>, vector<1x2xf32>
    %cst_219 = arith.constant 4.000000e+00 : f32
    %621 = vector.broadcast %cst_219 : f32 to vector<1x2xf32>
    %622 = arith.cmpf oeq, %604, %621 : vector<1x2xf32>
    %cst_220 = arith.constant 1.000000e+00 : f32
    %623 = vector.broadcast %cst_220 : f32 to vector<1x2xf32>
    %624 = arith.select %622, %623, %552 : vector<1x2xi1>, vector<1x2xf32>
    %cst_221 = arith.constant 5.000000e+00 : f32
    %625 = vector.broadcast %cst_221 : f32 to vector<1x2xf32>
    %626 = arith.cmpf oeq, %604, %625 : vector<1x2xf32>
    %cst_222 = arith.constant 1.000000e+00 : f32
    %627 = vector.broadcast %cst_222 : f32 to vector<1x2xf32>
    %628 = arith.select %626, %627, %556 : vector<1x2xi1>, vector<1x2xf32>
    %cst_223 = arith.constant 0.000000e+00 : f32
    %629 = vector.broadcast %cst_223 : f32 to vector<1x2xf32>
    %630 = arith.cmpf ogt, %608, %629 : vector<1x2xf32>
    %cst_224 = arith.constant 0xFF800000 : f32
    %631 = vector.broadcast %cst_224 : f32 to vector<1x2xf32>
    %632 = arith.select %630, %631, %468 : vector<1x2xi1>, vector<1x2xf32>
    %cst_225 = arith.constant 0.000000e+00 : f32
    %633 = vector.broadcast %cst_225 : f32 to vector<1x2xf32>
    %634 = arith.cmpf ogt, %612, %633 : vector<1x2xf32>
    %cst_226 = arith.constant 0xFF800000 : f32
    %635 = vector.broadcast %cst_226 : f32 to vector<1x2xf32>
    %636 = arith.select %634, %635, %470 : vector<1x2xi1>, vector<1x2xf32>
    %cst_227 = arith.constant 0.000000e+00 : f32
    %637 = vector.broadcast %cst_227 : f32 to vector<1x2xf32>
    %638 = arith.cmpf ogt, %616, %637 : vector<1x2xf32>
    %cst_228 = arith.constant 0xFF800000 : f32
    %639 = vector.broadcast %cst_228 : f32 to vector<1x2xf32>
    %640 = arith.select %638, %639, %472 : vector<1x2xi1>, vector<1x2xf32>
    %cst_229 = arith.constant 0.000000e+00 : f32
    %641 = vector.broadcast %cst_229 : f32 to vector<1x2xf32>
    %642 = arith.cmpf ogt, %620, %641 : vector<1x2xf32>
    %cst_230 = arith.constant 0xFF800000 : f32
    %643 = vector.broadcast %cst_230 : f32 to vector<1x2xf32>
    %644 = arith.select %642, %643, %474 : vector<1x2xi1>, vector<1x2xf32>
    %cst_231 = arith.constant 0.000000e+00 : f32
    %645 = vector.broadcast %cst_231 : f32 to vector<1x2xf32>
    %646 = arith.cmpf ogt, %624, %645 : vector<1x2xf32>
    %cst_232 = arith.constant 0xFF800000 : f32
    %647 = vector.broadcast %cst_232 : f32 to vector<1x2xf32>
    %648 = arith.select %646, %647, %476 : vector<1x2xi1>, vector<1x2xf32>
    %cst_233 = arith.constant 0.000000e+00 : f32
    %649 = vector.broadcast %cst_233 : f32 to vector<1x2xf32>
    %650 = arith.cmpf ogt, %628, %649 : vector<1x2xf32>
    %cst_234 = arith.constant 0xFF800000 : f32
    %651 = vector.broadcast %cst_234 : f32 to vector<1x2xf32>
    %652 = arith.select %650, %651, %478 : vector<1x2xi1>, vector<1x2xf32>
    %653 = arith.maximumf %632, %636 : vector<1x2xf32>
    %654 = arith.maximumf %653, %640 : vector<1x2xf32>
    %655 = arith.maximumf %654, %644 : vector<1x2xf32>
    %656 = arith.maximumf %655, %648 : vector<1x2xf32>
    %657 = arith.maximumf %656, %652 : vector<1x2xf32>
    %cst_235 = arith.constant 6.000000e+00 : f32
    %658 = vector.broadcast %cst_235 : f32 to vector<1x2xf32>
    %659 = arith.cmpf oeq, %652, %657 : vector<1x2xf32>
    %cst_236 = arith.constant 5.000000e+00 : f32
    %660 = vector.broadcast %cst_236 : f32 to vector<1x2xf32>
    %661 = arith.select %659, %660, %658 : vector<1x2xi1>, vector<1x2xf32>
    %662 = arith.cmpf oeq, %648, %657 : vector<1x2xf32>
    %cst_237 = arith.constant 4.000000e+00 : f32
    %663 = vector.broadcast %cst_237 : f32 to vector<1x2xf32>
    %664 = arith.select %662, %663, %661 : vector<1x2xi1>, vector<1x2xf32>
    %665 = arith.cmpf oeq, %644, %657 : vector<1x2xf32>
    %cst_238 = arith.constant 3.000000e+00 : f32
    %666 = vector.broadcast %cst_238 : f32 to vector<1x2xf32>
    %667 = arith.select %665, %666, %664 : vector<1x2xi1>, vector<1x2xf32>
    %668 = arith.cmpf oeq, %640, %657 : vector<1x2xf32>
    %cst_239 = arith.constant 2.000000e+00 : f32
    %669 = vector.broadcast %cst_239 : f32 to vector<1x2xf32>
    %670 = arith.select %668, %669, %667 : vector<1x2xi1>, vector<1x2xf32>
    %671 = arith.cmpf oeq, %636, %657 : vector<1x2xf32>
    %cst_240 = arith.constant 1.000000e+00 : f32
    %672 = vector.broadcast %cst_240 : f32 to vector<1x2xf32>
    %673 = arith.select %671, %672, %670 : vector<1x2xi1>, vector<1x2xf32>
    %674 = arith.cmpf oeq, %632, %657 : vector<1x2xf32>
    %cst_241 = arith.constant 0.000000e+00 : f32
    %675 = vector.broadcast %cst_241 : f32 to vector<1x2xf32>
    %676 = arith.select %674, %675, %673 : vector<1x2xi1>, vector<1x2xf32>
    %cst_242 = arith.constant 0.000000e+00 : f32
    %677 = vector.broadcast %cst_242 : f32 to vector<1x2xf32>
    %678 = arith.cmpf oeq, %676, %677 : vector<1x2xf32>
    %cst_243 = arith.constant 1.000000e+00 : f32
    %679 = vector.broadcast %cst_243 : f32 to vector<1x2xf32>
    %680 = arith.select %678, %679, %608 : vector<1x2xi1>, vector<1x2xf32>
    %cst_244 = arith.constant 1.000000e+00 : f32
    %681 = vector.broadcast %cst_244 : f32 to vector<1x2xf32>
    %682 = arith.cmpf oeq, %676, %681 : vector<1x2xf32>
    %cst_245 = arith.constant 1.000000e+00 : f32
    %683 = vector.broadcast %cst_245 : f32 to vector<1x2xf32>
    %684 = arith.select %682, %683, %612 : vector<1x2xi1>, vector<1x2xf32>
    %cst_246 = arith.constant 2.000000e+00 : f32
    %685 = vector.broadcast %cst_246 : f32 to vector<1x2xf32>
    %686 = arith.cmpf oeq, %676, %685 : vector<1x2xf32>
    %cst_247 = arith.constant 1.000000e+00 : f32
    %687 = vector.broadcast %cst_247 : f32 to vector<1x2xf32>
    %688 = arith.select %686, %687, %616 : vector<1x2xi1>, vector<1x2xf32>
    %cst_248 = arith.constant 3.000000e+00 : f32
    %689 = vector.broadcast %cst_248 : f32 to vector<1x2xf32>
    %690 = arith.cmpf oeq, %676, %689 : vector<1x2xf32>
    %cst_249 = arith.constant 1.000000e+00 : f32
    %691 = vector.broadcast %cst_249 : f32 to vector<1x2xf32>
    %692 = arith.select %690, %691, %620 : vector<1x2xi1>, vector<1x2xf32>
    %cst_250 = arith.constant 4.000000e+00 : f32
    %693 = vector.broadcast %cst_250 : f32 to vector<1x2xf32>
    %694 = arith.cmpf oeq, %676, %693 : vector<1x2xf32>
    %cst_251 = arith.constant 1.000000e+00 : f32
    %695 = vector.broadcast %cst_251 : f32 to vector<1x2xf32>
    %696 = arith.select %694, %695, %624 : vector<1x2xi1>, vector<1x2xf32>
    %cst_252 = arith.constant 5.000000e+00 : f32
    %697 = vector.broadcast %cst_252 : f32 to vector<1x2xf32>
    %698 = arith.cmpf oeq, %676, %697 : vector<1x2xf32>
    %cst_253 = arith.constant 1.000000e+00 : f32
    %699 = vector.broadcast %cst_253 : f32 to vector<1x2xf32>
    %700 = arith.select %698, %699, %628 : vector<1x2xi1>, vector<1x2xf32>
    %701 = vector.broadcast %357 : vector<1x2xf32> to vector<16x2xf32>
    %702 = arith.mulf %701, %6 : vector<16x2xf32>
    %703 = vector.broadcast %358 : vector<1x2xf32> to vector<16x2xf32>
    %704 = arith.mulf %703, %10 : vector<16x2xf32>
    %705 = arith.addf %702, %704 : vector<16x2xf32>
    %706 = vector.broadcast %359 : vector<1x2xf32> to vector<16x2xf32>
    %707 = arith.mulf %706, %14 : vector<16x2xf32>
    %708 = arith.addf %705, %707 : vector<16x2xf32>
    %709 = vector.broadcast %360 : vector<1x2xf32> to vector<16x2xf32>
    %710 = arith.mulf %709, %18 : vector<16x2xf32>
    %711 = arith.addf %708, %710 : vector<16x2xf32>
    %712 = vector.broadcast %361 : vector<1x2xf32> to vector<16x2xf32>
    %713 = arith.mulf %712, %22 : vector<16x2xf32>
    %714 = arith.addf %711, %713 : vector<16x2xf32>
    %715 = vector.broadcast %680 : vector<1x2xf32> to vector<16x2xf32>
    %716 = arith.mulf %714, %715 : vector<16x2xf32>
    %c0_254 = arith.constant 0 : index
    %c0_255 = arith.constant 0 : index
    %c0_256 = arith.constant 0 : index
    %717 = vector.load %arg6[%c0_254, %c0_255, %c0_256] : memref<6x16x2xf32, #tpu.memory_space<vmem>>, vector<1x16x2xf32>
    %718 = vector.shape_cast %717 : vector<1x16x2xf32> to vector<16x2xf32>
    %719 = vector.shape_cast %716 : vector<16x2xf32> to vector<1x16x2xf32>
    tpu.vector_store %arg6[%c0_254, %c0_255, %c0_256], %719 {strides = array<i32>} : memref<6x16x2xf32, #tpu.memory_space<vmem>>, vector<1x16x2xf32>,
    %c0_257 = arith.constant 0 : index
    %c0_258 = arith.constant 0 : index
    %720 = vector.load %arg7[%c0_257, %c0_258] : memref<6x2xf32, #tpu.memory_space<vmem>>, vector<1x2xf32>
    tpu.vector_store %arg7[%c0_257, %c0_258], %680 {strides = array<i32>} : memref<6x2xf32, #tpu.memory_space<vmem>>, vector<1x2xf32>,
    %c0_259 = arith.constant 0 : index
    %c0_260 = arith.constant 0 : index
    %c0_261 = arith.constant 0 : index
    %721 = vector.load %arg8[%c0_259, %c0_260, %c0_261] : memref<6x5x2xf32, #tpu.memory_space<vmem>>, vector<1x1x2xf32>
    %722 = vector.shape_cast %721 : vector<1x1x2xf32> to vector<1x2xf32>
    %723 = vector.shape_cast %357 : vector<1x2xf32> to vector<1x1x2xf32>
    tpu.vector_store %arg8[%c0_259, %c0_260, %c0_261], %723 {strides = array<i32>} : memref<6x5x2xf32, #tpu.memory_space<vmem>>, vector<1x1x2xf32>,
    %c0_262 = arith.constant 0 : index
    %c1_263 = arith.constant 1 : index
    %c0_264 = arith.constant 0 : index
    %724 = vector.load %arg8[%c0_262, %c1_263, %c0_264] : memref<6x5x2xf32, #tpu.memory_space<vmem>>, vector<1x1x2xf32>
    %725 = vector.shape_cast %724 : vector<1x1x2xf32> to vector<1x2xf32>
    %726 = vector.shape_cast %358 : vector<1x2xf32> to vector<1x1x2xf32>
    tpu.vector_store %arg8[%c0_262, %c1_263, %c0_264], %726 {strides = array<i32>} : memref<6x5x2xf32, #tpu.memory_space<vmem>>, vector<1x1x2xf32>,
    %c0_265 = arith.constant 0 : index
    %c2_266 = arith.constant 2 : index
    %c0_267 = arith.constant 0 : index
    %727 = vector.load %arg8[%c0_265, %c2_266, %c0_267] : memref<6x5x2xf32, #tpu.memory_space<vmem>>, vector<1x1x2xf32>
    %728 = vector.shape_cast %727 : vector<1x1x2xf32> to vector<1x2xf32>
    %729 = vector.shape_cast %359 : vector<1x2xf32> to vector<1x1x2xf32>
    tpu.vector_store %arg8[%c0_265, %c2_266, %c0_267], %729 {strides = array<i32>} : memref<6x5x2xf32, #tpu.memory_space<vmem>>, vector<1x1x2xf32>,
    %c0_268 = arith.constant 0 : index
    %c3_269 = arith.constant 3 : index
    %c0_270 = arith.constant 0 : index
    %730 = vector.load %arg8[%c0_268, %c3_269, %c0_270] : memref<6x5x2xf32, #tpu.memory_space<vmem>>, vector<1x1x2xf32>
    %731 = vector.shape_cast %730 : vector<1x1x2xf32> to vector<1x2xf32>
    %732 = vector.shape_cast %360 : vector<1x2xf32> to vector<1x1x2xf32>
    tpu.vector_store %arg8[%c0_268, %c3_269, %c0_270], %732 {strides = array<i32>} : memref<6x5x2xf32, #tpu.memory_space<vmem>>, vector<1x1x2xf32>,
    %c0_271 = arith.constant 0 : index
    %c4_272 = arith.constant 4 : index
    %c0_273 = arith.constant 0 : index
    %733 = vector.load %arg8[%c0_271, %c4_272, %c0_273] : memref<6x5x2xf32, #tpu.memory_space<vmem>>, vector<1x1x2xf32>
    %734 = vector.shape_cast %733 : vector<1x1x2xf32> to vector<1x2xf32>
    %735 = vector.shape_cast %361 : vector<1x2xf32> to vector<1x1x2xf32>
    tpu.vector_store %arg8[%c0_271, %c4_272, %c0_273], %735 {strides = array<i32>} : memref<6x5x2xf32, #tpu.memory_space<vmem>>, vector<1x1x2xf32>,
    %736 = vector.broadcast %378 : vector<1x2xf32> to vector<16x2xf32>
    %737 = arith.mulf %736, %6 : vector<16x2xf32>
    %738 = vector.broadcast %379 : vector<1x2xf32> to vector<16x2xf32>
    %739 = arith.mulf %738, %10 : vector<16x2xf32>
    %740 = arith.addf %737, %739 : vector<16x2xf32>
    %741 = vector.broadcast %380 : vector<1x2xf32> to vector<16x2xf32>
    %742 = arith.mulf %741, %14 : vector<16x2xf32>
    %743 = arith.addf %740, %742 : vector<16x2xf32>
    %744 = vector.broadcast %381 : vector<1x2xf32> to vector<16x2xf32>
    %745 = arith.mulf %744, %18 : vector<16x2xf32>
    %746 = arith.addf %743, %745 : vector<16x2xf32>
    %747 = vector.broadcast %382 : vector<1x2xf32> to vector<16x2xf32>
    %748 = arith.mulf %747, %22 : vector<16x2xf32>
    %749 = arith.addf %746, %748 : vector<16x2xf32>
    %750 = vector.broadcast %684 : vector<1x2xf32> to vector<16x2xf32>
    %751 = arith.mulf %749, %750 : vector<16x2xf32>
    %c1_274 = arith.constant 1 : index
    %c0_275 = arith.constant 0 : index
    %c0_276 = arith.constant 0 : index
    %752 = vector.load %arg6[%c1_274, %c0_275, %c0_276] : memref<6x16x2xf32, #tpu.memory_space<vmem>>, vector<1x16x2xf32>
    %753 = vector.shape_cast %752 : vector<1x16x2xf32> to vector<16x2xf32>
    %754 = vector.shape_cast %751 : vector<16x2xf32> to vector<1x16x2xf32>
    tpu.vector_store %arg6[%c1_274, %c0_275, %c0_276], %754 {strides = array<i32>} : memref<6x16x2xf32, #tpu.memory_space<vmem>>, vector<1x16x2xf32>,
    %c1_277 = arith.constant 1 : index
    %c0_278 = arith.constant 0 : index
    %755 = vector.load %arg7[%c1_277, %c0_278] : memref<6x2xf32, #tpu.memory_space<vmem>>, vector<1x2xf32>
    tpu.vector_store %arg7[%c1_277, %c0_278], %684 {strides = array<i32>} : memref<6x2xf32, #tpu.memory_space<vmem>>, vector<1x2xf32>,
    %c1_279 = arith.constant 1 : index
    %c0_280 = arith.constant 0 : index
    %c0_281 = arith.constant 0 : index
    %756 = vector.load %arg8[%c1_279, %c0_280, %c0_281] : memref<6x5x2xf32, #tpu.memory_space<vmem>>, vector<1x1x2xf32>
    %757 = vector.shape_cast %756 : vector<1x1x2xf32> to vector<1x2xf32>
    %758 = vector.shape_cast %378 : vector<1x2xf32> to vector<1x1x2xf32>
    tpu.vector_store %arg8[%c1_279, %c0_280, %c0_281], %758 {strides = array<i32>} : memref<6x5x2xf32, #tpu.memory_space<vmem>>, vector<1x1x2xf32>,
    %c1_282 = arith.constant 1 : index
    %c1_283 = arith.constant 1 : index
    %c0_284 = arith.constant 0 : index
    %759 = vector.load %arg8[%c1_282, %c1_283, %c0_284] : memref<6x5x2xf32, #tpu.memory_space<vmem>>, vector<1x1x2xf32>
    %760 = vector.shape_cast %759 : vector<1x1x2xf32> to vector<1x2xf32>
    %761 = vector.shape_cast %379 : vector<1x2xf32> to vector<1x1x2xf32>
    tpu.vector_store %arg8[%c1_282, %c1_283, %c0_284], %761 {strides = array<i32>} : memref<6x5x2xf32, #tpu.memory_space<vmem>>, vector<1x1x2xf32>,
    %c1_285 = arith.constant 1 : index
    %c2_286 = arith.constant 2 : index
    %c0_287 = arith.constant 0 : index
    %762 = vector.load %arg8[%c1_285, %c2_286, %c0_287] : memref<6x5x2xf32, #tpu.memory_space<vmem>>, vector<1x1x2xf32>
    %763 = vector.shape_cast %762 : vector<1x1x2xf32> to vector<1x2xf32>
    %764 = vector.shape_cast %380 : vector<1x2xf32> to vector<1x1x2xf32>
    tpu.vector_store %arg8[%c1_285, %c2_286, %c0_287], %764 {strides = array<i32>} : memref<6x5x2xf32, #tpu.memory_space<vmem>>, vector<1x1x2xf32>,
    %c1_288 = arith.constant 1 : index
    %c3_289 = arith.constant 3 : index
    %c0_290 = arith.constant 0 : index
    %765 = vector.load %arg8[%c1_288, %c3_289, %c0_290] : memref<6x5x2xf32, #tpu.memory_space<vmem>>, vector<1x1x2xf32>
    %766 = vector.shape_cast %765 : vector<1x1x2xf32> to vector<1x2xf32>
    %767 = vector.shape_cast %381 : vector<1x2xf32> to vector<1x1x2xf32>
    tpu.vector_store %arg8[%c1_288, %c3_289, %c0_290], %767 {strides = array<i32>} : memref<6x5x2xf32, #tpu.memory_space<vmem>>, vector<1x1x2xf32>,
    %c1_291 = arith.constant 1 : index
    %c4_292 = arith.constant 4 : index
    %c0_293 = arith.constant 0 : index
    %768 = vector.load %arg8[%c1_291, %c4_292, %c0_293] : memref<6x5x2xf32, #tpu.memory_space<vmem>>, vector<1x1x2xf32>
    %769 = vector.shape_cast %768 : vector<1x1x2xf32> to vector<1x2xf32>
    %770 = vector.shape_cast %382 : vector<1x2xf32> to vector<1x1x2xf32>
    tpu.vector_store %arg8[%c1_291, %c4_292, %c0_293], %770 {strides = array<i32>} : memref<6x5x2xf32, #tpu.memory_space<vmem>>, vector<1x1x2xf32>,
    %771 = vector.broadcast %399 : vector<1x2xf32> to vector<16x2xf32>
    %772 = arith.mulf %771, %6 : vector<16x2xf32>
    %773 = vector.broadcast %400 : vector<1x2xf32> to vector<16x2xf32>
    %774 = arith.mulf %773, %10 : vector<16x2xf32>
    %775 = arith.addf %772, %774 : vector<16x2xf32>
    %776 = vector.broadcast %401 : vector<1x2xf32> to vector<16x2xf32>
    %777 = arith.mulf %776, %14 : vector<16x2xf32>
    %778 = arith.addf %775, %777 : vector<16x2xf32>
    %779 = vector.broadcast %402 : vector<1x2xf32> to vector<16x2xf32>
    %780 = arith.mulf %779, %18 : vector<16x2xf32>
    %781 = arith.addf %778, %780 : vector<16x2xf32>
    %782 = vector.broadcast %403 : vector<1x2xf32> to vector<16x2xf32>
    %783 = arith.mulf %782, %22 : vector<16x2xf32>
    %784 = arith.addf %781, %783 : vector<16x2xf32>
    %785 = vector.broadcast %688 : vector<1x2xf32> to vector<16x2xf32>
    %786 = arith.mulf %784, %785 : vector<16x2xf32>
    %c2_294 = arith.constant 2 : index
    %c0_295 = arith.constant 0 : index
    %c0_296 = arith.constant 0 : index
    %787 = vector.load %arg6[%c2_294, %c0_295, %c0_296] : memref<6x16x2xf32, #tpu.memory_space<vmem>>, vector<1x16x2xf32>
    %788 = vector.shape_cast %787 : vector<1x16x2xf32> to vector<16x2xf32>
    %789 = vector.shape_cast %786 : vector<16x2xf32> to vector<1x16x2xf32>
    tpu.vector_store %arg6[%c2_294, %c0_295, %c0_296], %789 {strides = array<i32>} : memref<6x16x2xf32, #tpu.memory_space<vmem>>, vector<1x16x2xf32>,
    %c2_297 = arith.constant 2 : index
    %c0_298 = arith.constant 0 : index
    %790 = vector.load %arg7[%c2_297, %c0_298] : memref<6x2xf32, #tpu.memory_space<vmem>>, vector<1x2xf32>
    tpu.vector_store %arg7[%c2_297, %c0_298], %688 {strides = array<i32>} : memref<6x2xf32, #tpu.memory_space<vmem>>, vector<1x2xf32>,
    %c2_299 = arith.constant 2 : index
    %c0_300 = arith.constant 0 : index
    %c0_301 = arith.constant 0 : index
    %791 = vector.load %arg8[%c2_299, %c0_300, %c0_301] : memref<6x5x2xf32, #tpu.memory_space<vmem>>, vector<1x1x2xf32>
    %792 = vector.shape_cast %791 : vector<1x1x2xf32> to vector<1x2xf32>
    %793 = vector.shape_cast %399 : vector<1x2xf32> to vector<1x1x2xf32>
    tpu.vector_store %arg8[%c2_299, %c0_300, %c0_301], %793 {strides = array<i32>} : memref<6x5x2xf32, #tpu.memory_space<vmem>>, vector<1x1x2xf32>,
    %c2_302 = arith.constant 2 : index
    %c1_303 = arith.constant 1 : index
    %c0_304 = arith.constant 0 : index
    %794 = vector.load %arg8[%c2_302, %c1_303, %c0_304] : memref<6x5x2xf32, #tpu.memory_space<vmem>>, vector<1x1x2xf32>
    %795 = vector.shape_cast %794 : vector<1x1x2xf32> to vector<1x2xf32>
    %796 = vector.shape_cast %400 : vector<1x2xf32> to vector<1x1x2xf32>
    tpu.vector_store %arg8[%c2_302, %c1_303, %c0_304], %796 {strides = array<i32>} : memref<6x5x2xf32, #tpu.memory_space<vmem>>, vector<1x1x2xf32>,
    %c2_305 = arith.constant 2 : index
    %c2_306 = arith.constant 2 : index
    %c0_307 = arith.constant 0 : index
    %797 = vector.load %arg8[%c2_305, %c2_306, %c0_307] : memref<6x5x2xf32, #tpu.memory_space<vmem>>, vector<1x1x2xf32>
    %798 = vector.shape_cast %797 : vector<1x1x2xf32> to vector<1x2xf32>
    %799 = vector.shape_cast %401 : vector<1x2xf32> to vector<1x1x2xf32>
    tpu.vector_store %arg8[%c2_305, %c2_306, %c0_307], %799 {strides = array<i32>} : memref<6x5x2xf32, #tpu.memory_space<vmem>>, vector<1x1x2xf32>,
    %c2_308 = arith.constant 2 : index
    %c3_309 = arith.constant 3 : index
    %c0_310 = arith.constant 0 : index
    %800 = vector.load %arg8[%c2_308, %c3_309, %c0_310] : memref<6x5x2xf32, #tpu.memory_space<vmem>>, vector<1x1x2xf32>
    %801 = vector.shape_cast %800 : vector<1x1x2xf32> to vector<1x2xf32>
    %802 = vector.shape_cast %402 : vector<1x2xf32> to vector<1x1x2xf32>
    tpu.vector_store %arg8[%c2_308, %c3_309, %c0_310], %802 {strides = array<i32>} : memref<6x5x2xf32, #tpu.memory_space<vmem>>, vector<1x1x2xf32>,
    %c2_311 = arith.constant 2 : index
    %c4_312 = arith.constant 4 : index
    %c0_313 = arith.constant 0 : index
    %803 = vector.load %arg8[%c2_311, %c4_312, %c0_313] : memref<6x5x2xf32, #tpu.memory_space<vmem>>, vector<1x1x2xf32>
    %804 = vector.shape_cast %803 : vector<1x1x2xf32> to vector<1x2xf32>
    %805 = vector.shape_cast %403 : vector<1x2xf32> to vector<1x1x2xf32>
    tpu.vector_store %arg8[%c2_311, %c4_312, %c0_313], %805 {strides = array<i32>} : memref<6x5x2xf32, #tpu.memory_space<vmem>>, vector<1x1x2xf32>,
    %806 = vector.broadcast %420 : vector<1x2xf32> to vector<16x2xf32>
    %807 = arith.mulf %806, %6 : vector<16x2xf32>
    %808 = vector.broadcast %421 : vector<1x2xf32> to vector<16x2xf32>
    %809 = arith.mulf %808, %10 : vector<16x2xf32>
    %810 = arith.addf %807, %809 : vector<16x2xf32>
    %811 = vector.broadcast %422 : vector<1x2xf32> to vector<16x2xf32>
    %812 = arith.mulf %811, %14 : vector<16x2xf32>
    %813 = arith.addf %810, %812 : vector<16x2xf32>
    %814 = vector.broadcast %423 : vector<1x2xf32> to vector<16x2xf32>
    %815 = arith.mulf %814, %18 : vector<16x2xf32>
    %816 = arith.addf %813, %815 : vector<16x2xf32>
    %817 = vector.broadcast %424 : vector<1x2xf32> to vector<16x2xf32>
    %818 = arith.mulf %817, %22 : vector<16x2xf32>
    %819 = arith.addf %816, %818 : vector<16x2xf32>
    %820 = vector.broadcast %692 : vector<1x2xf32> to vector<16x2xf32>
    %821 = arith.mulf %819, %820 : vector<16x2xf32>
    %c3_314 = arith.constant 3 : index
    %c0_315 = arith.constant 0 : index
    %c0_316 = arith.constant 0 : index
    %822 = vector.load %arg6[%c3_314, %c0_315, %c0_316] : memref<6x16x2xf32, #tpu.memory_space<vmem>>, vector<1x16x2xf32>
    %823 = vector.shape_cast %822 : vector<1x16x2xf32> to vector<16x2xf32>
    %824 = vector.shape_cast %821 : vector<16x2xf32> to vector<1x16x2xf32>
    tpu.vector_store %arg6[%c3_314, %c0_315, %c0_316], %824 {strides = array<i32>} : memref<6x16x2xf32, #tpu.memory_space<vmem>>, vector<1x16x2xf32>,
    %c3_317 = arith.constant 3 : index
    %c0_318 = arith.constant 0 : index
    %825 = vector.load %arg7[%c3_317, %c0_318] : memref<6x2xf32, #tpu.memory_space<vmem>>, vector<1x2xf32>
    tpu.vector_store %arg7[%c3_317, %c0_318], %692 {strides = array<i32>} : memref<6x2xf32, #tpu.memory_space<vmem>>, vector<1x2xf32>,
    %c3_319 = arith.constant 3 : index
    %c0_320 = arith.constant 0 : index
    %c0_321 = arith.constant 0 : index
    %826 = vector.load %arg8[%c3_319, %c0_320, %c0_321] : memref<6x5x2xf32, #tpu.memory_space<vmem>>, vector<1x1x2xf32>
    %827 = vector.shape_cast %826 : vector<1x1x2xf32> to vector<1x2xf32>
    %828 = vector.shape_cast %420 : vector<1x2xf32> to vector<1x1x2xf32>
    tpu.vector_store %arg8[%c3_319, %c0_320, %c0_321], %828 {strides = array<i32>} : memref<6x5x2xf32, #tpu.memory_space<vmem>>, vector<1x1x2xf32>,
    %c3_322 = arith.constant 3 : index
    %c1_323 = arith.constant 1 : index
    %c0_324 = arith.constant 0 : index
    %829 = vector.load %arg8[%c3_322, %c1_323, %c0_324] : memref<6x5x2xf32, #tpu.memory_space<vmem>>, vector<1x1x2xf32>
    %830 = vector.shape_cast %829 : vector<1x1x2xf32> to vector<1x2xf32>
    %831 = vector.shape_cast %421 : vector<1x2xf32> to vector<1x1x2xf32>
    tpu.vector_store %arg8[%c3_322, %c1_323, %c0_324], %831 {strides = array<i32>} : memref<6x5x2xf32, #tpu.memory_space<vmem>>, vector<1x1x2xf32>,
    %c3_325 = arith.constant 3 : index
    %c2_326 = arith.constant 2 : index
    %c0_327 = arith.constant 0 : index
    %832 = vector.load %arg8[%c3_325, %c2_326, %c0_327] : memref<6x5x2xf32, #tpu.memory_space<vmem>>, vector<1x1x2xf32>
    %833 = vector.shape_cast %832 : vector<1x1x2xf32> to vector<1x2xf32>
    %834 = vector.shape_cast %422 : vector<1x2xf32> to vector<1x1x2xf32>
    tpu.vector_store %arg8[%c3_325, %c2_326, %c0_327], %834 {strides = array<i32>} : memref<6x5x2xf32, #tpu.memory_space<vmem>>, vector<1x1x2xf32>,
    %c3_328 = arith.constant 3 : index
    %c3_329 = arith.constant 3 : index
    %c0_330 = arith.constant 0 : index
    %835 = vector.load %arg8[%c3_328, %c3_329, %c0_330] : memref<6x5x2xf32, #tpu.memory_space<vmem>>, vector<1x1x2xf32>
    %836 = vector.shape_cast %835 : vector<1x1x2xf32> to vector<1x2xf32>
    %837 = vector.shape_cast %423 : vector<1x2xf32> to vector<1x1x2xf32>
    tpu.vector_store %arg8[%c3_328, %c3_329, %c0_330], %837 {strides = array<i32>} : memref<6x5x2xf32, #tpu.memory_space<vmem>>, vector<1x1x2xf32>,
    %c3_331 = arith.constant 3 : index
    %c4_332 = arith.constant 4 : index
    %c0_333 = arith.constant 0 : index
    %838 = vector.load %arg8[%c3_331, %c4_332, %c0_333] : memref<6x5x2xf32, #tpu.memory_space<vmem>>, vector<1x1x2xf32>
    %839 = vector.shape_cast %838 : vector<1x1x2xf32> to vector<1x2xf32>
    %840 = vector.shape_cast %424 : vector<1x2xf32> to vector<1x1x2xf32>
    tpu.vector_store %arg8[%c3_331, %c4_332, %c0_333], %840 {strides = array<i32>} : memref<6x5x2xf32, #tpu.memory_space<vmem>>, vector<1x1x2xf32>,
    %841 = vector.broadcast %441 : vector<1x2xf32> to vector<16x2xf32>
    %842 = arith.mulf %841, %6 : vector<16x2xf32>
    %843 = vector.broadcast %442 : vector<1x2xf32> to vector<16x2xf32>
    %844 = arith.mulf %843, %10 : vector<16x2xf32>
    %845 = arith.addf %842, %844 : vector<16x2xf32>
    %846 = vector.broadcast %443 : vector<1x2xf32> to vector<16x2xf32>
    %847 = arith.mulf %846, %14 : vector<16x2xf32>
    %848 = arith.addf %845, %847 : vector<16x2xf32>
    %849 = vector.broadcast %444 : vector<1x2xf32> to vector<16x2xf32>
    %850 = arith.mulf %849, %18 : vector<16x2xf32>
    %851 = arith.addf %848, %850 : vector<16x2xf32>
    %852 = vector.broadcast %445 : vector<1x2xf32> to vector<16x2xf32>
    %853 = arith.mulf %852, %22 : vector<16x2xf32>
    %854 = arith.addf %851, %853 : vector<16x2xf32>
    %855 = vector.broadcast %696 : vector<1x2xf32> to vector<16x2xf32>
    %856 = arith.mulf %854, %855 : vector<16x2xf32>
    %c4_334 = arith.constant 4 : index
    %c0_335 = arith.constant 0 : index
    %c0_336 = arith.constant 0 : index
    %857 = vector.load %arg6[%c4_334, %c0_335, %c0_336] : memref<6x16x2xf32, #tpu.memory_space<vmem>>, vector<1x16x2xf32>
    %858 = vector.shape_cast %857 : vector<1x16x2xf32> to vector<16x2xf32>
    %859 = vector.shape_cast %856 : vector<16x2xf32> to vector<1x16x2xf32>
    tpu.vector_store %arg6[%c4_334, %c0_335, %c0_336], %859 {strides = array<i32>} : memref<6x16x2xf32, #tpu.memory_space<vmem>>, vector<1x16x2xf32>,
    %c4_337 = arith.constant 4 : index
    %c0_338 = arith.constant 0 : index
    %860 = vector.load %arg7[%c4_337, %c0_338] : memref<6x2xf32, #tpu.memory_space<vmem>>, vector<1x2xf32>
    tpu.vector_store %arg7[%c4_337, %c0_338], %696 {strides = array<i32>} : memref<6x2xf32, #tpu.memory_space<vmem>>, vector<1x2xf32>,
    %c4_339 = arith.constant 4 : index
    %c0_340 = arith.constant 0 : index
    %c0_341 = arith.constant 0 : index
    %861 = vector.load %arg8[%c4_339, %c0_340, %c0_341] : memref<6x5x2xf32, #tpu.memory_space<vmem>>, vector<1x1x2xf32>
    %862 = vector.shape_cast %861 : vector<1x1x2xf32> to vector<1x2xf32>
    %863 = vector.shape_cast %441 : vector<1x2xf32> to vector<1x1x2xf32>
    tpu.vector_store %arg8[%c4_339, %c0_340, %c0_341], %863 {strides = array<i32>} : memref<6x5x2xf32, #tpu.memory_space<vmem>>, vector<1x1x2xf32>,
    %c4_342 = arith.constant 4 : index
    %c1_343 = arith.constant 1 : index
    %c0_344 = arith.constant 0 : index
    %864 = vector.load %arg8[%c4_342, %c1_343, %c0_344] : memref<6x5x2xf32, #tpu.memory_space<vmem>>, vector<1x1x2xf32>
    %865 = vector.shape_cast %864 : vector<1x1x2xf32> to vector<1x2xf32>
    %866 = vector.shape_cast %442 : vector<1x2xf32> to vector<1x1x2xf32>
    tpu.vector_store %arg8[%c4_342, %c1_343, %c0_344], %866 {strides = array<i32>} : memref<6x5x2xf32, #tpu.memory_space<vmem>>, vector<1x1x2xf32>,
    %c4_345 = arith.constant 4 : index
    %c2_346 = arith.constant 2 : index
    %c0_347 = arith.constant 0 : index
    %867 = vector.load %arg8[%c4_345, %c2_346, %c0_347] : memref<6x5x2xf32, #tpu.memory_space<vmem>>, vector<1x1x2xf32>
    %868 = vector.shape_cast %867 : vector<1x1x2xf32> to vector<1x2xf32>
    %869 = vector.shape_cast %443 : vector<1x2xf32> to vector<1x1x2xf32>
    tpu.vector_store %arg8[%c4_345, %c2_346, %c0_347], %869 {strides = array<i32>} : memref<6x5x2xf32, #tpu.memory_space<vmem>>, vector<1x1x2xf32>,
    %c4_348 = arith.constant 4 : index
    %c3_349 = arith.constant 3 : index
    %c0_350 = arith.constant 0 : index
    %870 = vector.load %arg8[%c4_348, %c3_349, %c0_350] : memref<6x5x2xf32, #tpu.memory_space<vmem>>, vector<1x1x2xf32>
    %871 = vector.shape_cast %870 : vector<1x1x2xf32> to vector<1x2xf32>
    %872 = vector.shape_cast %444 : vector<1x2xf32> to vector<1x1x2xf32>
    tpu.vector_store %arg8[%c4_348, %c3_349, %c0_350], %872 {strides = array<i32>} : memref<6x5x2xf32, #tpu.memory_space<vmem>>, vector<1x1x2xf32>,
    %c4_351 = arith.constant 4 : index
    %c4_352 = arith.constant 4 : index
    %c0_353 = arith.constant 0 : index
    %873 = vector.load %arg8[%c4_351, %c4_352, %c0_353] : memref<6x5x2xf32, #tpu.memory_space<vmem>>, vector<1x1x2xf32>
    %874 = vector.shape_cast %873 : vector<1x1x2xf32> to vector<1x2xf32>
    %875 = vector.shape_cast %445 : vector<1x2xf32> to vector<1x1x2xf32>
    tpu.vector_store %arg8[%c4_351, %c4_352, %c0_353], %875 {strides = array<i32>} : memref<6x5x2xf32, #tpu.memory_space<vmem>>, vector<1x1x2xf32>,
    %876 = vector.broadcast %462 : vector<1x2xf32> to vector<16x2xf32>
    %877 = arith.mulf %876, %6 : vector<16x2xf32>
    %878 = vector.broadcast %463 : vector<1x2xf32> to vector<16x2xf32>
    %879 = arith.mulf %878, %10 : vector<16x2xf32>
    %880 = arith.addf %877, %879 : vector<16x2xf32>
    %881 = vector.broadcast %464 : vector<1x2xf32> to vector<16x2xf32>
    %882 = arith.mulf %881, %14 : vector<16x2xf32>
    %883 = arith.addf %880, %882 : vector<16x2xf32>
    %884 = vector.broadcast %465 : vector<1x2xf32> to vector<16x2xf32>
    %885 = arith.mulf %884, %18 : vector<16x2xf32>
    %886 = arith.addf %883, %885 : vector<16x2xf32>
    %887 = vector.broadcast %466 : vector<1x2xf32> to vector<16x2xf32>
    %888 = arith.mulf %887, %22 : vector<16x2xf32>
    %889 = arith.addf %886, %888 : vector<16x2xf32>
    %890 = vector.broadcast %700 : vector<1x2xf32> to vector<16x2xf32>
    %891 = arith.mulf %889, %890 : vector<16x2xf32>
    %c5_354 = arith.constant 5 : index
    %c0_355 = arith.constant 0 : index
    %c0_356 = arith.constant 0 : index
    %892 = vector.load %arg6[%c5_354, %c0_355, %c0_356] : memref<6x16x2xf32, #tpu.memory_space<vmem>>, vector<1x16x2xf32>
    %893 = vector.shape_cast %892 : vector<1x16x2xf32> to vector<16x2xf32>
    %894 = vector.shape_cast %891 : vector<16x2xf32> to vector<1x16x2xf32>
    tpu.vector_store %arg6[%c5_354, %c0_355, %c0_356], %894 {strides = array<i32>} : memref<6x16x2xf32, #tpu.memory_space<vmem>>, vector<1x16x2xf32>,
    %c5_357 = arith.constant 5 : index
    %c0_358 = arith.constant 0 : index
    %895 = vector.load %arg7[%c5_357, %c0_358] : memref<6x2xf32, #tpu.memory_space<vmem>>, vector<1x2xf32>
    tpu.vector_store %arg7[%c5_357, %c0_358], %700 {strides = array<i32>} : memref<6x2xf32, #tpu.memory_space<vmem>>, vector<1x2xf32>,
    %c5_359 = arith.constant 5 : index
    %c0_360 = arith.constant 0 : index
    %c0_361 = arith.constant 0 : index
    %896 = vector.load %arg8[%c5_359, %c0_360, %c0_361] : memref<6x5x2xf32, #tpu.memory_space<vmem>>, vector<1x1x2xf32>
    %897 = vector.shape_cast %896 : vector<1x1x2xf32> to vector<1x2xf32>
    %898 = vector.shape_cast %462 : vector<1x2xf32> to vector<1x1x2xf32>
    tpu.vector_store %arg8[%c5_359, %c0_360, %c0_361], %898 {strides = array<i32>} : memref<6x5x2xf32, #tpu.memory_space<vmem>>, vector<1x1x2xf32>,
    %c5_362 = arith.constant 5 : index
    %c1_363 = arith.constant 1 : index
    %c0_364 = arith.constant 0 : index
    %899 = vector.load %arg8[%c5_362, %c1_363, %c0_364] : memref<6x5x2xf32, #tpu.memory_space<vmem>>, vector<1x1x2xf32>
    %900 = vector.shape_cast %899 : vector<1x1x2xf32> to vector<1x2xf32>
    %901 = vector.shape_cast %463 : vector<1x2xf32> to vector<1x1x2xf32>
    tpu.vector_store %arg8[%c5_362, %c1_363, %c0_364], %901 {strides = array<i32>} : memref<6x5x2xf32, #tpu.memory_space<vmem>>, vector<1x1x2xf32>,
    %c5_365 = arith.constant 5 : index
    %c2_366 = arith.constant 2 : index
    %c0_367 = arith.constant 0 : index
    %902 = vector.load %arg8[%c5_365, %c2_366, %c0_367] : memref<6x5x2xf32, #tpu.memory_space<vmem>>, vector<1x1x2xf32>
    %903 = vector.shape_cast %902 : vector<1x1x2xf32> to vector<1x2xf32>
    %904 = vector.shape_cast %464 : vector<1x2xf32> to vector<1x1x2xf32>
    tpu.vector_store %arg8[%c5_365, %c2_366, %c0_367], %904 {strides = array<i32>} : memref<6x5x2xf32, #tpu.memory_space<vmem>>, vector<1x1x2xf32>,
    %c5_368 = arith.constant 5 : index
    %c3_369 = arith.constant 3 : index
    %c0_370 = arith.constant 0 : index
    %905 = vector.load %arg8[%c5_368, %c3_369, %c0_370] : memref<6x5x2xf32, #tpu.memory_space<vmem>>, vector<1x1x2xf32>
    %906 = vector.shape_cast %905 : vector<1x1x2xf32> to vector<1x2xf32>
    %907 = vector.shape_cast %465 : vector<1x2xf32> to vector<1x1x2xf32>
    tpu.vector_store %arg8[%c5_368, %c3_369, %c0_370], %907 {strides = array<i32>} : memref<6x5x2xf32, #tpu.memory_space<vmem>>, vector<1x1x2xf32>,
    %c5_371 = arith.constant 5 : index
    %c4_372 = arith.constant 4 : index
    %c0_373 = arith.constant 0 : index
    %908 = vector.load %arg8[%c5_371, %c4_372, %c0_373] : memref<6x5x2xf32, #tpu.memory_space<vmem>>, vector<1x1x2xf32>
    %909 = vector.shape_cast %908 : vector<1x1x2xf32> to vector<1x2xf32>
    %910 = vector.shape_cast %466 : vector<1x2xf32> to vector<1x1x2xf32>
    tpu.vector_store %arg8[%c5_371, %c4_372, %c0_373], %910 {strides = array<i32>} : memref<6x5x2xf32, #tpu.memory_space<vmem>>, vector<1x1x2xf32>,
    return
  }
  func.func @transform_0(%arg0: i32) -> (i32, i32, i32) {
    %c0_i32 = arith.constant 0 : i32
    %c0_i32_0 = arith.constant 0 : i32
    %c0_i32_1 = arith.constant 0 : i32
    return %c0_i32, %c0_i32_0, %arg0 : i32, i32, i32
  }
  func.func @transform_1(%arg0: i32) -> (i32, i32, i32) {
    %c0_i32 = arith.constant 0 : i32
    %c0_i32_0 = arith.constant 0 : i32
    %c0_i32_1 = arith.constant 0 : i32
    return %c0_i32, %c0_i32_0, %arg0 : i32, i32, i32
  }
  func.func @transform_2(%arg0: i32) -> (i32, i32) {
    %c0_i32 = arith.constant 0 : i32
    %c0_i32_0 = arith.constant 0 : i32
    %c0_i32_1 = arith.constant 0 : i32
    return %c0_i32, %c0_i32_0 : i32, i32
  }
  func.func @transform_3(%arg0: i32) -> (i32, i32) {
    %c0_i32 = arith.constant 0 : i32
    %c0_i32_0 = arith.constant 0 : i32
    %c0_i32_1 = arith.constant 0 : i32
    return %c0_i32, %c0_i32_0 : i32, i32
  }
  func.func @transform_4(%arg0: i32) -> (i32, i32) {
    %c0_i32 = arith.constant 0 : i32
    %c0_i32_0 = arith.constant 0 : i32
    %c0_i32_1 = arith.constant 0 : i32
    return %c0_i32, %c0_i32_0 : i32, i32
  }
  func.func @transform_5(%arg0: i32) -> (i32, i32, i32) {
    %c0_i32 = arith.constant 0 : i32
    %c0_i32_0 = arith.constant 0 : i32
    %c0_i32_1 = arith.constant 0 : i32
    return %c0_i32, %c0_i32_0, %arg0 : i32, i32, i32
  }
  func.func @transform_6(%arg0: i32) -> (i32, i32) {
    %c0_i32 = arith.constant 0 : i32
    %c0_i32_0 = arith.constant 0 : i32
    return %c0_i32, %arg0 : i32, i32
  }
  func.func @transform_7(%arg0: i32) -> (i32, i32, i32) {
    %c0_i32 = arith.constant 0 : i32
    %c0_i32_0 = arith.constant 0 : i32
    %c0_i32_1 = arith.constant 0 : i32
    return %c0_i32, %c0_i32_0, %arg0 : i32, i32, i32
  }
}

</mosaic_0001>

<bundles_post_ra>
// kernel: tpu_custom_call.1
= control target key start
LH: loop header
LB: loop body
LE: loop exit
PB: predicated region body
PF: predicated region fallthrough
CT: control target
= control target key end

     0   :  { %vm43_vm0 = vcmask 130048   ;;  %vm990_vm1 = vcmask 261120   ;;  %vm1678_vm2 = vcmask 15360   ;;  %vm2993_vm3 = vcmask 8192   ;;  %s6204_s0 = inlined_call_operand.vmem [shape: f32[5,16,2], index: 0, kind: input, shape index: {}]   ;;  %s6205_s2 = inlined_call_operand.vmem [shape: f32[64,16], index: 2, kind: input, shape index: {}]   ;;  %s6206_s3 = inlined_call_operand.vmem [shape: f32[16,16], index: 3, kind: input, shape index: {}]   ;;  %s6207_s1 = inlined_call_operand.vmem [shape: f32[6,32,2], index: 1, kind: input, shape index: {}]   ;;  %s6208_s4 = inlined_call_operand.vmem [shape: f32[64,32], index: 4, kind: input, shape index: {}]   ;;  %s6209_s7 = inlined_call_operand.vmem [shape: f32[6,5,2], index: 7, kind: output, shape index: {2}]   ;;  %s6210_s6 = inlined_call_operand.vmem [shape: f32[6,2], index: 6, kind: output, shape index: {1}]   ;;  %s6211_s5 = inlined_call_operand.vmem [shape: f32[6,16,2], index: 5, kind: output, shape index: {0}]  }
   0x1   :  { %v41_v0 = vld [vmem:[%s6204_s0] sm:$0xff]  ;;  %v42_v1 = vld [vmem:[%s6204_s0 + $0x8] sm:$0xff]  ;;  %v3932_v4 = vld [vmem:[%s6205_s2 + $0x30] sm:$0xff] }
   0x2   :  { %v3925_v2 = vld [vmem:[%s6205_s2] sm:$0xff]  ;;  %v3700_v3 = vpack.c.bf16 %v42_v1, %v41_v0  ;;  %3478 = vmatprep.mubr.msk.f32.mxu1 %vm43_vm0, %v3932_v4  ;;  %v3172_v5 = vld [vmem:[%s6204_s0 + $0x10] sm:$0xff]  ;;  %v3173_v6 = vld [vmem:[%s6204_s0 + $0x18] sm:$0xff] }
   0x3   :  { %3469 = vmatprep.mubr.msk.f32.mxu0 %vm43_vm0, %v3925_v2  ;;  %v3708_v7 = vpack.c.bf16 %v3173_v6, %v3172_v5  ;;  %v3945_v8 = vld [vmem:[%s6205_s2 + $0x8] sm:$0xff]  ;;  %v3950_v9 = vld [vmem:[%s6205_s2 + $0x38] sm:$0xff]  ;;  %v3184_v10 = vld [vmem:[%s6204_s0 + $0x20] sm:$0xff] }
   0x4   :  { %3701 = vmatprep.subr.bf16.mxu0 %v3700_v3  ;;  %3788 = vmatprep.subr.bf16.mxu1 %v3700_v3  ;;  %v3185_v11 = vld [vmem:[%s6204_s0 + $0x28] sm:$0xff]  ;;  %v3961_v12 = vld [vmem:[%s6205_s2 + $0x10] sm:$0xff]  ;;  %v3966_v13 = vld [vmem:[%s6206_s3] sm:$0xff] }
   0x5   :  { %3703 = vmatpush3.bf16.msra.mxu0 %v3700_v3  ;;  %3789 = vmatpush3.bf16.msra.mxu1 %v3700_v3  ;;  %v3716_v14 = vpack.c.bf16 %v3185_v11, %v3184_v10  ;;  %v3975_v15 = vld [vmem:[%s6205_s2 + $0x18] sm:$0xff]  ;;  %v3980_v16 = vld [vmem:[%s6206_s3 + $0x8] sm:$0xff]  ;;  %v3989_v17 = vld [vmem:[%s6205_s2 + $0x20] sm:$0xff] }
   0x6   :  { %3705 = vmatprep.subr.bf16.mxu1 %v3700_v3  ;;  %3713 = vmatprep.subr.bf16.mxu0 %v3708_v7  ;;  %v3196_v18 = vld [vmem:[%s6204_s0 + $0x30] sm:$0xff]  ;;  %v3197_v19 = vld [vmem:[%s6204_s0 + $0x38] sm:$0xff]  ;;  %v4006_v20 = vld [vmem:[%s6205_s2 + $0x28] sm:$0xff] }
   0x7   :  { %v3724_v21 = vpack.c.bf16 %v3197_v19, %v3196_v18  ;;  %v3208_v22 = vld [vmem:[%s6204_s0 + $0x40] sm:$0xff]  ;;  %v3209_v23 = vld [vmem:[%s6204_s0 + $0x48] sm:$0xff]  ;;  %v3230_v31 = vld [vmem:[%s6207_s1 + $0x30] sm:$0xff] }
   0x8   :  { %3470 = vmatmul.mubr.msk.f32.vlgmr.msra.gmra.mrb[0].mxu0 %vm43_vm0, %v3945_v8  ;;  %3479 = vmatmul.mubr.msk.f32.vlgmr.msra.gmra.mrb[0].mxu1 %vm43_vm0, %v3950_v9  ;;  %v3732_v24 = vpack.c.bf16 %v3209_v23, %v3208_v22  ;;  %v986_v25 = vld [vmem:[%s6207_s1] sm:$0xff]  ;;  %v987_v26 = vld [vmem:[%s6207_s1 + $0x8] sm:$0xff]  ;;  %v3231_v32 = vld [vmem:[%s6207_s1 + $0x38] sm:$0xff] }
   0x9   :  { %3707 = vmatpush3.bf16.msra.mxu1 %v3700_v3  ;;  %3715 = vmatpush3.bf16.msra.mxu0 %v3708_v7  ;;  %v3740_v27 = vpack.c.bf16 %v987_v26, %v986_v25  ;;  %v3228_v28 = vld [vmem:[%s6207_s1 + $0x20] sm:$0xff]  ;;  %v3229_v29 = vld [vmem:[%s6207_s1 + $0x28] sm:$0xff]  ;;  %v3752_v33 = vpack.c.bf16 %v3231_v32, %v3230_v31  ;;  %v988_v36 = vld [vmem:[%s6207_s1 + $0x10] sm:$0xff] }
   0xa   :  { %3472 = vmatprep.mubr.msk.f32.mxu0 %vm43_vm0, %v3961_v12  ;;  %3485 = vmatprep.mubr.msk.f32.mxu1 %vm43_vm0, %v3966_v13  ;;  %v3748_v30 = vpack.c.bf16 %v3229_v29, %v3228_v28  ;;  %v3252_v34 = vld [vmem:[%s6207_s1 + $0x60] sm:$0xff]  ;;  %v3253_v35 = vld [vmem:[%s6207_s1 + $0x68] sm:$0xff]  ;;  %v989_v37 = vld [vmem:[%s6207_s1 + $0x18] sm:$0xff] }
   0xb   :  { %3709 = vmatprep.subr.bf16.mxu1 %v3708_v7  ;;  %3717 = vmatprep.subr.bf16.mxu0 %v3716_v14  ;;  %v3764_v38 = vpack.c.bf16 %v3253_v35, %v3252_v34  ;;  %v3744_v39 = vpack.c.bf16 %v989_v37, %v988_v36  ;;  %v4121_v40 = vld [vmem:[%s6208_s4] sm:$0xff]  ;;  %v3241_v42 = vld [vmem:[%s6207_s1 + $0x48] sm:$0xff]  ;;  %v3242_v44 = vld [vmem:[%s6207_s1 + $0x50] sm:$0xff] }
   0xc   :  { %3473 = vmatmul.mubr.msk.f32.gmra.mrb[2].mxu0 %vm43_vm0, %v3975_v15  ;;  %3486 = vmatmul.mubr.msk.f32.vlgmr.msra.gmra.mrb[2].mxu1 %vm43_vm0, %v3980_v16  ;;  %v3240_v41 = vld [vmem:[%s6207_s1 + $0x40] sm:$0xff]  ;;  %v3243_v45 = vld [vmem:[%s6207_s1 + $0x58] sm:$0xff]  ;;  %v3254_v46 = vld [vmem:[%s6207_s1 + $0x70] sm:$0xff] }
   0xd   :  { %3711 = vmatpush3.bf16.msra.mxu1 %v3708_v7  ;;  %3475 = vmatprep.mubr.msk.f32.mxu0 %vm43_vm0, %v3989_v17  ;;  %v3756_v43 = vpack.c.bf16 %v3241_v42, %v3240_v41  ;;  %v3255_v47 = vld [vmem:[%s6207_s1 + $0x78] sm:$0xff]  ;;  %v4154_v48 = vld [vmem:[%s6208_s4 + $0x8] sm:$0xff]  ;;  %v4161_v49 = vld [vmem:[%s6208_s4 + $0x10] sm:$0xff]  ;;  %v3760_v50 = vpack.c.bf16 %v3243_v45, %v3242_v44 }
   0xe   :  { %3492 = vmatprep.mubr.msk.f32.mxu1 %vm43_vm0, %v3925_v2  ;;  %3721 = vmatprep.subr.bf16.mxu1 %v3716_v14  ;;  %v3768_v51 = vpack.c.bf16 %v3255_v47, %v3254_v46  ;;  %v3264_v52 = vld [vmem:[%s6207_s1 + $0x80] sm:$0xff]  ;;  %v3265_v53 = vld [vmem:[%s6207_s1 + $0x88] sm:$0xff]  ;;  %v36_v56 = vld [vmem:[%s6208_s4 + $0x18] sm:$0xff] }
   0xf   :  { %v3276_v54 = vld [vmem:[%s6207_s1 + $0xa0] sm:$0xff]  ;;  %v3277_v55 = vld [vmem:[%s6207_s1 + $0xa8] sm:$0xff]  ;;  %v3772_v58 = vpack.c.bf16 %v3265_v53, %v3264_v52  ;;  %v39_v61 = vld [vmem:[%s6208_s4 + $0x30] sm:$0xff] }
  0x10   :  { %3476 = vmatmul.mubr.msk.f32.gmra.mrb[4].mxu0 %vm43_vm0, %v4006_v20  ;;  %3493 = vmatmul.mubr.msk.f32.vlgmr.msra.gmra.mrb[4].mxu1 %vm43_vm0, %v3945_v8  ;;  %v37_v57 = vld [vmem:[%s6208_s4 + $0x20] sm:$0xff]  ;;  %v3780_v59 = vpack.c.bf16 %v3277_v55, %v3276_v54  ;;  %v38_v60 = vld [vmem:[%s6208_s4 + $0x28] sm:$0xff]  ;;  %v40_v62 = vld [vmem:[%s6208_s4 + $0x38] sm:$0xff] }
  0x11   :  { %3723 = vmatpush3.bf16.msra.mxu1 %v3716_v14  ;;  %3495 = vmatprep.mubr.msk.f32.mxu1 %vm43_vm0, %v3961_v12  ;;  %v3266_v63 = vld [vmem:[%s6207_s1 + $0x90] sm:$0xff]  ;;  %v3267_v0 = vld [vmem:[%s6207_s1 + $0x98] sm:$0xff] }
  0x12   :  { %3508 = vmatprep.mubr.msk.f32.mxu0 %vm43_vm0, %v3966_v13  ;;  %3725 = vmatprep.subr.bf16.mxu1 %v3724_v21  ;;  %v3278_v1 = vld [vmem:[%s6207_s1 + $0xb0] sm:$0xff]  ;;  %v3776_v3 = vpack.c.bf16 %v3267_v0, %v3266_v63 }
  0x14   :  { %3496 = vmatmul.mubr.msk.f32.gmra.mrb[6].mxu1 %vm43_vm0, %v3975_v15  ;;  %3509 = vmatmul.mubr.msk.f32.vlgmr.msra.gmra.mrb[6].mxu0 %vm43_vm0, %v3980_v16 }
  0x15   :  { %3719 = vmatpush3.bf16.msra.mxu0 %v3716_v14  ;;  %3498 = vmatprep.mubr.msk.f32.mxu1 %vm43_vm0, %v3989_v17 }
  0x16   :  { %3515 = vmatprep.mubr.msk.f32.mxu0 %vm43_vm0, %v3925_v2  ;;  %3729 = vmatprep.subr.bf16.mxu0 %v3724_v21 }
  0x18   :  { %3499 = vmatmul.mubr.msk.f32.gmra.mrb[8].mxu1 %vm43_vm0, %v4006_v20  ;;  %3516 = vmatmul.mubr.msk.f32.vlgmr.msra.gmra.mrb[8].mxu0 %vm43_vm0, %v3945_v8 }
  0x19   :  { %3731 = vmatpush3.bf16.msra.mxu0 %v3724_v21  ;;  %3501 = vmatprep.mubr.msk.f32.mxu1 %vm43_vm0, %v3932_v4 }
  0x1a   :  { %3518 = vmatprep.mubr.msk.f32.mxu0 %vm43_vm0, %v3961_v12  ;;  %3733 = vmatprep.subr.bf16.mxu0 %v3732_v24 }
  0x1c   :  { %3502 = vmatmul.mubr.msk.f32.gmra.mrb[10].mxu1 %vm43_vm0, %v3950_v9  ;;  %3519 = vmatmul.mubr.msk.f32.gmra.mrb[10].mxu0 %vm43_vm0, %v3975_v15 }
  0x1d   :  { %3521 = vmatprep.mubr.msk.f32.mxu0 %vm43_vm0, %v3989_v17  ;;  %3531 = vmatprep.mubr.msk.f32.mxu1 %vm43_vm0, %v3966_v13 }
  0x20   :  { %3522 = vmatmul.mubr.msk.f32.gmra.mrb[12].mxu0 %vm43_vm0, %v4006_v20  ;;  %3532 = vmatmul.mubr.msk.f32.vlgmr.msra.gmra.mrb[12].mxu1 %vm43_vm0, %v3980_v16 }
  0x21   :  { %3727 = vmatpush3.bf16.msra.mxu1 %v3724_v21  ;;  %3524 = vmatprep.mubr.msk.f32.mxu0 %vm43_vm0, %v3932_v4 }
  0x22   :  { %3538 = vmatprep.mubr.msk.f32.mxu1 %vm43_vm0, %v3925_v2  ;;  %3737 = vmatprep.subr.bf16.mxu1 %v3732_v24 }
  0x24   :  { %3525 = vmatmul.mubr.msk.f32.gmra.mrb[14].mxu0 %vm43_vm0, %v3950_v9  ;;  %3539 = vmatmul.mubr.msk.f32.vlgmr.msra.gmra.mrb[14].mxu1 %vm43_vm0, %v3945_v8 }
  0x25   :  { %3739 = vmatpush3.bf16.msra.mxu1 %v3732_v24  ;;  %3541 = vmatprep.mubr.msk.f32.mxu1 %vm43_vm0, %v3961_v12 }
  0x26   :  { %3554 = vmatprep.mubr.msk.f32.mxu0 %vm43_vm0, %v3966_v13  ;;  %3741 = vmatprep.subr.bf16.mxu1 %v3740_v27 }
  0x28   :  { %3542 = vmatmul.mubr.msk.f32.gmra.mrb[16].mxu1 %vm43_vm0, %v3975_v15  ;;  %3555 = vmatmul.mubr.msk.f32.vlgmr.msra.gmra.mrb[16].mxu0 %vm43_vm0, %v3980_v16 }
  0x29   :  { %3735 = vmatpush3.bf16.msra.mxu0 %v3732_v24  ;;  %3544 = vmatprep.mubr.msk.f32.mxu1 %vm43_vm0, %v3989_v17 }
  0x2a   :  { %3561 = vmatprep.mubr.msk.f32.mxu0 %vm43_vm0, %v3925_v2  ;;  %3749 = vmatprep.subr.bf16.mxu0 %v3748_v30  ;;  %v3279_v2 = vld [vmem:[%s6207_s1 + $0xb8] sm:$0xff] }
  0x2c   :  { %3545 = vmatmul.mubr.msk.f32.gmra.mrb[18].mxu1 %vm43_vm0, %v4006_v20  ;;  %3562 = vmatmul.mubr.msk.f32.vlgmr.msra.gmra.mrb[18].mxu0 %vm43_vm0, %v3945_v8 }
  0x2d   :  { %3751 = vmatpush3.bf16.msra.mxu0 %v3748_v30  ;;  %3547 = vmatprep.mubr.msk.f32.mxu1 %vm43_vm0, %v3932_v4 }
  0x2e   :  { %3564 = vmatprep.mubr.msk.f32.mxu0 %vm43_vm0, %v3961_v12  ;;  %3753 = vmatprep.subr.bf16.mxu0 %v3752_v33 }
  0x30   :  { %3548 = vmatmul.mubr.msk.f32.gmra.mrb[20].mxu1 %vm43_vm0, %v3950_v9  ;;  %3565 = vmatmul.mubr.msk.f32.gmra.mrb[20].mxu0 %vm43_vm0, %v3975_v15 }
  0x31   :  { %3567 = vmatprep.mubr.msk.f32.mxu0 %vm43_vm0, %v3989_v17  ;;  %3577 = vmatprep.mubr.msk.f32.mxu1 %vm43_vm0, %v3966_v13 }
  0x32   :  { %3755 = vmatpush3.bf16.msra.mxu0 %v3752_v33 }
  0x33   :  { %3765 = vmatprep.subr.bf16.mxu0 %v3764_v38 }
  0x34   :  { %3568 = vmatmul.mubr.msk.f32.gmra.mrb[22].mxu0 %vm43_vm0, %v4006_v20  ;;  %3578 = vmatmul.mubr.msk.f32.vlgmr.msra.gmra.mrb[22].mxu1 %vm43_vm0, %v3980_v16 }
  0x35   :  { %3743 = vmatpush3.bf16.msra.mxu1 %v3740_v27  ;;  %3570 = vmatprep.mubr.msk.f32.mxu0 %vm43_vm0, %v3932_v4  ;;  %v3784_v4 = vpack.c.bf16 %v3279_v2, %v3278_v1 }
  0x36   :  { %3745 = vmatprep.subr.bf16.mxu1 %v3744_v39  ;;  %3588 = vmatprep.mubr.msk.f32.mxu1 %vm990_vm1, %v4121_v40 }
  0x38   :  { %3571 = vmatmul.mubr.msk.f32.gmra.mrb[24].mxu0 %vm43_vm0, %v3950_v9 }
  0x39   :  { %3747 = vmatpush3.bf16.msra.mxu1 %v3744_v39  ;;  %3608 = vmatprep.mubr.msk.f32.mxu0 %vm990_vm1, %v4121_v40 }
  0x3a   :  { %3757 = vmatprep.subr.bf16.mxu1 %v3756_v43 }
  0x3c   :  { %3589 = vmatmul.mubr.msk.f32.vlgmr.msra.gmra.mrb[24].mxu1 %vm990_vm1, %v4154_v48  ;;  %3609 = vmatmul.mubr.msk.f32.vlgmr.msra.gmra.mrb[26].mxu0 %vm990_vm1, %v4154_v48 }
  0x3d   :  { %3759 = vmatpush3.bf16.msra.mxu1 %v3756_v43  ;;  %3591 = vmatprep.mubr.msk.f32.mxu1 %vm990_vm1, %v4161_v49 }
  0x3e   :  { %3767 = vmatpush3.bf16.msra.mxu0 %v3764_v38  ;;  %3611 = vmatprep.mubr.msk.f32.mxu0 %vm990_vm1, %v4161_v49 }
  0x3f   :  { %3761 = vmatprep.subr.bf16.mxu1 %v3760_v50  ;;  %3769 = vmatprep.subr.bf16.mxu0 %v3768_v51 }
  0x40   :  { %3592 = vmatmul.mubr.msk.f32.gmra.mrb[26].mxu1 %vm990_vm1, %v36_v56  ;;  %3612 = vmatmul.mubr.msk.f32.gmra.mrb[28].mxu0 %vm990_vm1, %v36_v56 }
  0x41   :  { %3594 = vmatprep.mubr.msk.f32.mxu1 %vm990_vm1, %v37_v57  ;;  %3614 = vmatprep.mubr.msk.f32.mxu0 %vm990_vm1, %v37_v57 }
  0x42   :  { %3763 = vmatpush3.bf16.msra.mxu1 %v3760_v50  ;;  %3771 = vmatpush3.bf16.msra.mxu0 %v3768_v51 }
  0x43   :  { %3773 = vmatprep.subr.bf16.mxu1 %v3772_v58  ;;  %3781 = vmatprep.subr.bf16.mxu0 %v3780_v59 }
  0x44   :  { %3595 = vmatmul.mubr.msk.f32.gmra.mrb[28].mxu1 %vm990_vm1, %v38_v60  ;;  %3615 = vmatmul.mubr.msk.f32.gmra.mrb[30].mxu0 %vm990_vm1, %v38_v60 }
  0x45   :  { %3597 = vmatprep.mubr.msk.f32.mxu1 %vm990_vm1, %v39_v61  ;;  %3617 = vmatprep.mubr.msk.f32.mxu0 %vm990_vm1, %v39_v61 }
  0x48   :  { %3598 = vmatmul.mubr.msk.f32.gmra.mrb[30].mxu1 %vm990_vm1, %v40_v62  ;;  %3618 = vmatmul.mubr.msk.f32.gmra.mrb[32].mxu0 %vm990_vm1, %v40_v62 }
  0x49   :  { %3628 = vmatprep.mubr.msk.f32.mxu1 %vm990_vm1, %v4121_v40  ;;  %3648 = vmatprep.mubr.msk.f32.mxu0 %vm990_vm1, %v4121_v40 }
  0x4c   :  { %3629 = vmatmul.mubr.msk.f32.vlgmr.msra.gmra.mrb[32].mxu1 %vm990_vm1, %v4154_v48  ;;  %3649 = vmatmul.mubr.msk.f32.vlgmr.msra.gmra.mrb[34].mxu0 %vm990_vm1, %v4154_v48 }
  0x4d   :  { %3775 = vmatpush3.bf16.msra.mxu1 %v3772_v58  ;;  %3631 = vmatprep.mubr.msk.f32.mxu1 %vm990_vm1, %v4161_v49 }
  0x4e   :  { %3783 = vmatpush3.bf16.msra.mxu0 %v3780_v59  ;;  %3651 = vmatprep.mubr.msk.f32.mxu0 %vm990_vm1, %v4161_v49 }
  0x4f   :  { %3777 = vmatprep.subr.bf16.mxu1 %v3776_v3  ;;  %3785 = vmatprep.subr.bf16.mxu0 %v3784_v4 }
  0x50   :  { %3632 = vmatmul.mubr.msk.f32.gmra.mrb[34].mxu1 %vm990_vm1, %v36_v56  ;;  %3652 = vmatmul.mubr.msk.f32.gmra.mrb[36].mxu0 %vm990_vm1, %v36_v56 }
  0x51   :  { %3634 = vmatprep.mubr.msk.f32.mxu1 %vm990_vm1, %v37_v57  ;;  %3654 = vmatprep.mubr.msk.f32.mxu0 %vm990_vm1, %v37_v57 }
  0x52   :  { %3779 = vmatpush3.bf16.msra.mxu1 %v3776_v3  ;;  %3787 = vmatpush3.bf16.msra.mxu0 %v3784_v4 }
  0x54   :  { %3635 = vmatmul.mubr.msk.f32.gmra.mrb[36].mxu1 %vm990_vm1, %v38_v60  ;;  %3655 = vmatmul.mubr.msk.f32.gmra.mrb[38].mxu0 %vm990_vm1, %v38_v60 }
  0x55   :  { %3637 = vmatprep.mubr.msk.f32.mxu1 %vm990_vm1, %v39_v61  ;;  %3657 = vmatprep.mubr.msk.f32.mxu0 %vm990_vm1, %v39_v61 }
  0x58   :  { %3638 = vmatmul.mubr.msk.f32.gmra.mrb[38].mxu1 %vm990_vm1, %v40_v62  ;;  %3658 = vmatmul.mubr.msk.f32.gmra.mrb[40].mxu0 %vm990_vm1, %v40_v62 }
  0x59   :  { %3668 = vmatprep.mubr.msk.f32.mxu1 %vm990_vm1, %v4121_v40  ;;  %3688 = vmatprep.mubr.msk.f32.mxu0 %vm990_vm1, %v4121_v40 }
  0x5c   :  { %3669 = vmatmul.mubr.msk.f32.vlgmr.msra.gmra.mrb[40].mxu1 %vm990_vm1, %v4154_v48  ;;  %3689 = vmatmul.mubr.msk.f32.vlgmr.msra.gmra.mrb[42].mxu0 %vm990_vm1, %v4154_v48 }
  0x5d   :  { %3671 = vmatprep.mubr.msk.f32.mxu1 %vm990_vm1, %v4161_v49  ;;  %3691 = vmatprep.mubr.msk.f32.mxu0 %vm990_vm1, %v4161_v49 }
  0x60   :  { %3672 = vmatmul.mubr.msk.f32.gmra.mrb[42].mxu1 %vm990_vm1, %v36_v56  ;;  %3692 = vmatmul.mubr.msk.f32.gmra.mrb[44].mxu0 %vm990_vm1, %v36_v56 }
  0x61   :  { %3674 = vmatprep.mubr.msk.f32.mxu1 %vm990_vm1, %v37_v57  ;;  %3694 = vmatprep.mubr.msk.f32.mxu0 %vm990_vm1, %v37_v57 }
  0x64   :  { %3675 = vmatmul.mubr.msk.f32.gmra.mrb[44].mxu1 %vm990_vm1, %v38_v60  ;;  %3695 = vmatmul.mubr.msk.f32.gmra.mrb[46].mxu0 %vm990_vm1, %v38_v60 }
  0x65   :  { %3677 = vmatprep.mubr.msk.f32.mxu1 %vm990_vm1, %v39_v61  ;;  %3697 = vmatprep.mubr.msk.f32.mxu0 %vm990_vm1, %v39_v61 }
  0x68   :  { %3678 = vmatmul.mubr.msk.f32.gmra.mrb[46].mxu1 %vm990_vm1, %v40_v62  ;;  %3698 = vmatmul.mubr.msk.f32.gmra.mrb[48].mxu0 %vm990_vm1, %v40_v62 }
  0xdb   :  { %v4264_v5 = vpop.f32.mrb[0].mxu1  ;;  %v4266_v6 = vpop.f32.mrb[0].mxu0 }
  0xdc   :  { %6348 = vst [vmem:[#allocation2_spill] sm:$0xff] %v4266_v6  ;;  %v4268_v7 = vpop.f32.mrb[1].mxu1  ;;  %v4270_v8 = vpop.f32.mrb[1].mxu0 }
  0xdd   :  { %6349 = vst [vmem:[#allocation3_spill] sm:$0xff] %v4268_v7  ;;  %6350 = vst [vmem:[#allocation4_spill] sm:$0xff] %v4270_v8 }
  0xdf   :  { %v4272_v9 = vpop.f32.mrb[2].mxu1  ;;  %v4274_v10 = vpop.f32.mrb[2].mxu0 }
  0xe0   :  { %6351 = vst [vmem:[#allocation5_spill] sm:$0xff] %v4272_v9  ;;  %6352 = vst [vmem:[#allocation6_spill] sm:$0xff] %v4274_v10  ;;  %v4276_v11 = vpop.f32.mrb[3].mxu1  ;;  %v4278_v12 = vpop.f32.mrb[3].mxu0 }
  0xe1   :  { %6353 = vst [vmem:[#allocation7_spill] sm:$0xff] %v4276_v11  ;;  %6354 = vst [vmem:[#allocation8_spill] sm:$0xff] %v4278_v12 }
  0xe3   :  { %v4280_v13 = vpop.f32.mrb[4].mxu1  ;;  %v4282_v14 = vpop.f32.mrb[4].mxu0 }
  0xe4   :  { %6355 = vst [vmem:[#allocation9_spill] sm:$0xff] %v4280_v13  ;;  %v4284_v15 = vpop.f32.mrb[5].mxu1  ;;  %v4286_v16 = vpop.f32.mrb[5].mxu0 }
  0xe5   :  { %6356 = vst [vmem:[#allocation10_spill] sm:$0xff] %v4284_v15 }
  0xe7   :  { %v4288_v17 = vpop.f32.mrb[6].mxu1  ;;  %v4290_v18 = vpop.f32.mrb[6].mxu0 }
  0xe8   :  { %6357 = vst [vmem:[#allocation11_spill] sm:$0xff] %v4290_v18  ;;  %v4292_v19 = vpop.f32.mrb[7].mxu1  ;;  %v4294_v20 = vpop.f32.mrb[7].mxu0 }
  0xe9   :  { %6358 = vst [vmem:[#allocation12_spill] sm:$0xff] %v4292_v19  ;;  %6359 = vst [vmem:[#allocation13_spill] sm:$0xff] %v4294_v20 }
  0xeb   :  { %v4296_v21 = vpop.f32.mrb[8].mxu1  ;;  %v4298_v22 = vpop.f32.mrb[8].mxu0 }
  0xec   :  { %6360 = vst [vmem:[#allocation14_spill] sm:$0xff] %v4298_v22  ;;  %v4300_v23 = vpop.f32.mrb[9].mxu1  ;;  %v4302_v24 = vpop.f32.mrb[9].mxu0 }
  0xed   :  { %6361 = vst [vmem:[#allocation15_spill] sm:$0xff] %v4300_v23  ;;  %6362 = vst [vmem:[#allocation16_spill] sm:$0xff] %v4302_v24 }
  0xef   :  { %v4304_v25 = vpop.f32.mrb[10].mxu1  ;;  %v4306_v26 = vpop.f32.mrb[10].mxu0 }
  0xf0   :  { %v4308_v27 = vpop.f32.mrb[11].mxu1  ;;  %v4310_v28 = vpop.f32.mrb[11].mxu0 }
  0xf1   :  { %6363 = vst [vmem:[#allocation17_spill] sm:$0xff] %v4308_v27  ;;  %6364 = vst [vmem:[#allocation18_spill] sm:$0xff] %v4310_v28 }
  0xf3   :  { %v4312_v29 = vpop.f32.mrb[12].mxu1  ;;  %v4314_v30 = vpop.f32.mrb[12].mxu0 }
  0xf4   :  { %6365 = vst [vmem:[#allocation19_spill] sm:$0xff] %v4312_v29  ;;  %v4316_v31 = vpop.f32.mrb[13].mxu1  ;;  %v4318_v32 = vpop.f32.mrb[13].mxu0 }
  0xf5   :  { %6366 = vst [vmem:[#allocation20_spill] sm:$0xff] %v4316_v31  ;;  %6367 = vst [vmem:[#allocation21_spill] sm:$0xff] %v4318_v32 }
  0xf7   :  { %v4320_v33 = vpop.f32.mrb[14].mxu1  ;;  %v4322_v34 = vpop.f32.mrb[14].mxu0 }
  0xf8   :  { %6368 = vst [vmem:[#allocation22_spill] sm:$0xff] %v4320_v33  ;;  %v4324_v35 = vpop.f32.mrb[15].mxu1  ;;  %v4326_v36 = vpop.f32.mrb[15].mxu0 }
  0xf9   :  { %6369 = vst [vmem:[#allocation23_spill] sm:$0xff] %v4324_v35  ;;  %6370 = vst [vmem:[#allocation24_spill] sm:$0xff] %v4326_v36 }
  0xfb   :  { %v4328_v37 = vpop.f32.mrb[16].mxu1  ;;  %v4330_v38 = vpop.f32.mrb[16].mxu0 }
  0xfc   :  { %6371 = vst [vmem:[#allocation25_spill] sm:$0xff] %v4328_v37  ;;  %6372 = vst [vmem:[#allocation26_spill] sm:$0xff] %v4330_v38  ;;  %v4332_v39 = vpop.f32.mrb[17].mxu1  ;;  %v4334_v40 = vpop.f32.mrb[17].mxu0 }
  0xfd   :  { %6373 = vst [vmem:[#allocation27_spill] sm:$0xff] %v4332_v39  ;;  %6374 = vst [vmem:[#allocation28_spill] sm:$0xff] %v4334_v40 }
  0xff   :  { %v4336_v41 = vpop.f32.mrb[18].mxu1  ;;  %v4338_v42 = vpop.f32.mrb[18].mxu0 }
 0x100   :  { %6375 = vst [vmem:[#allocation29_spill] sm:$0xff] %v4338_v42  ;;  %v4340_v43 = vpop.f32.mrb[19].mxu1  ;;  %v4342_v44 = vpop.f32.mrb[19].mxu0 }
 0x101   :  { %6376 = vst [vmem:[#allocation30_spill] sm:$0xff] %v4340_v43  ;;  %6377 = vst [vmem:[#allocation31_spill] sm:$0xff] %v4342_v44 }
 0x103   :  { %v4344_v45 = vpop.f32.mrb[20].mxu1  ;;  %v4346_v46 = vpop.f32.mrb[20].mxu0 }
 0x104   :  { %6378 = vst [vmem:[#allocation32_spill] sm:$0xff] %v4346_v46  ;;  %v4348_v47 = vpop.f32.mrb[21].mxu1  ;;  %v4350_v48 = vpop.f32.mrb[21].mxu0 }
 0x105   :  { %6379 = vst [vmem:[#allocation33_spill] sm:$0xff] %v4348_v47  ;;  %6380 = vst [vmem:[#allocation34_spill] sm:$0xff] %v4350_v48 }
 0x107   :  { %v4352_v49 = vpop.f32.mrb[22].mxu1  ;;  %v4354_v50 = vpop.f32.mrb[22].mxu0 }
 0x108   :  { %6381 = vst [vmem:[#allocation35_spill] sm:$0xff] %v4352_v49  ;;  %v4356_v51 = vpop.f32.mrb[23].mxu1  ;;  %v4358_v52 = vpop.f32.mrb[23].mxu0 }
 0x109   :  { %6382 = vst [vmem:[#allocation36_spill] sm:$0xff] %v4356_v51  ;;  %6383 = vst [vmem:[#allocation37_spill] sm:$0xff] %v4358_v52 }
 0x10b   :  { %v4360_v53 = vpop.f32.mrb[24].mxu0 }
 0x10c   :  { %v4362_v54 = vpop.f32.mrb[25].mxu0 }
 0x10d   :  { %6384 = vst [vmem:[#allocation38_spill] sm:$0xff] %v4362_v54 }
 0x10f   :  { %v3590_v55 = vpop.f32.mrb[24].mxu1  ;;  %v3610_v56 = vpop.f32.mrb[26].mxu0 }
 0x110   :  { %v1671_v57 = vmul.f32 %v3590_v55, %v4266_v6  ;;  %v1702_v58 = vmul.f32 %v3590_v55, %v4280_v13  ;;  %v1732_v59 = vmul.f32 %v3590_v55, %v4298_v22  ;;  %v1762_v60 = vmul.f32 %v3590_v55, %v4320_v33  ;;  %v1081_v61 = vpop.f32.mrb[25].mxu1  ;;  %v1191_v62 = vpop.f32.mrb[27].mxu0 }
 0x111   :  { %v1792_v63 = vmul.f32 %v3590_v55, %v4338_v42  ;;  %v1670_v0 = vmul.f32 %v1081_v61, %v4270_v8  ;;  %v1701_v1 = vmul.f32 %v1081_v61, %v4284_v15  ;;  %v1731_v2 = vmul.f32 %v1081_v61, %v4302_v24 }
 0x112   :  { %v1680_v3 = vsel %vm1678_vm2, %v1671_v57, 0.0  ;;  %v1710_v4 = vsel %vm1678_vm2, %v1702_v58, 0.0  ;;  %v1740_v49 = vsel %vm1678_vm2, %v1732_v59, 0.0  ;;  %v1770_v51 = vsel %vm1678_vm2, %v1762_v60, 0.0 }
 0x113   :  { %v1800_v38 = vsel %vm1678_vm2, %v1792_v63, 0.0  ;;  %v1679_v40 = vsel %vm1678_vm2, %v1670_v0, 0.0  ;;  %v1709_v55 = vsel %vm1678_vm2, %v1701_v1, 0.0  ;;  %v1739_v29 = vsel %vm1678_vm2, %v1731_v2, 0.0  ;;  %v3593_v31 = vpop.f32.mrb[26].mxu1  ;;  %v4380_v18 = vpop.f32.mrb[28].mxu0 }
 0x114   :  { %v4382_v20 = vadd.f32 %v1680_v3, %v1679_v40  ;;  %v4384_v57 = vadd.f32 %v1710_v4, %v1709_v55  ;;  %v4386_v58 = vadd.f32 %v1740_v49, %v1739_v29  ;;  %v1761_v59 = vmul.f32 %v1081_v61, %v4324_v35  ;;  %v1091_v60 = vpop.f32.mrb[27].mxu1  ;;  %v4389_v9 = vpop.f32.mrb[29].mxu0 }
 0x115   :  { %v1791_v63 = vmul.f32 %v1081_v61, %v4342_v44  ;;  %v1822_v0 = vmul.f32 %v3610_v56, %v4266_v6  ;;  %v1852_v1 = vmul.f32 %v3610_v56, %v4280_v13  ;;  %v1882_v2 = vmul.f32 %v3610_v56, %v4298_v22 }
 0x116   :  { %v1769_v40 = vsel %vm1678_vm2, %v1761_v59, 0.0  ;;  %v1912_v3 = vmul.f32 %v3610_v56, %v4320_v33  ;;  %v1942_v29 = vmul.f32 %v3610_v56, %v4338_v42  ;;  %v1821_v49 = vmul.f32 %v1191_v62, %v4270_v8 }
 0x117   :  { %v1771_v4 = vadd.f32 %v1770_v51, %v1769_v40  ;;  %v1799_v55 = vsel %vm1678_vm2, %v1791_v63, 0.0  ;;  %v1830_v11 = vsel %vm1678_vm2, %v1822_v0, 0.0  ;;  %v1860_v61 = vsel %vm1678_vm2, %v1852_v1, 0.0  ;;  %v4402_v6 = vpop.f32.mrb[28].mxu1  ;;  %v4404_v13 = vpop.f32.mrb[30].mxu0 }
 0x118   :  { %v1801_v22 = vadd.f32 %v1800_v38, %v1799_v55  ;;  %v1890_v59 = vsel %vm1678_vm2, %v1882_v2, 0.0  ;;  %v1920_v33 = vsel %vm1678_vm2, %v1912_v3, 0.0  ;;  %v1950_v56 = vsel %vm1678_vm2, %v1942_v29, 0.0  ;;  %v4409_v42 = vpop.f32.mrb[29].mxu1  ;;  %v4411_v51 = vpop.f32.mrb[31].mxu0 }
 0x119   :  { %v1829_v63 = vsel %vm1678_vm2, %v1821_v49, 0.0  ;;  %v1851_v0 = vmul.f32 %v1191_v62, %v4284_v15  ;;  %v1881_v1 = vmul.f32 %v1191_v62, %v4302_v24  ;;  %v1911_v40 = vmul.f32 %v1191_v62, %v4324_v35 }
 0x11a   :  { %v4417_v8 = vadd.f32 %v1830_v11, %v1829_v63  ;;  %v1941_v38 = vmul.f32 %v1191_v62, %v4342_v44  ;;  %v1673_v2 = vmul.f32 %v3593_v31, %v4274_v10  ;;  %v1704_v3 = vmul.f32 %v3593_v31, %v4288_v17 }
 0x11b   :  { %v1859_v29 = vsel %vm1678_vm2, %v1851_v0, 0.0  ;;  %v1889_v55 = vsel %vm1678_vm2, %v1881_v1, 0.0  ;;  %v1919_v49 = vsel %vm1678_vm2, %v1911_v40, 0.0  ;;  %v1734_v15 = vmul.f32 %v3593_v31, %v4306_v26  ;;  %v4426_v54 = vpop.f32.mrb[30].mxu1  ;;  %v4428_v24 = vpop.f32.mrb[32].mxu0 }
 0x11c   :  { %6385 = vst [vmem:[#allocation39_spill] sm:$0xff] %v4428_v24  ;;  %v1861_v11 = vadd.f32 %v1860_v61, %v1859_v29  ;;  %v1891_v63 = vadd.f32 %v1890_v59, %v1889_v55  ;;  %v1921_v35 = vadd.f32 %v1920_v33, %v1919_v49  ;;  %v1949_v62 = vsel %vm1678_vm2, %v1941_v38, 0.0  ;;  %v4431_v44 = vpop.f32.mrb[31].mxu1  ;;  %v4433_v47 = vpop.f32.mrb[33].mxu0 }
 0x11d   :  { %6386 = vst [vmem:[#allocation40_spill] sm:$0xff] %v4431_v44  ;;  %6387 = vst [vmem:[#allocation41_spill] sm:$0xff] %v4433_v47  ;;  %v4435_v0 = vadd.f32 %v1950_v56, %v1949_v62  ;;  %v4438_v1 = vsel %vm1678_vm2, %v1673_v2, 0.0  ;;  %v4441_v40 = vsel %vm1678_vm2, %v1704_v3, 0.0  ;;  %v4444_v36 = vsel %vm1678_vm2, %v1734_v15, 0.0 }
 0x11e   :  { %v1764_v61 = vmul.f32 %v3593_v31, %v4328_v37  ;;  %v1794_v33 = vmul.f32 %v3593_v31, %v4346_v46  ;;  %v1672_v59 = vmul.f32 %v1091_v60, %v4278_v12  ;;  %v1703_v38 = vmul.f32 %v1091_v60, %v4292_v19 }
 0x11f   :  { %v1733_v56 = vmul.f32 %v1091_v60, %v4310_v28  ;;  %v1763_v29 = vmul.f32 %v1091_v60, %v4332_v39  ;;  %v1793_v2 = vmul.f32 %v1091_v60, %v4350_v48  ;;  %v1824_v3 = vmul.f32 %v4380_v18, %v4274_v10  ;;  %v4455_v55 = vpop.f32.mrb[32].mxu1  ;;  %v4457_v15 = vpop.f32.mrb[34].mxu0 }
 0x120   :  { %6388 = vst [vmem:[#allocation42_spill] sm:$0xff] %v4455_v55  ;;  %6389 = vst [vmem:[#allocation43_spill] sm:$0xff] %v4457_v15  ;;  %v4460_v49 = vsel %vm1678_vm2, %v1764_v61, 0.0  ;;  %v4463_v31 = vsel %vm1678_vm2, %v1794_v33, 0.0  ;;  %v1682_v62 = vsel %vm1678_vm2, %v1672_v59, 0.0  ;;  %v1712_v47 = vsel %vm1678_vm2, %v1703_v38, 0.0 }
 0x121   :  { %v4467_v24 = vpop.f32.mrb[33].mxu1  ;;  %v4469_v60 = vpop.f32.mrb[35].mxu0  ;;  %v1683_v10 = vadd.f32 %v1682_v62, %v4382_v20  ;;  %v1713_v55 = vadd.f32 %v1712_v47, %v4384_v57  ;;  %v1742_v15 = vsel %vm1678_vm2, %v1733_v56, 0.0  ;;  %v1772_v61 = vsel %vm1678_vm2, %v1763_v29, 0.0 }
 0x122   :  { %6390 = vst [vmem:[#allocation44_spill] sm:$0xff] %v4469_v60  ;;  %v1743_v27 = vadd.f32 %v1742_v15, %v4386_v58  ;;  %v1773_v33 = vadd.f32 %v1772_v61, %v1771_v4  ;;  %v1802_v44 = vsel %vm1678_vm2, %v1793_v2, 0.0  ;;  %v4478_v59 = vsel %vm1678_vm2, %v1824_v3, 0.0 }
 0x123   :  { %v1803_v38 = vadd.f32 %v1802_v44, %v1801_v22  ;;  %v1854_v60 = vmul.f32 %v4380_v18, %v4288_v17  ;;  %v1884_v20 = vmul.f32 %v4380_v18, %v4306_v26  ;;  %v1914_v47 = vmul.f32 %v4380_v18, %v4328_v37  ;;  %v4486_v57 = vpop.f32.mrb[34].mxu1  ;;  %v4488_v56 = vpop.f32.mrb[36].mxu0 }
 0x124   :  { %6391 = vst [vmem:[#allocation45_spill] sm:$0xff] %v4488_v56  ;;  %v1944_v58 = vmul.f32 %v4380_v18, %v4346_v46  ;;  %v1823_v4 = vmul.f32 %v4389_v9, %v4278_v12  ;;  %v1853_v22 = vmul.f32 %v4389_v9, %v4292_v19  ;;  %v1883_v44 = vmul.f32 %v4389_v9, %v4310_v28  ;;  %v4498_v29 = vpop.f32.mrb[35].mxu1  ;;  %v4500_v2 = vpop.f32.mrb[37].mxu0 }
 0x125   :  { %6392 = vst [vmem:[#allocation46_spill] sm:$0xff] %v4498_v29  ;;  %6393 = vst [vmem:[#allocation47_spill] sm:$0xff] %v4500_v2  ;;  %v4503_v3 = vsel %vm1678_vm2, %v1854_v60, 0.0  ;;  %v4506_v15 = vsel %vm1678_vm2, %v1884_v20, 0.0  ;;  %v4509_v18 = vsel %vm1678_vm2, %v1914_v47, 0.0  ;;  %v1913_v62 = vmul.f32 %v4389_v9, %v4332_v39 }
 0x126   :  { %v4514_v61 = vsel %vm1678_vm2, %v1944_v58, 0.0  ;;  %v1832_v56 = vsel %vm1678_vm2, %v1823_v4, 0.0  ;;  %v1862_v28 = vsel %vm1678_vm2, %v1853_v22, 0.0  ;;  %v1892_v2 = vsel %vm1678_vm2, %v1883_v44, 0.0 }
 0x127   :  { %v1833_v60 = vadd.f32 %v1832_v56, %v4417_v8  ;;  %v1863_v19 = vadd.f32 %v1862_v28, %v1861_v11  ;;  %v4520_v20 = vadd.f32 %v1892_v2, %v1891_v63  ;;  %v1922_v47 = vsel %vm1678_vm2, %v1913_v62, 0.0  ;;  %v4523_v29 = vpop.f32.mrb[36].mxu1  ;;  %v4525_v12 = vpop.f32.mrb[38].mxu0 }
 0x128   :  { %6394 = vst [vmem:[#allocation48_spill] sm:$0xff] %v4523_v29  ;;  %6395 = vst [vmem:[#allocation49_spill] sm:$0xff] %v4525_v12  ;;  %v4527_v39 = vadd.f32 %v1922_v47, %v1921_v35  ;;  %v1943_v58 = vmul.f32 %v4389_v9, %v4350_v48  ;;  %v1675_v4 = vmul.f32 %v4402_v6, %v4282_v14  ;;  %v4535_v28 = vpop.f32.mrb[37].mxu1  ;;  %v4537_v11 = vpop.f32.mrb[39].mxu0 }
 0x129   :  { %v1706_v8 = vmul.f32 %v4402_v6, %v4296_v21  ;;  %6396 = vst [vmem:[#allocation50_spill] sm:$0xff] %v4535_v28  ;;  %6397 = vst [vmem:[#allocation51_spill] sm:$0xff] %v4537_v11  ;;  %v1736_v63 = vmul.f32 %v4402_v6, %v4314_v30  ;;  %v1766_v35 = vmul.f32 %v4402_v6, %v4336_v41 }
 0x12a   :  { %v1796_v56 = vmul.f32 %v4402_v6, %v4354_v50  ;;  %v1674_v9 = vmul.f32 %v4409_v42, %v4286_v16  ;;  %v1952_v22 = vsel %vm1678_vm2, %v1943_v58, 0.0  ;;  %v4549_v44 = vsel %vm1678_vm2, %v1675_v4, 0.0 }
 0x12b   :  { %v4552_v2 = vsel %vm1678_vm2, %v1706_v8, 0.0  ;;  %v1685_v62 = vadd.f32 %v4438_v1, %v1683_v10  ;;  %v1953_v47 = vadd.f32 %v1952_v22, %v4435_v0  ;;  %v4557_v11 = vsel %vm1678_vm2, %v1736_v63, 0.0  ;;  %v4565_v58 = vpop.f32.mrb[38].mxu1  ;;  %v4567_v4 = vpop.f32.mrb[40].mxu0 }
 0x12c   :  { %v4560_v6 = vsel %vm1678_vm2, %v1766_v35, 0.0  ;;  %v4563_v12 = vsel %vm1678_vm2, %v1796_v56, 0.0  ;;  %6398 = vst [vmem:[#allocation52_spill] sm:$0xff] %v4565_v58  ;;  %6399 = vst [vmem:[#allocation53_spill] sm:$0xff] %v4567_v4  ;;  %v1686_v8 = vsel %vm1678_vm2, %v1674_v9, 0.0  ;;  %v1705_v10 = vmul.f32 %v4409_v42, %v4300_v23  ;;  %v4575_v63 = vpop.f32.mrb[39].mxu1 }
 0x12d   :  { %v1715_v0 = vadd.f32 %v4441_v40, %v1713_v55  ;;  %v1735_v1 = vmul.f32 %v4409_v42, %v4318_v32  ;;  %6400 = vst [vmem:[#allocation54_spill] sm:$0xff] %v4575_v63  ;;  %v4577_v35 = vpop.f32.mrb[41].mxu0  ;;  %v1687_v56 = vadd.f32 %v1686_v8, %v1685_v62  ;;  %v1745_v22 = vadd.f32 %v4444_v36, %v1743_v27 }
 0x12e   :  { %6401 = vst [vmem:[#allocation55_spill] sm:$0xff] %v4577_v35  ;;  %v1765_v4 = vmul.f32 %v4409_v42, %v4340_v43  ;;  %v1775_v9 = vadd.f32 %v4460_v49, %v1773_v33  ;;  %v1716_v58 = vsel %vm1678_vm2, %v1705_v10, 0.0  ;;  %v1795_v40 = vmul.f32 %v4409_v42, %v4358_v52  ;;  %v6414_v35 = vld [vmem:[#allocation38_spill] sm:$0xff] }
 0x12f   :  { %v1746_v28 = vsel %vm1678_vm2, %v1735_v1, 0.0  ;;  %v1805_v55 = vadd.f32 %v4463_v31, %v1803_v38  ;;  %v1717_v63 = vadd.f32 %v1716_v58, %v1715_v0  ;;  %v1826_v27 = vmul.f32 %v4404_v13, %v4282_v14  ;;  %v4591_v36 = vpop.f32.mrb[40].mxu1  ;;  %v4593_v8 = vpop.f32.mrb[42].mxu0 }
 0x130   :  { %v1747_v29 = vadd.f32 %v1746_v28, %v1745_v22  ;;  %v1776_v62 = vsel %vm1678_vm2, %v1765_v4, 0.0  ;;  %6402 = vst [vmem:[#allocation56_spill] sm:$0xff] %v4591_v36  ;;  %6403 = vst [vmem:[#allocation57_spill] sm:$0xff] %v4593_v8  ;;  %v1806_v33 = vsel %vm1678_vm2, %v1795_v40, 0.0  ;;  %v1856_v10 = vmul.f32 %v4404_v13, %v4296_v21  ;;  %v4600_v31 = vpop.f32.mrb[41].mxu1  ;;  %v4602_v38 = vpop.f32.mrb[43].mxu0 }
 0x131   :  { %v1777_v49 = vadd.f32 %v1776_v62, %v1775_v9  ;;  %v1886_v42 = vmul.f32 %v4404_v13, %v4314_v30  ;;  %6404 = vst [vmem:[#allocation58_spill] sm:$0xff] %v4600_v31  ;;  %6405 = vst [vmem:[#allocation59_spill] sm:$0xff] %v4602_v38  ;;  %v1807_v28 = vadd.f32 %v1806_v33, %v1805_v55  ;;  %v4605_v58 = vsel %vm1678_vm2, %v1826_v27, 0.0 }
 0x132   :  { %v1916_v4 = vmul.f32 %v4404_v13, %v4336_v41  ;;  %v1946_v0 = vmul.f32 %v4404_v13, %v4354_v50  ;;  %v4612_v1 = vsel %vm1678_vm2, %v1856_v10, 0.0  ;;  %v1825_v9 = vmul.f32 %v4411_v51, %v4286_v16 }
 0x133   :  { %v4615_v22 = vsel %vm1678_vm2, %v1886_v42, 0.0  ;;  %v1835_v40 = vadd.f32 %v4478_v59, %v1833_v60  ;;  %v1855_v13 = vmul.f32 %v4411_v51, %v4300_v23  ;;  %v1865_v27 = vadd.f32 %v4503_v3, %v1863_v19  ;;  %v4629_v33 = vpop.f32.mrb[42].mxu1 }
 0x134   :  { %v4621_v55 = vsel %vm1678_vm2, %v1916_v4, 0.0  ;;  %v4624_v62 = vsel %vm1678_vm2, %v1946_v0, 0.0  ;;  %6406 = vst [vmem:[#allocation60_spill] sm:$0xff] %v4629_v33  ;;  %v1836_v10 = vsel %vm1678_vm2, %v1825_v9, 0.0  ;;  %v1885_v42 = vmul.f32 %v4411_v51, %v4318_v32 }
 0x135   :  { %v1895_v59 = vadd.f32 %v4506_v15, %v4520_v20  ;;  %v1915_v60 = vmul.f32 %v4411_v51, %v4340_v43  ;;  %v4638_v4 = vadd.f32 %v1836_v10, %v1835_v40  ;;  %v1866_v0 = vsel %vm1678_vm2, %v1855_v13, 0.0  ;;  %v4650_v20 = vpop.f32.mrb[43].mxu1 }
 0x136   :  { %v1925_v19 = vadd.f32 %v4509_v18, %v4527_v39  ;;  %v1945_v3 = vmul.f32 %v4411_v51, %v4358_v52  ;;  %v4645_v9 = vadd.f32 %v1866_v0, %v1865_v27  ;;  %v1896_v33 = vsel %vm1678_vm2, %v1885_v42, 0.0  ;;  %6407 = vst [vmem:[#allocation61_spill] sm:$0xff] %v4650_v20  ;;  %v6409_v42 = vld [vmem:[#allocation40_spill] sm:$0xff] }
 0x137   :  { %v1926_v38 = vsel %vm1678_vm2, %v1915_v60, 0.0  ;;  %v1955_v15 = vadd.f32 %v4514_v61, %v1953_v47  ;;  %v4652_v40 = vadd.f32 %v1896_v33, %v1895_v59  ;;  %v1677_v39 = vmul.f32 %v4426_v54, %v4264_v5  ;;  %v4667_v47 = vpop.f32.mrb[44].mxu0  ;;  %v6411_v20 = vld [vmem:[#allocation24_spill] sm:$0xff] }
 0x138   :  { %v4654_v10 = vadd.f32 %v1926_v38, %v1925_v19  ;;  %v1956_v13 = vsel %vm1678_vm2, %v1945_v3, 0.0  ;;  %v1708_v18 = vmul.f32 %v4426_v54, %v4304_v25  ;;  %v1738_v27 = vmul.f32 %v4426_v54, %v4322_v34  ;;  %6408 = vst [vmem:[#allocation62_spill] sm:$0xff] %v4667_v47 }
 0x139   :  { %v4659_v51 = vadd.f32 %v1956_v13, %v1955_v15  ;;  %v1768_v61 = vmul.f32 %v4426_v54, %v4344_v45  ;;  %v1692_v38 = vsel %vm1678_vm2, %v1677_v39, 0.0  ;;  %v1798_v33 = vmul.f32 %v4426_v54, %v4360_v53  ;;  %v6410_v15 = vld [vmem:[#allocation17_spill] sm:$0xff] }
 0x13a   :  { %v1676_v59 = vmul.f32 %v6409_v42, %v4268_v7  ;;  %v1689_v60 = vadd.f32 %v4549_v44, %v1687_v56  ;;  %v1722_v0 = vsel %vm1678_vm2, %v1708_v18, 0.0  ;;  %v1752_v19 = vsel %vm1678_vm2, %v1738_v27, 0.0  ;;  %v6412_v18 = vld [vmem:[#allocation33_spill] sm:$0xff] }
 0x13b   :  { %v1782_v3 = vsel %vm1678_vm2, %v1768_v61, 0.0  ;;  %v1707_v13 = vmul.f32 %v6409_v42, %v6410_v15  ;;  %v1812_v47 = vsel %vm1678_vm2, %v1798_v33, 0.0  ;;  %v1719_v54 = vadd.f32 %v4552_v2, %v1717_v63  ;;  %v4689_v61 = vpop.f32.mrb[45].mxu0 }
 0x13c   :  { %v1690_v39 = vsel %vm1678_vm2, %v1676_v59, 0.0  ;;  %v1737_v8 = vmul.f32 %v6409_v42, %v6411_v20  ;;  %v1749_v56 = vadd.f32 %v4557_v11, %v1747_v29  ;;  %v1767_v27 = vmul.f32 %v6409_v42, %v6412_v18  ;;  %6413 = vst [vmem:[#allocation40_spill] sm:$0xff] %v4689_v61  ;;  %v6415_v61 = vld [vmem:[#allocation39_spill] sm:$0xff] }
 0x13d   :  { %v1691_v31 = vadd.f32 %v1690_v39, %v1689_v60  ;;  %v1720_v44 = vsel %vm1678_vm2, %v1707_v13, 0.0  ;;  %v1779_v59 = vadd.f32 %v4560_v6, %v1777_v49  ;;  %v1797_v2 = vmul.f32 %v6409_v42, %v6414_v35  ;;  %v4702_v49 = vpop.f32.mrb[44].mxu1 }
 0x13e   :  { %v1721_v36 = vadd.f32 %v1720_v44, %v1719_v54  ;;  %v1750_v33 = vsel %vm1678_vm2, %v1737_v8, 0.0  ;;  %v1780_v60 = vsel %vm1678_vm2, %v1767_v27, 0.0  ;;  %v1809_v13 = vadd.f32 %v4563_v12, %v1807_v28  ;;  %6416 = vst [vmem:[#allocation24_spill] sm:$0xff] %v4702_v49 }
 0x13f   :  { %v1693_v63 = vadd.f32 %v1692_v38, %v1691_v31  ;;  %v1751_v52 = vadd.f32 %v1750_v33, %v1749_v56  ;;  %v1781_v11 = vadd.f32 %v1780_v60, %v1779_v59  ;;  %v1810_v39 = vsel %vm1678_vm2, %v1797_v2, 0.0  ;;  %v4713_v59 = vpop.f32.mrb[45].mxu1 }
 0x140   :  { %v1723_v29 = vadd.f32 %v1722_v0, %v1721_v36  ;;  %v1828_v54 = vmul.f32 %v6415_v61, %v4264_v5  ;;  %v1811_v43 = vadd.f32 %v1810_v39, %v1809_v13  ;;  %v1858_v6 = vmul.f32 %v6415_v61, %v4304_v25  ;;  %6417 = vst [vmem:[#allocation33_spill] sm:$0xff] %v4713_v59 }
 0x141   :  { %v1694_v44 = vrot.slane %v1693_v63, 4  ;;  %v1753_v8 = vadd.f32 %v1752_v19, %v1751_v52  ;;  %v1783_v38 = vadd.f32 %v1782_v3, %v1781_v11  ;;  %v1888_v12 = vmul.f32 %v6415_v61, %v4322_v34 }
 0x142   :  { %v1724_v31 = vrot.slane %v1723_v29, 4  ;;  %v1842_v42 = vsel %vm1678_vm2, %v1828_v54, 0.0  ;;  %v1813_v0 = vadd.f32 %v1812_v47, %v1811_v43  ;;  %v1872_v56 = vsel %vm1678_vm2, %v1858_v6, 0.0 }
 0x143   :  { %v1695_v36 = vadd.f32 %v1694_v44, %v1693_v63  ;;  %v1754_v28 = vrot.slane %v1753_v8, 4  ;;  %v1784_v52 = vrot.slane %v1783_v38, 4  ;;  %v4709_v19 = vsel %vm1678_vm2, %v1888_v12, 0.0 }
 0x144   :  { %v1725_v27 = vadd.f32 %v1724_v31, %v1723_v29  ;;  %v1918_v33 = vmul.f32 %v6415_v61, %v4344_v45  ;;  %v1814_v60 = vrot.slane %v1813_v0, 4  ;;  %v1948_v63 = vmul.f32 %v6415_v61, %v4360_v53  ;;  %v6418_v29 = vld [vmem:[#allocation41_spill] sm:$0xff]  ;;  %v4725_v31 = vpop.f32.mrb[46].mxu0 }
 0x145   :  { %v1696_v3 = vrot.slane %v1695_v36, 2  ;;  %v1755_v2 = vadd.f32 %v1754_v28, %v1753_v8  ;;  %v1785_v43 = vadd.f32 %v1784_v52, %v1783_v38  ;;  %v1827_v11 = vmul.f32 %v6418_v29, %v4268_v7  ;;  %6419 = vst [vmem:[#allocation38_spill] sm:$0xff] %v4725_v31  ;;  %v4734_v31 = vpop.f32.mrb[47].mxu0 }
 0x146   :  { %v1726_v13 = vrot.slane %v1725_v27, 2  ;;  %v4718_v47 = vsel %vm1678_vm2, %v1918_v33, 0.0  ;;  %v1815_v44 = vadd.f32 %v1814_v60, %v1813_v0  ;;  %v4723_v6 = vsel %vm1678_vm2, %v1948_v63, 0.0  ;;  %6420 = vst [vmem:[#allocation39_spill] sm:$0xff] %v4734_v31 }
 0x147   :  { %v1697_v39 = vadd.f32 %v1696_v3, %v1695_v36  ;;  %v1756_v54 = vrot.slane %v1755_v2, 2  ;;  %v1786_v12 = vrot.slane %v1785_v43, 2  ;;  %v1839_v61 = vadd.f32 %v4605_v58, %v4638_v4 }
 0x148   :  { %v1727_v8 = vadd.f32 %v1726_v13, %v1725_v27  ;;  %v1840_v38 = vsel %vm1678_vm2, %v1827_v11, 0.0  ;;  %v1816_v33 = vrot.slane %v1815_v44, 2  ;;  %v1857_v36 = vmul.f32 %v6418_v29, %v6410_v15 }
 0x149   :  { %v1698_v28 = vrot.slane %v1697_v39, 1  ;;  %v1757_v52 = vadd.f32 %v1756_v54, %v1755_v2  ;;  %v1787_v0 = vadd.f32 %v1786_v12, %v1785_v43  ;;  %v1841_v60 = vadd.f32 %v1840_v38, %v1839_v61  ;;  %v4748_v38 = vpop.f32.mrb[46].mxu1 }
 0x14a   :  { %v1728_v3 = vrot.slane %v1727_v8, 1  ;;  %v1869_v63 = vadd.f32 %v4612_v1, %v4645_v9  ;;  %v1817_v59 = vadd.f32 %v1816_v33, %v1815_v44  ;;  %v1870_v58 = vsel %vm1678_vm2, %v1857_v36, 0.0  ;;  %6424 = vst [vmem:[#allocation65_spill] sm:$0xff] %v4748_v38 }
 0x14b   :  { %v1699_v27 = vadd.f32 %v1698_v28, %v1697_v39  ;;  %v1758_v13 = vrot.slane %v1757_v52, 1  ;;  %v1788_v11 = vrot.slane %v1787_v0, 1  ;;  %v1843_v2 = vadd.f32 %v1842_v42, %v1841_v60  ;;  %v4763_v60 = vpop.f32.mrb[47].mxu1 }
 0x14c   :  { %v1729_v4 = vadd.f32 %v1728_v3, %v1727_v8  ;;  %v1871_v54 = vadd.f32 %v1870_v58, %v1869_v63  ;;  %v1818_v7 = vrot.slane %v1817_v59, 1  ;;  %v1887_v43 = vmul.f32 %v6418_v29, %v6411_v20  ;;  %6427 = vst [vmem:[#allocation68_spill] sm:$0xff] %v4763_v60  ;;  %v6428_v58 = vld [vmem:[#allocation2_spill] sm:$0xff] }
 0x14d   :  { %v4737_v49 = vmul.f32 0.0625, %v1699_v27  ;;  %v1759_v15 = vadd.f32 %v1758_v13, %v1757_v52  ;;  %v1789_v1 = vadd.f32 %v1788_v11, %v1787_v0  ;;  %v1844_v9 = vrot.slane %v1843_v2, 4 }
 0x14e   :  { %v4741_v12 = vmul.f32 0.0625, %v1729_v4  ;;  %v1873_v39 = vadd.f32 %v1872_v56, %v1871_v54  ;;  %v1819_v44 = vadd.f32 %v1818_v7, %v1817_v59  ;;  %v1899_v8 = vadd.f32 %v4615_v22, %v4652_v40  ;;  %v6429_v4 = vld [vmem:[#allocation42_spill] sm:$0xff] }
 0x14f   :  { %6421 = vst [vmem:[#allocation41_spill] sm:$0xff] %v4737_v49  ;;  %v4743_v61 = vmul.f32 0.0625, %v1759_v15  ;;  %v1900_v42 = vsel %vm1678_vm2, %v1887_v43, 0.0  ;;  %v4750_v28 = vmul.f32 0.0625, %v1789_v1  ;;  %v1845_v52 = vadd.f32 %v1844_v9, %v1843_v2  ;;  %v6430_v2 = vld [vmem:[#allocation9_spill] sm:$0xff]  ;;  %v4775_v9 = vpop.f32.mrb[48].mxu0 }
 0x150   :  { %6422 = vst [vmem:[#allocation63_spill] sm:$0xff] %v4741_v12  ;;  %v1874_v33 = vrot.slane %v1873_v39, 4  ;;  %v1917_v36 = vmul.f32 %v6418_v29, %v6412_v18  ;;  %v4754_v3 = vmul.f32 0.0625, %v1819_v44  ;;  %v1901_v56 = vadd.f32 %v1900_v42, %v1899_v8  ;;  %6432 = vst [vmem:[#allocation42_spill] sm:$0xff] %v4775_v9 }
 0x151   :  { %6423 = vst [vmem:[#allocation64_spill] sm:$0xff] %v4743_v61  ;;  %6425 = vst [vmem:[#allocation66_spill] sm:$0xff] %v4750_v28  ;;  %v1929_v7 = vadd.f32 %v4621_v55, %v4654_v10  ;;  %v1947_v22 = vmul.f32 %v6418_v29, %v6414_v35  ;;  %v1846_v40 = vrot.slane %v1845_v52, 2  ;;  %v1959_v0 = vadd.f32 %v4624_v62, %v4659_v51  ;;  %v6431_v51 = vld [vmem:[#allocation14_spill] sm:$0xff] }
 0x152   :  { %6426 = vst [vmem:[#allocation67_spill] sm:$0xff] %v4754_v3  ;;  %v1875_v15 = vadd.f32 %v1874_v33, %v1873_v39  ;;  %v1930_v59 = vsel %vm1678_vm2, %v1917_v36, 0.0  ;;  %v1903_v63 = vadd.f32 %v4709_v19, %v1901_v56  ;;  %v1972_v55 = vmul.f32 %v6429_v4, %v6428_v58  ;;  %v6433_v56 = vld [vmem:[#allocation22_spill] sm:$0xff] }
 0x153   :  { %v1931_v27 = vadd.f32 %v1930_v59, %v1929_v7  ;;  %v1960_v13 = vsel %vm1678_vm2, %v1947_v22, 0.0  ;;  %v1847_v10 = vadd.f32 %v1846_v40, %v1845_v52  ;;  %v2002_v54 = vmul.f32 %v6429_v4, %v6430_v2  ;;  %v6434_v59 = vld [vmem:[#allocation29_spill] sm:$0xff] }
 0x154   :  { %v1876_v11 = vrot.slane %v1875_v15, 2  ;;  %v1961_v29 = vadd.f32 %v1960_v13, %v1959_v0  ;;  %v1904_v43 = vrot.slane %v1903_v63, 4  ;;  %v1980_v62 = vsel %vm1678_vm2, %v1972_v55, 0.0 }
 0x155   :  { %v1933_v1 = vadd.f32 %v4718_v47, %v1931_v27  ;;  %v2032_v19 = vmul.f32 %v6429_v4, %v6431_v51  ;;  %v1848_v39 = vrot.slane %v1847_v10, 1  ;;  %v2010_v42 = vsel %vm1678_vm2, %v2002_v54, 0.0 }
 0x156   :  { %v1877_v44 = vadd.f32 %v1876_v11, %v1875_v15  ;;  %v1963_v8 = vadd.f32 %v4723_v6, %v1961_v29  ;;  %v1905_v52 = vadd.f32 %v1904_v43, %v1903_v63  ;;  %v2062_v47 = vmul.f32 %v6429_v4, %v6433_v56  ;;  %v6435_v6 = vld [vmem:[#allocation4_spill] sm:$0xff] }
 0x157   :  { %v1934_v33 = vrot.slane %v1933_v1, 4  ;;  %v2040_v36 = vsel %vm1678_vm2, %v2032_v19, 0.0  ;;  %v1849_v7 = vadd.f32 %v1848_v39, %v1847_v10  ;;  %v2092_v0 = vmul.f32 %v6429_v4, %v6434_v59  ;;  %v6437_v39 = vld [vmem:[#allocation10_spill] sm:$0xff] }
 0x158   :  { %v1878_v22 = vrot.slane %v1877_v44, 1  ;;  %v1964_v40 = vrot.slane %v1963_v8, 4  ;;  %v1906_v27 = vrot.slane %v1905_v52, 2  ;;  %v2070_v15 = vsel %vm1678_vm2, %v2062_v47, 0.0 }
 0x159   :  { %v1935_v13 = vadd.f32 %v1934_v33, %v1933_v1  ;;  %v1971_v55 = vmul.f32 %v4467_v24, %v6435_v6  ;;  %v4787_v63 = vmul.f32 0.0625, %v1849_v7  ;;  %v2100_v54 = vsel %vm1678_vm2, %v2092_v0, 0.0  ;;  %v4814_v0 = vpop.f32.mrb[49].mxu0 }
 0x15a   :  { %v1879_v11 = vadd.f32 %v1878_v22, %v1877_v44  ;;  %v1965_v29 = vadd.f32 %v1964_v40, %v1963_v8  ;;  %v1907_v43 = vadd.f32 %v1906_v27, %v1905_v52  ;;  %v2001_v4 = vmul.f32 %v4467_v24, %v6437_v39  ;;  %v6439_v22 = vld [vmem:[#allocation16_spill] sm:$0xff] }
 0x15b   :  { %6436 = vst [vmem:[#allocation69_spill] sm:$0xff] %v4787_v63  ;;  %v1936_v10 = vrot.slane %v1935_v13, 2  ;;  %v1979_v19 = vsel %vm1678_vm2, %v1971_v55, 0.0  ;;  %v2031_v52 = vmul.f32 %v4467_v24, %v6439_v22  ;;  %v6440_v55 = vld [vmem:[#allocation23_spill] sm:$0xff] }
 0x15c   :  { %v4793_v9 = vmul.f32 0.0625, %v1879_v11  ;;  %v1966_v1 = vrot.slane %v1965_v29, 2  ;;  %v4797_v47 = vadd.f32 %v1980_v62, %v1979_v19  ;;  %v1908_v7 = vrot.slane %v1907_v43, 1  ;;  %v6441_v19 = vld [vmem:[#allocation31_spill] sm:$0xff] }
 0x15d   :  { %v1937_v44 = vadd.f32 %v1936_v10, %v1935_v13  ;;  %v2009_v8 = vsel %vm1678_vm2, %v2001_v4, 0.0  ;;  %v2061_v11 = vmul.f32 %v4467_v24, %v6440_v55  ;;  %v2039_v62 = vsel %vm1678_vm2, %v2031_v52, 0.0 }
 0x15e   :  { %6438 = vst [vmem:[#allocation70_spill] sm:$0xff] %v4793_v9  ;;  %v1967_v40 = vadd.f32 %v1966_v1, %v1965_v29  ;;  %v4804_v27 = vadd.f32 %v2010_v42, %v2009_v8  ;;  %v1909_v60 = vadd.f32 %v1908_v7, %v1907_v43  ;;  %v2091_v13 = vmul.f32 %v4467_v24, %v6441_v19  ;;  %v6442_v29 = vld [vmem:[#allocation43_spill] sm:$0xff] }
 0x15f   :  { %v1938_v33 = vrot.slane %v1937_v44, 1  ;;  %v2041_v4 = vadd.f32 %v2040_v36, %v2039_v62  ;;  %v2069_v38 = vsel %vm1678_vm2, %v2061_v11, 0.0  ;;  %v2122_v1 = vmul.f32 %v6442_v29, %v6428_v58  ;;  %6443 = vst [vmem:[#allocation43_spill] sm:$0xff] %v4814_v0 }
 0x160   :  { %v1968_v10 = vrot.slane %v1967_v40, 1  ;;  %v4816_v42 = vmul.f32 0.0625, %v1909_v60  ;;  %v2071_v31 = vadd.f32 %v2070_v15, %v2069_v38  ;;  %v2099_v43 = vsel %vm1678_vm2, %v2091_v13, 0.0 }
 0x161   :  { %v1939_v8 = vadd.f32 %v1938_v33, %v1937_v44  ;;  %v2101_v52 = vadd.f32 %v2100_v54, %v2099_v43  ;;  %v2130_v9 = vsel %vm1678_vm2, %v2122_v1, 0.0  ;;  %v2152_v24 = vmul.f32 %v6442_v29, %v6430_v2  ;;  %v6447_v44 = vld [vmem:[#allocation44_spill] sm:$0xff] }
 0x162   :  { %6444 = vst [vmem:[#allocation71_spill] sm:$0xff] %v4816_v42  ;;  %v1969_v7 = vadd.f32 %v1968_v10, %v1967_v40  ;;  %v2182_v60 = vmul.f32 %v6442_v29, %v6431_v51  ;;  %v2212_v38 = vmul.f32 %v6442_v29, %v6433_v56  ;;  %v2242_v33 = vmul.f32 %v6442_v29, %v6434_v59  ;;  %v6453_v59 = vld [vmem:[#allocation27_spill] sm:$0xff] }
 0x163   :  { %v4822_v36 = vmul.f32 0.0625, %v1939_v8  ;;  %v2160_v54 = vsel %vm1678_vm2, %v2152_v24, 0.0  ;;  %v2121_v40 = vmul.f32 %v6447_v44, %v6435_v6  ;;  %v2151_v1 = vmul.f32 %v6447_v44, %v6437_v39  ;;  %v6448_v8 = vld [vmem:[#allocation6_spill] sm:$0xff] }
 0x164   :  { %v4830_v15 = vmul.f32 0.0625, %v1969_v7  ;;  %v2190_v13 = vsel %vm1678_vm2, %v2182_v60, 0.0  ;;  %v2220_v10 = vsel %vm1678_vm2, %v2212_v38, 0.0  ;;  %v2250_v43 = vsel %vm1678_vm2, %v2242_v33, 0.0 }
 0x165   :  { %6445 = vst [vmem:[#allocation72_spill] sm:$0xff] %v4822_v36  ;;  %v2129_v29 = vsel %vm1678_vm2, %v2121_v40, 0.0  ;;  %v2181_v7 = vmul.f32 %v6447_v44, %v6439_v22  ;;  %v2159_v62 = vsel %vm1678_vm2, %v2151_v1, 0.0  ;;  %v2211_v60 = vmul.f32 %v6447_v44, %v6440_v55 }
 0x166   :  { %6446 = vst [vmem:[#allocation73_spill] sm:$0xff] %v4830_v15  ;;  %v2131_v24 = vadd.f32 %v2130_v9, %v2129_v29  ;;  %v2241_v38 = vmul.f32 %v6447_v44, %v6441_v19  ;;  %v2161_v11 = vadd.f32 %v2160_v54, %v2159_v62  ;;  %v1974_v33 = vmul.f32 %v4486_v57, %v6448_v8  ;;  %v6450_v19 = vld [vmem:[#allocation46_spill] sm:$0xff] }
 0x167   :  { %v2189_v0 = vsel %vm1678_vm2, %v2181_v7, 0.0  ;;  %v2004_v40 = vmul.f32 %v4486_v57, %v4288_v17  ;;  %v2219_v9 = vsel %vm1678_vm2, %v2211_v60, 0.0  ;;  %v2034_v29 = vmul.f32 %v4486_v57, %v4306_v26  ;;  %v6449_v7 = vld [vmem:[#allocation8_spill] sm:$0xff] }
 0x168   :  { %v2191_v39 = vadd.f32 %v2190_v13, %v2189_v0  ;;  %v2249_v1 = vsel %vm1678_vm2, %v2241_v38, 0.0  ;;  %v2221_v55 = vadd.f32 %v2220_v10, %v2219_v9  ;;  %v1984_v54 = vsel %vm1678_vm2, %v1974_v33, 0.0  ;;  %v6451_v13 = vld [vmem:[#allocation12_spill] sm:$0xff]  ;;  %v6452_v38 = vld [vmem:[#allocation18_spill] sm:$0xff] }
 0x169   :  { %v2251_v22 = vadd.f32 %v2250_v43, %v2249_v1  ;;  %v2064_v44 = vmul.f32 %v4486_v57, %v4328_v37  ;;  %v2094_v62 = vmul.f32 %v4486_v57, %v4346_v46  ;;  %v1973_v0 = vmul.f32 %v6450_v19, %v6449_v7  ;;  %v6454_v1 = vld [vmem:[#allocation45_spill] sm:$0xff] }
 0x16a   :  { %v2003_v60 = vmul.f32 %v6450_v19, %v6451_v13  ;;  %v2033_v6 = vmul.f32 %v6450_v19, %v6452_v38  ;;  %v2063_v10 = vmul.f32 %v6450_v19, %v6453_v59  ;;  %v2093_v43 = vmul.f32 %v6450_v19, %v4350_v48 }
 0x16b   :  { %v2014_v33 = vsel %vm1678_vm2, %v2004_v40, 0.0  ;;  %v2044_v9 = vsel %vm1678_vm2, %v2034_v29, 0.0  ;;  %v1982_v57 = vsel %vm1678_vm2, %v1973_v0, 0.0  ;;  %v2124_v56 = vmul.f32 %v6454_v1, %v6448_v8 }
 0x16c   :  { %v1983_v51 = vadd.f32 %v1982_v57, %v4797_v47  ;;  %v2012_v2 = vsel %vm1678_vm2, %v2003_v60, 0.0  ;;  %v2042_v58 = vsel %vm1678_vm2, %v2033_v6, 0.0  ;;  %v2072_v15 = vsel %vm1678_vm2, %v2063_v10, 0.0 }
 0x16d   :  { %v2013_v3 = vadd.f32 %v2012_v2, %v4804_v27  ;;  %v2043_v19 = vadd.f32 %v2042_v58, %v2041_v4  ;;  %v2073_v36 = vadd.f32 %v2072_v15, %v2071_v31  ;;  %v2102_v40 = vsel %vm1678_vm2, %v2093_v43, 0.0  ;;  %v6455_v58 = vld [vmem:[#allocation47_spill] sm:$0xff] }
 0x16e   :  { %v2074_v29 = vsel %vm1678_vm2, %v2064_v44, 0.0  ;;  %v2103_v0 = vadd.f32 %v2102_v40, %v2101_v52  ;;  %v2154_v8 = vmul.f32 %v6454_v1, %v4288_v17  ;;  %v2184_v47 = vmul.f32 %v6454_v1, %v4306_v26 }
 0x16f   :  { %v2214_v6 = vmul.f32 %v6454_v1, %v4328_v37  ;;  %v2244_v60 = vmul.f32 %v6454_v1, %v4346_v46  ;;  %v2123_v31 = vmul.f32 %v6455_v58, %v6449_v7  ;;  %v2153_v2 = vmul.f32 %v6455_v58, %v6451_v13 }
 0x170   :  { %v2104_v27 = vsel %vm1678_vm2, %v2094_v62, 0.0  ;;  %v2134_v4 = vsel %vm1678_vm2, %v2124_v56, 0.0  ;;  %v2183_v52 = vmul.f32 %v6455_v58, %v6452_v38  ;;  %v2213_v15 = vmul.f32 %v6455_v58, %v6453_v59  ;;  %v6456_v59 = vld [vmem:[#allocation48_spill] sm:$0xff] }
 0x171   :  { %v2164_v44 = vsel %vm1678_vm2, %v2154_v8, 0.0  ;;  %v2194_v10 = vsel %vm1678_vm2, %v2184_v47, 0.0  ;;  %v2132_v43 = vsel %vm1678_vm2, %v2123_v31, 0.0  ;;  %v2162_v57 = vsel %vm1678_vm2, %v2153_v2, 0.0 }
 0x172   :  { %v2133_v1 = vadd.f32 %v2132_v43, %v2131_v24  ;;  %v2163_v40 = vadd.f32 %v2162_v57, %v2161_v11  ;;  %v2192_v62 = vsel %vm1678_vm2, %v2183_v52, 0.0  ;;  %v2222_v56 = vsel %vm1678_vm2, %v2213_v15, 0.0 }
 0x173   :  { %v2193_v13 = vadd.f32 %v2192_v62, %v2191_v39  ;;  %v2223_v7 = vadd.f32 %v2222_v56, %v2221_v55  ;;  %v2243_v38 = vmul.f32 %v6455_v58, %v4350_v48  ;;  %v1976_v8 = vmul.f32 %v6456_v59, %v4282_v14  ;;  %v6457_v58 = vld [vmem:[#allocation50_spill] sm:$0xff] }
 0x174   :  { %v2006_v47 = vmul.f32 %v6456_v59, %v4296_v21  ;;  %v2036_v31 = vmul.f32 %v6456_v59, %v4314_v30  ;;  %v2066_v11 = vmul.f32 %v6456_v59, %v4336_v41  ;;  %v2096_v24 = vmul.f32 %v6456_v59, %v4354_v50 }
 0x175   :  { %v2224_v39 = vsel %vm1678_vm2, %v2214_v6, 0.0  ;;  %v2252_v55 = vsel %vm1678_vm2, %v2243_v38, 0.0  ;;  %v1975_v2 = vmul.f32 %v6457_v58, %v4286_v16  ;;  %v1985_v52 = vadd.f32 %v1984_v54, %v1983_v51 }
 0x176   :  { %v2254_v15 = vsel %vm1678_vm2, %v2244_v60, 0.0  ;;  %v2253_v43 = vadd.f32 %v2252_v55, %v2251_v22  ;;  %v1988_v57 = vsel %vm1678_vm2, %v1976_v8, 0.0  ;;  %v4933_v62 = vsel %vm1678_vm2, %v2006_v47, 0.0  ;;  %v6458_v22 = vld [vmem:[#allocation30_spill] sm:$0xff]  ;;  %v6459_v55 = vld [vmem:[#allocation37_spill] sm:$0xff] }
 0x177   :  { %v4936_v56 = vsel %vm1678_vm2, %v2036_v31, 0.0  ;;  %v1986_v59 = vsel %vm1678_vm2, %v1975_v2, 0.0  ;;  %v2005_v38 = vmul.f32 %v6457_v58, %v4300_v23  ;;  %v2015_v6 = vadd.f32 %v2014_v33, %v2013_v3  ;;  %v6460_v33 = vld [vmem:[#allocation49_spill] sm:$0xff] }
 0x178   :  { %v1987_v48 = vadd.f32 %v1986_v59, %v1985_v52  ;;  %v2035_v51 = vmul.f32 %v6457_v58, %v4318_v32  ;;  %v2045_v54 = vadd.f32 %v2044_v9, %v2043_v19  ;;  %v2065_v60 = vmul.f32 %v6457_v58, %v6458_v22 }
 0x179   :  { %v2016_v8 = vsel %vm1678_vm2, %v2005_v38, 0.0  ;;  %v2075_v47 = vadd.f32 %v2074_v29, %v2073_v36  ;;  %v2095_v31 = vmul.f32 %v6457_v58, %v6459_v55  ;;  %v2105_v46 = vadd.f32 %v2104_v27, %v2103_v0 }
 0x17a   :  { %v2017_v2 = vadd.f32 %v2016_v8, %v2015_v6  ;;  %v2046_v37 = vsel %vm1678_vm2, %v2035_v51, 0.0  ;;  %v2076_v3 = vsel %vm1678_vm2, %v2065_v60, 0.0  ;;  %v2126_v52 = vmul.f32 %v6460_v33, %v4282_v14  ;;  %v6461_v6 = vld [vmem:[#allocation51_spill] sm:$0xff] }
 0x17b   :  { %v2047_v59 = vadd.f32 %v2046_v37, %v2045_v54  ;;  %v2077_v9 = vadd.f32 %v2076_v3, %v2075_v47  ;;  %v2106_v19 = vsel %vm1678_vm2, %v2095_v31, 0.0  ;;  %v2156_v38 = vmul.f32 %v6460_v33, %v4296_v21 }
 0x17c   :  { %v2078_v36 = vsel %vm1678_vm2, %v2066_v11, 0.0  ;;  %v2107_v29 = vadd.f32 %v2106_v19, %v2105_v46  ;;  %v2186_v0 = vmul.f32 %v6460_v33, %v4314_v30  ;;  %v2216_v27 = vmul.f32 %v6460_v33, %v4336_v41 }
 0x17d   :  { %v2108_v58 = vsel %vm1678_vm2, %v2096_v24, 0.0  ;;  %v4963_v37 = vmul.f32 %v6460_v33, %v4354_v50  ;;  %v2125_v51 = vmul.f32 %v6461_v6, %v4286_v16  ;;  %v2135_v54 = vadd.f32 %v2134_v4, %v2133_v1 }
 0x17e   :  { %v4968_v60 = vsel %vm1678_vm2, %v2126_v52, 0.0  ;;  %v4971_v46 = vsel %vm1678_vm2, %v2156_v38, 0.0  ;;  %v2155_v11 = vmul.f32 %v6461_v6, %v4300_v23  ;;  %v2165_v8 = vadd.f32 %v2164_v44, %v2163_v40 }
 0x17f   :  { %v4976_v24 = vsel %vm1678_vm2, %v2186_v0, 0.0  ;;  %v2136_v47 = vsel %vm1678_vm2, %v2125_v51, 0.0  ;;  %v2185_v31 = vmul.f32 %v6461_v6, %v4318_v32  ;;  %v2195_v3 = vadd.f32 %v2194_v10, %v2193_v13  ;;  %v6462_v10 = vld [vmem:[#allocation52_spill] sm:$0xff] }
 0x180   :  { %v4981_v4 = vadd.f32 %v2136_v47, %v2135_v54  ;;  %v2166_v1 = vsel %vm1678_vm2, %v2155_v11, 0.0  ;;  %v2215_v33 = vmul.f32 %v6461_v6, %v6458_v22  ;;  %v2225_v52 = vadd.f32 %v2224_v39, %v2223_v7 }
 0x181   :  { %v4986_v19 = vadd.f32 %v2166_v1, %v2165_v8  ;;  %v2196_v44 = vsel %vm1678_vm2, %v2185_v31, 0.0  ;;  %v2245_v40 = vmul.f32 %v6461_v6, %v6459_v55  ;;  %v2255_v38 = vadd.f32 %v2254_v15, %v2253_v43  ;;  %v6463_v1 = vld [vmem:[#allocation3_spill] sm:$0xff] }
 0x182   :  { %v4991_v0 = vadd.f32 %v2196_v44, %v2195_v3  ;;  %v2226_v13 = vsel %vm1678_vm2, %v2215_v33, 0.0  ;;  %v1978_v51 = vmul.f32 %v6462_v10, %v4264_v5  ;;  %v2008_v54 = vmul.f32 %v6462_v10, %v4304_v25  ;;  %v6464_v33 = vld [vmem:[#allocation54_spill] sm:$0xff] }
 0x183   :  { %v4998_v11 = vadd.f32 %v2226_v13, %v2225_v52  ;;  %v2256_v7 = vsel %vm1678_vm2, %v2245_v40, 0.0  ;;  %v2038_v39 = vmul.f32 %v6462_v10, %v4322_v34  ;;  %v2068_v15 = vmul.f32 %v6462_v10, %v4344_v45  ;;  %v6465_v13 = vld [vmem:[#allocation17_spill] sm:$0xff] }
 0x184   :  { %v5006_v43 = vsel %vm1678_vm2, %v2216_v27, 0.0  ;;  %v5008_v6 = vadd.f32 %v2256_v7, %v2255_v38  ;;  %v1992_v8 = vsel %vm1678_vm2, %v1978_v51, 0.0  ;;  %v2098_v47 = vmul.f32 %v6462_v10, %v4360_v53 }
 0x185   :  { %v2022_v31 = vsel %vm1678_vm2, %v2008_v54, 0.0  ;;  %v2052_v3 = vsel %vm1678_vm2, %v2038_v39, 0.0  ;;  %v1977_v52 = vmul.f32 %v6464_v33, %v6463_v1  ;;  %v1989_v44 = vadd.f32 %v1988_v57, %v1987_v48 }
 0x186   :  { %v2082_v40 = vsel %vm1678_vm2, %v2068_v15, 0.0  ;;  %v2007_v27 = vmul.f32 %v6464_v33, %v6465_v13  ;;  %v2019_v38 = vadd.f32 %v4933_v62, %v2017_v2  ;;  %v2037_v51 = vmul.f32 %v6464_v33, %v6411_v20 }
 0x187   :  { %v1990_v10 = vsel %vm1678_vm2, %v1977_v52, 0.0  ;;  %v2049_v54 = vadd.f32 %v4936_v56, %v2047_v59  ;;  %v2067_v7 = vmul.f32 %v6464_v33, %v6412_v18  ;;  %v2079_v39 = vadd.f32 %v2078_v36, %v2077_v9  ;;  %v6466_v59 = vld [vmem:[#allocation53_spill] sm:$0xff] }
 0x188   :  { %v1991_v55 = vadd.f32 %v1990_v10, %v1989_v44  ;;  %v2020_v48 = vsel %vm1678_vm2, %v2007_v27, 0.0  ;;  %v2050_v57 = vsel %vm1678_vm2, %v2037_v51, 0.0  ;;  %v2097_v15 = vmul.f32 %v6464_v33, %v6414_v35 }
 0x189   :  { %v2021_v62 = vadd.f32 %v2020_v48, %v2019_v38  ;;  %v2051_v2 = vadd.f32 %v2050_v57, %v2049_v54  ;;  %v2080_v22 = vsel %vm1678_vm2, %v2067_v7, 0.0  ;;  %v2109_v32 = vadd.f32 %v2108_v58, %v2107_v29  ;;  %v6467_v57 = vld [vmem:[#allocation55_spill] sm:$0xff] }
 0x18a   :  { %v1993_v52 = vadd.f32 %v1992_v8, %v1991_v55  ;;  %v2081_v23 = vadd.f32 %v2080_v22, %v2079_v39  ;;  %v2110_v56 = vsel %vm1678_vm2, %v2097_v15, 0.0  ;;  %v2128_v9 = vmul.f32 %v6466_v59, %v4264_v5 }
 0x18b   :  { %v2023_v36 = vadd.f32 %v2022_v31, %v2021_v62  ;;  %v2053_v44 = vadd.f32 %v2052_v3, %v2051_v2  ;;  %v2111_v27 = vadd.f32 %v2110_v56, %v2109_v32  ;;  %v2158_v51 = vmul.f32 %v6466_v59, %v4304_v25 }
 0x18c   :  { %v2112_v33 = vsel %vm1678_vm2, %v2098_v47, 0.0  ;;  %v1994_v38 = vrot.slane %v1993_v52, 4  ;;  %v2083_v10 = vadd.f32 %v2082_v40, %v2081_v23  ;;  %v2188_v29 = vmul.f32 %v6466_v59, %v4322_v34 }
 0x18d   :  { %v5042_v22 = vsel %vm1678_vm2, %v4963_v37, 0.0  ;;  %v2024_v55 = vrot.slane %v2023_v36, 4  ;;  %v2054_v58 = vrot.slane %v2053_v44, 4  ;;  %v2113_v8 = vadd.f32 %v2112_v33, %v2111_v27 }
 0x18e   :  { %v1995_v31 = vadd.f32 %v1994_v38, %v1993_v52  ;;  %v2084_v3 = vrot.slane %v2083_v10, 4  ;;  %v2142_v32 = vsel %vm1678_vm2, %v2128_v9, 0.0  ;;  %v5047_v54 = vmul.f32 %v6466_v59, %v4344_v45 }
 0x18f   :  { %v2025_v47 = vadd.f32 %v2024_v55, %v2023_v36  ;;  %v2055_v23 = vadd.f32 %v2054_v58, %v2053_v44  ;;  %v2114_v40 = vrot.slane %v2113_v8, 4  ;;  %v5051_v7 = vmul.f32 %v6466_v59, %v4360_v53 }
 0x190   :  { %v1996_v37 = vrot.slane %v1995_v31, 2  ;;  %v2085_v39 = vadd.f32 %v2084_v3, %v2083_v10  ;;  %v2172_v48 = vsel %vm1678_vm2, %v2158_v51, 0.0  ;;  %v2127_v15 = vmul.f32 %v6467_v57, %v6463_v1 }
 0x191   :  { %v2026_v62 = vrot.slane %v2025_v47, 2  ;;  %v2056_v2 = vrot.slane %v2055_v23, 2  ;;  %v2115_v52 = vadd.f32 %v2114_v40, %v2113_v8  ;;  %v2202_v56 = vsel %vm1678_vm2, %v2188_v29, 0.0 }
 0x192   :  { %v1997_v9 = vadd.f32 %v1996_v37, %v1995_v31  ;;  %v2086_v36 = vrot.slane %v2085_v39, 2  ;;  %v2139_v44 = vadd.f32 %v4968_v60, %v4981_v4  ;;  %v2140_v59 = vsel %vm1678_vm2, %v2127_v15, 0.0 }
 0x193   :  { %v2027_v27 = vadd.f32 %v2026_v62, %v2025_v47  ;;  %v2057_v33 = vadd.f32 %v2056_v2, %v2055_v23  ;;  %v2116_v38 = vrot.slane %v2115_v52, 2  ;;  %v2157_v51 = vmul.f32 %v6467_v57, %v6465_v13 }
 0x194   :  { %v1998_v10 = vrot.slane %v1997_v9, 1  ;;  %v2087_v55 = vadd.f32 %v2086_v36, %v2085_v39  ;;  %v2141_v58 = vadd.f32 %v2140_v59, %v2139_v44  ;;  %v2169_v8 = vadd.f32 %v4971_v46, %v4986_v19 }
 0x195   :  { %v2028_v29 = vrot.slane %v2027_v27, 1  ;;  %v2058_v31 = vrot.slane %v2057_v33, 1  ;;  %v2117_v3 = vadd.f32 %v2116_v38, %v2115_v52  ;;  %v2170_v40 = vsel %vm1678_vm2, %v2157_v51, 0.0 }
 0x196   :  { %v1999_v60 = vadd.f32 %v1998_v10, %v1997_v9  ;;  %v2088_v4 = vrot.slane %v2087_v55, 1  ;;  %v2143_v37 = vadd.f32 %v2142_v32, %v2141_v58  ;;  %v2171_v47 = vadd.f32 %v2170_v40, %v2169_v8 }
 0x197   :  { %v2029_v23 = vadd.f32 %v2028_v29, %v2027_v27  ;;  %v2059_v15 = vadd.f32 %v2058_v31, %v2057_v33  ;;  %v2118_v62 = vrot.slane %v2117_v3, 1  ;;  %v2187_v2 = vmul.f32 %v6467_v57, %v6411_v20  ;;  %v6478_v29 = vld [vmem:[#allocation72_spill] sm:$0xff] }
 0x198   :  { %v5067_v39 = vmul.f32 0.0625, %v1999_v60  ;;  %v2089_v36 = vadd.f32 %v2088_v4, %v2087_v55  ;;  %v2144_v44 = vrot.slane %v2143_v37, 4  ;;  %v2173_v46 = vadd.f32 %v2172_v48, %v2171_v47  ;;  %v6474_v48 = vld [vmem:[#allocation70_spill] sm:$0xff]  ;;  %v6482_v47 = vld [vmem:[#allocation73_spill] sm:$0xff] }
 0x199   :  { %v5069_v19 = vmul.f32 0.0625, %v2029_v23  ;;  %v5071_v52 = vmul.f32 0.0625, %v2059_v15  ;;  %v2119_v59 = vadd.f32 %v2118_v62, %v2117_v3  ;;  %v2199_v32 = vadd.f32 %v4976_v24, %v4991_v0 }
 0x19a   :  { %6468 = vst [vmem:[#allocation44_spill] sm:$0xff] %v5067_v39  ;;  %v5075_v9 = vmul.f32 0.0625, %v2089_v36  ;;  %v6472_v27 = vmax.f32 %v4737_v49, %v4787_v63  ;;  %v2145_v38 = vadd.f32 %v2144_v44, %v2143_v37  ;;  %v2174_v51 = vrot.slane %v2173_v46, 4  ;;  %v6481_v37 = vld [vmem:[#allocation67_spill] sm:$0xff]  ;;  %v6497_v63 = vld [vmem:[#allocation57_spill] sm:$0xff] }
 0x19b   :  { %6469 = vst [vmem:[#allocation46_spill] sm:$0xff] %v5069_v19  ;;  %6470 = vst [vmem:[#allocation45_spill] sm:$0xff] %v5071_v52  ;;  %v5083_v10 = vmul.f32 0.0625, %v2119_v59  ;;  %v6475_v55 = vmax.f32 %v4741_v12, %v6474_v48  ;;  %v6476_v24 = vmax.f32 %v4743_v61, %v4816_v42  ;;  %v2200_v8 = vsel %vm1678_vm2, %v2187_v2, 0.0  ;;  %v6496_v12 = vld [vmem:[#allocation31_spill] sm:$0xff] }
 0x19c   :  { %6471 = vst [vmem:[#allocation47_spill] sm:$0xff] %v5075_v9  ;;  %v5081_v33 = vmax.f32 %v6472_v27, %v5067_v39  ;;  %v6479_v31 = vmax.f32 %v4750_v28, %v6478_v29  ;;  %v2146_v40 = vrot.slane %v2145_v38, 2  ;;  %v2175_v60 = vadd.f32 %v2174_v51, %v2173_v46 }
 0x19d   :  { %6473 = vst [vmem:[#allocation48_spill] sm:$0xff] %v5083_v10  ;;  %v5089_v58 = vmax.f32 %v6475_v55, %v5069_v19  ;;  %v5095_v0 = vmax.f32 %v6476_v24, %v5071_v52  ;;  %v2201_v4 = vadd.f32 %v2200_v8, %v2199_v32  ;;  %v6483_v23 = vmax.f32 %v6481_v37, %v6482_v47  ;;  %v6485_v55 = vld [vmem:[#allocation2_spill] sm:$0xff]  ;;  %v6486_v24 = vld [vmem:[#allocation56_spill] sm:$0xff] }
 0x19e   :  { %v5102_v3 = vmax.f32 %v6479_v31, %v5075_v9  ;;  %v2217_v62 = vmul.f32 %v6467_v57, %v6412_v18  ;;  %v2229_v2 = vadd.f32 %v5006_v43, %v4998_v11  ;;  %v2247_v36 = vmul.f32 %v6467_v57, %v6414_v35  ;;  %v6487_v31 = vld [vmem:[#allocation9_spill] sm:$0xff] }
 0x19f   :  { %6477 = vst [vmem:[#allocation50_spill] sm:$0xff] %v5095_v0  ;;  %v5108_v15 = vmax.f32 %v6483_v23, %v5083_v10  ;;  %v2147_v44 = vadd.f32 %v2146_v40, %v2145_v38  ;;  %v2176_v59 = vrot.slane %v2175_v60, 2  ;;  %v2203_v27 = vadd.f32 %v2202_v56, %v2201_v4  ;;  %v6488_v38 = vld [vmem:[#allocation14_spill] sm:$0xff] }
 0x1a0   :  { %6480 = vst [vmem:[#allocation49_spill] sm:$0xff] %v5102_v3  ;;  %v2259_v46 = vadd.f32 %v5042_v22, %v5008_v6  ;;  %v2230_v32 = vsel %vm1678_vm2, %v2217_v62, 0.0  ;;  %v2260_v51 = vsel %vm1678_vm2, %v2247_v36, 0.0  ;;  %v2272_v8 = vmul.f32 %v6486_v24, %v6485_v55 }
 0x1a1   :  { %6484 = vst [vmem:[#allocation51_spill] sm:$0xff] %v5108_v15  ;;  %v2302_v23 = vmul.f32 %v6486_v24, %v6487_v31  ;;  %v2148_v11 = vrot.slane %v2147_v44, 1  ;;  %v2177_v43 = vadd.f32 %v2176_v59, %v2175_v60  ;;  %v2204_v10 = vrot.slane %v2203_v27, 4  ;;  %v6489_v59 = vld [vmem:[#allocation22_spill] sm:$0xff] }
 0x1a2   :  { %v2231_v57 = vadd.f32 %v2230_v32, %v2229_v2  ;;  %v2232_v56 = vsel %vm1678_vm2, %v5047_v54, 0.0  ;;  %v2262_v6 = vsel %vm1678_vm2, %v5051_v7, 0.0  ;;  %v2261_v22 = vadd.f32 %v2260_v51, %v2259_v46  ;;  %v6490_v32 = vld [vmem:[#allocation29_spill] sm:$0xff] }
 0x1a3   :  { %v2332_v40 = vmul.f32 %v6486_v24, %v6488_v38  ;;  %v2178_v4 = vrot.slane %v2177_v43, 1  ;;  %v2205_v62 = vadd.f32 %v2204_v10, %v2203_v27  ;;  %v2280_v47 = vsel %vm1678_vm2, %v2272_v8, 0.0  ;;  %v6491_v27 = vld [vmem:[#allocation4_spill] sm:$0xff]  ;;  %v6492_v8 = vld [vmem:[#allocation58_spill] sm:$0xff] }
 0x1a4   :  { %v2233_v36 = vadd.f32 %v2232_v56, %v2231_v57  ;;  %v2263_v37 = vadd.f32 %v2262_v6, %v2261_v22  ;;  %v2310_v60 = vsel %vm1678_vm2, %v2302_v23, 0.0  ;;  %v2362_v2 = vmul.f32 %v6486_v24, %v6489_v59  ;;  %v6493_v22 = vld [vmem:[#allocation10_spill] sm:$0xff] }
 0x1a5   :  { %v2392_v54 = vmul.f32 %v6486_v24, %v6490_v32  ;;  %v2149_v9 = vadd.f32 %v2148_v11, %v2147_v44  ;;  %v2206_v7 = vrot.slane %v2205_v62, 2  ;;  %v2340_v51 = vsel %vm1678_vm2, %v2332_v40, 0.0  ;;  %v6494_v11 = vld [vmem:[#allocation16_spill] sm:$0xff] }
 0x1a6   :  { %v2234_v46 = vrot.slane %v2233_v36, 4  ;;  %v2179_v29 = vadd.f32 %v2178_v4, %v2177_v43  ;;  %v2264_v28 = vrot.slane %v2263_v37, 4  ;;  %v2370_v10 = vsel %vm1678_vm2, %v2362_v2, 0.0  ;;  %v6495_v43 = vld [vmem:[#allocation23_spill] sm:$0xff] }
 0x1a7   :  { %v2271_v57 = vmul.f32 %v6492_v8, %v6491_v27  ;;  %v2207_v56 = vadd.f32 %v2206_v7, %v2205_v62  ;;  %v2400_v6 = vsel %vm1678_vm2, %v2392_v54, 0.0  ;;  %v2301_v52 = vmul.f32 %v6492_v8, %v6493_v22 }
 0x1a8   :  { %v2235_v23 = vadd.f32 %v2234_v46, %v2233_v36  ;;  %v2265_v24 = vadd.f32 %v2264_v28, %v2263_v37  ;;  %v2331_v40 = vmul.f32 %v6492_v8, %v6494_v11  ;;  %v2361_v4 = vmul.f32 %v6492_v8, %v6495_v43 }
 0x1a9   :  { %v2279_v44 = vsel %vm1678_vm2, %v2271_v57, 0.0  ;;  %v2208_v2 = vrot.slane %v2207_v56, 1  ;;  %v2309_v62 = vsel %vm1678_vm2, %v2301_v52, 0.0  ;;  %v2391_v39 = vmul.f32 %v6492_v8, %v6496_v12 }
 0x1aa   :  { %v2236_v42 = vrot.slane %v2235_v23, 2  ;;  %v2281_v61 = vadd.f32 %v2280_v47, %v2279_v44  ;;  %v2266_v36 = vrot.slane %v2265_v24, 2  ;;  %v2311_v7 = vadd.f32 %v2310_v60, %v2309_v62 }
 0x1ab   :  { %v2339_v54 = vsel %vm1678_vm2, %v2331_v40, 0.0  ;;  %v2369_v46 = vsel %vm1678_vm2, %v2361_v4, 0.0  ;;  %v2209_v28 = vadd.f32 %v2208_v2, %v2207_v56  ;;  %v2422_v49 = vmul.f32 %v6497_v63, %v6485_v55 }
 0x1ac   :  { %v2237_v37 = vadd.f32 %v2236_v42, %v2235_v23  ;;  %v2341_v57 = vadd.f32 %v2340_v51, %v2339_v54  ;;  %v2371_v19 = vadd.f32 %v2370_v10, %v2369_v46  ;;  %v2267_v48 = vadd.f32 %v2266_v36, %v2265_v24 }
 0x1ad   :  { %v2452_v52 = vmul.f32 %v6497_v63, %v6487_v31  ;;  %v5157_v47 = vmul.f32 0.0625, %v2149_v9  ;;  %v2482_v44 = vmul.f32 %v6497_v63, %v6488_v38  ;;  %v2512_v42 = vmul.f32 %v6497_v63, %v6489_v59  ;;  %v6499_v59 = vld [vmem:[#allocation59_spill] sm:$0xff] }
 0x1ae   :  { %v2238_v60 = vrot.slane %v2237_v37, 1  ;;  %v5163_v51 = vmul.f32 0.0625, %v2179_v29  ;;  %v5165_v10 = vmul.f32 0.0625, %v2209_v28  ;;  %v2268_v8 = vrot.slane %v2267_v48, 1  ;;  %v6500_v28 = vld [vmem:[#allocation6_spill] sm:$0xff] }
 0x1af   :  { %v2399_v56 = vsel %vm1678_vm2, %v2391_v39, 0.0  ;;  %v2430_v31 = vsel %vm1678_vm2, %v2422_v49, 0.0  ;;  %v2460_v9 = vsel %vm1678_vm2, %v2452_v52, 0.0  ;;  %v2490_v24 = vsel %vm1678_vm2, %v2482_v44, 0.0  ;;  %v6502_v44 = vld [vmem:[#allocation25_spill] sm:$0xff] }
 0x1b0   :  { %6498 = vst [vmem:[#allocation52_spill] sm:$0xff] %v5165_v10  ;;  %v2239_v55 = vadd.f32 %v2238_v60, %v2237_v37  ;;  %v2401_v23 = vadd.f32 %v2400_v6, %v2399_v56  ;;  %v2542_v38 = vmul.f32 %v6497_v63, %v6490_v32  ;;  %v2421_v29 = vmul.f32 %v6499_v59, %v6491_v27  ;;  %v6501_v37 = vld [vmem:[#allocation60_spill] sm:$0xff] }
 0x1b1   :  { %v2451_v40 = vmul.f32 %v6499_v59, %v6493_v22  ;;  %v2520_v4 = vsel %vm1678_vm2, %v2512_v42, 0.0  ;;  %v2481_v39 = vmul.f32 %v6499_v59, %v6494_v11  ;;  %v2511_v49 = vmul.f32 %v6499_v59, %v6495_v43  ;;  %v6504_v56 = vld [vmem:[#allocation32_spill] sm:$0xff] }
 0x1b2   :  { %v2541_v6 = vmul.f32 %v6499_v59, %v6496_v12  ;;  %v2269_v2 = vadd.f32 %v2268_v8, %v2267_v48  ;;  %v2550_v63 = vsel %vm1678_vm2, %v2542_v38, 0.0  ;;  %v2429_v32 = vsel %vm1678_vm2, %v2421_v29, 0.0  ;;  %v6507_v59 = vld [vmem:[#allocation12_spill] sm:$0xff] }
 0x1b3   :  { %v2459_v27 = vsel %vm1678_vm2, %v2451_v40, 0.0  ;;  %v2431_v62 = vadd.f32 %v2430_v31, %v2429_v32  ;;  %v2489_v36 = vsel %vm1678_vm2, %v2481_v39, 0.0  ;;  %v2519_v54 = vsel %vm1678_vm2, %v2511_v49, 0.0  ;;  %v6509_v49 = vld [vmem:[#allocation18_spill] sm:$0xff] }
 0x1b4   :  { %v2461_v22 = vadd.f32 %v2460_v9, %v2459_v27  ;;  %v2491_v11 = vadd.f32 %v2490_v24, %v2489_v36  ;;  %v2521_v46 = vadd.f32 %v2520_v4, %v2519_v54  ;;  %v2549_v43 = vsel %vm1678_vm2, %v2541_v6, 0.0  ;;  %v6505_v9 = vld [vmem:[#allocation8_spill] sm:$0xff]  ;;  %v6506_v24 = vld [vmem:[#allocation61_spill] sm:$0xff]  ;;  %v6510_v27 = vld [vmem:[#allocation27_spill] sm:$0xff] }
 0x1b5   :  { %v2274_v12 = vmul.f32 %v6501_v37, %v6500_v28  ;;  %v2551_v48 = vadd.f32 %v2550_v63, %v2549_v43  ;;  %v2304_v52 = vmul.f32 %v6501_v37, %v4288_v17  ;;  %v2334_v60 = vmul.f32 %v6501_v37, %v4306_v26 }
 0x1b6   :  { %v2364_v42 = vmul.f32 %v6501_v37, %v6502_v44  ;;  %v5198_v8 = vmul.f32 0.0625, %v2239_v55  ;;  %v2394_v31 = vmul.f32 %v6501_v37, %v6504_v56  ;;  %v2273_v38 = vmul.f32 %v6506_v24, %v6505_v9  ;;  %v6511_v37 = vld [vmem:[#allocation34_spill] sm:$0xff] }
 0x1b7   :  { %v2303_v29 = vmul.f32 %v6506_v24, %v6507_v59  ;;  %v5206_v40 = vmul.f32 0.0625, %v2269_v2  ;;  %v2284_v4 = vsel %vm1678_vm2, %v2274_v12, 0.0  ;;  %v2314_v39 = vsel %vm1678_vm2, %v2304_v52, 0.0 }
 0x1b8   :  { %6503 = vst [vmem:[#allocation3_spill] sm:$0xff] %v5198_v8  ;;  %v2333_v6 = vmul.f32 %v6506_v24, %v6509_v49  ;;  %v2344_v55 = vsel %vm1678_vm2, %v2334_v60, 0.0  ;;  %v2282_v63 = vsel %vm1678_vm2, %v2273_v38, 0.0  ;;  %v2363_v36 = vmul.f32 %v6506_v24, %v6510_v27 }
 0x1b9   :  { %6508 = vst [vmem:[#allocation54_spill] sm:$0xff] %v5206_v40  ;;  %v2312_v32 = vsel %vm1678_vm2, %v2303_v29, 0.0  ;;  %v2283_v54 = vadd.f32 %v2282_v63, %v2281_v61  ;;  %v2393_v12 = vmul.f32 %v6506_v24, %v6511_v37  ;;  %v6512_v40 = vld [vmem:[#allocation62_spill] sm:$0xff]  ;;  %v2374_v24 = vsel %vm1678_vm2, %v2364_v42, 0.0 }
 0x1ba   :  { %v2313_v43 = vadd.f32 %v2312_v32, %v2311_v7  ;;  %v2342_v2 = vsel %vm1678_vm2, %v2333_v6, 0.0  ;;  %v2372_v15 = vsel %vm1678_vm2, %v2363_v36, 0.0  ;;  %v2424_v60 = vmul.f32 %v6512_v40, %v6500_v28 }
 0x1bb   :  { %v2343_v52 = vadd.f32 %v2342_v2, %v2341_v57  ;;  %v2454_v38 = vmul.f32 %v6512_v40, %v4288_v17  ;;  %v2373_v29 = vadd.f32 %v2372_v15, %v2371_v19  ;;  %v2402_v3 = vsel %vm1678_vm2, %v2393_v12, 0.0  ;;  %v6513_v19 = vld [vmem:[#allocation40_spill] sm:$0xff] }
 0x1bc   :  { %v2484_v61 = vmul.f32 %v6512_v40, %v4306_v26  ;;  %v2514_v7 = vmul.f32 %v6512_v40, %v6502_v44  ;;  %v2404_v57 = vsel %vm1678_vm2, %v2394_v31, 0.0  ;;  %v2403_v6 = vadd.f32 %v2402_v3, %v2401_v23 }
 0x1bd   :  { %v2544_v28 = vmul.f32 %v6512_v40, %v6504_v56  ;;  %v2434_v63 = vsel %vm1678_vm2, %v2424_v60, 0.0  ;;  %v2464_v17 = vsel %vm1678_vm2, %v2454_v38, 0.0  ;;  %v2423_v15 = vmul.f32 %v6513_v19, %v6505_v9  ;;  %v6514_v9 = vld [vmem:[#allocation24_spill] sm:$0xff] }
 0x1be   :  { %v2453_v26 = vmul.f32 %v6513_v19, %v6507_v59  ;;  %v2494_v44 = vsel %vm1678_vm2, %v2484_v61, 0.0  ;;  %v2483_v42 = vmul.f32 %v6513_v19, %v6509_v49  ;;  %v2513_v3 = vmul.f32 %v6513_v19, %v6510_v27 }
 0x1bf   :  { %v2543_v23 = vmul.f32 %v6513_v19, %v6511_v37  ;;  %v2432_v56 = vsel %vm1678_vm2, %v2423_v15, 0.0  ;;  %v2276_v40 = vmul.f32 %v6514_v9, %v4282_v14  ;;  %v2306_v59 = vmul.f32 %v6514_v9, %v4296_v21  ;;  %v6515_v15 = vld [vmem:[#allocation33_spill] sm:$0xff] }
 0x1c0   :  { %v2462_v31 = vsel %vm1678_vm2, %v2453_v26, 0.0  ;;  %v2433_v32 = vadd.f32 %v2432_v56, %v2431_v62  ;;  %v2492_v49 = vsel %vm1678_vm2, %v2483_v42, 0.0  ;;  %v2522_v2 = vsel %vm1678_vm2, %v2513_v3, 0.0  ;;  %v6517_v3 = vld [vmem:[#allocation21_spill] sm:$0xff] }
 0x1c1   :  { %v2463_v36 = vadd.f32 %v2462_v31, %v2461_v22  ;;  %v2524_v27 = vsel %vm1678_vm2, %v2514_v7, 0.0  ;;  %v2493_v12 = vadd.f32 %v2492_v49, %v2491_v11  ;;  %v2523_v37 = vadd.f32 %v2522_v2, %v2521_v46  ;;  %v6516_v11 = vld [vmem:[#allocation15_spill] sm:$0xff] }
 0x1c2   :  { %v2552_v60 = vsel %vm1678_vm2, %v2543_v23, 0.0  ;;  %v2554_v38 = vsel %vm1678_vm2, %v2544_v28, 0.0  ;;  %v2336_v19 = vmul.f32 %v6514_v9, %v4314_v30  ;;  %v2366_v62 = vmul.f32 %v6514_v9, %v4336_v41 }
 0x1c3   :  { %v2553_v61 = vadd.f32 %v2552_v60, %v2551_v48  ;;  %v2396_v22 = vmul.f32 %v6514_v9, %v4354_v50  ;;  %v2275_v26 = vmul.f32 %v6515_v15, %v4286_v16  ;;  %v2285_v7 = vadd.f32 %v2284_v4, %v2283_v54 }
 0x1c4   :  { %v2305_v46 = vmul.f32 %v6515_v15, %v6516_v11  ;;  %v2288_v42 = vsel %vm1678_vm2, %v2276_v40, 0.0  ;;  %v5270_v48 = vsel %vm1678_vm2, %v2306_v59, 0.0  ;;  %v2315_v28 = vadd.f32 %v2314_v39, %v2313_v43  ;;  %v6518_v40 = vld [vmem:[#allocation30_spill] sm:$0xff]  ;;  %v6519_v43 = vld [vmem:[#allocation37_spill] sm:$0xff] }
 0x1c5   :  { %v2335_v23 = vmul.f32 %v6515_v15, %v6517_v3  ;;  %v5275_v56 = vsel %vm1678_vm2, %v2336_v19, 0.0  ;;  %v2286_v31 = vsel %vm1678_vm2, %v2275_v26, 0.0  ;;  %v2345_v4 = vadd.f32 %v2344_v55, %v2343_v52  ;;  %v6520_v26 = vld [vmem:[#allocation38_spill] sm:$0xff] }
 0x1c6   :  { %v2316_v9 = vsel %vm1678_vm2, %v2305_v46, 0.0  ;;  %v2287_v54 = vadd.f32 %v2286_v31, %v2285_v7  ;;  %v2365_v59 = vmul.f32 %v6515_v15, %v6518_v40  ;;  %v2375_v39 = vadd.f32 %v2374_v24, %v2373_v29 }
 0x1c7   :  { %v2317_v49 = vadd.f32 %v2316_v9, %v2315_v28  ;;  %v2346_v2 = vsel %vm1678_vm2, %v2335_v23, 0.0  ;;  %v2395_v8 = vmul.f32 %v6515_v15, %v6519_v43  ;;  %v2405_v0 = vadd.f32 %v2404_v57, %v2403_v6 }
 0x1c8   :  { %v2347_v60 = vadd.f32 %v2346_v2, %v2345_v4  ;;  %v2376_v19 = vsel %vm1678_vm2, %v2365_v59, 0.0  ;;  %v2426_v10 = vmul.f32 %v6520_v26, %v4282_v14  ;;  %v2456_v55 = vmul.f32 %v6520_v26, %v4296_v21  ;;  %v6523_v59 = vld [vmem:[#allocation68_spill] sm:$0xff] }
 0x1c9   :  { %v2486_v52 = vmul.f32 %v6520_v26, %v4314_v30  ;;  %v2377_v7 = vadd.f32 %v2376_v19, %v2375_v39  ;;  %v2406_v46 = vsel %vm1678_vm2, %v2395_v8, 0.0  ;;  %v5294_v29 = vmul.f32 %v6520_v26, %v4336_v41  ;;  %v6521_v41 = vld [vmem:[#allocation39_spill] sm:$0xff] }
 0x1ca   :  { %v5298_v24 = vmul.f32 %v6520_v26, %v4354_v50  ;;  %v2378_v57 = vsel %vm1678_vm2, %v2366_v62, 0.0  ;;  %v2408_v14 = vsel %vm1678_vm2, %v2396_v22, 0.0  ;;  %v2407_v6 = vadd.f32 %v2406_v46, %v2405_v0 }
 0x1cb   :  { %v5303_v21 = vsel %vm1678_vm2, %v2426_v10, 0.0  ;;  %v5306_v30 = vsel %vm1678_vm2, %v2456_v55, 0.0  ;;  %v5309_v8 = vsel %vm1678_vm2, %v2486_v52, 0.0  ;;  %v2425_v15 = vmul.f32 %v6521_v41, %v4286_v16 }
 0x1cc   :  { %v2435_v28 = vadd.f32 %v2434_v63, %v2433_v32  ;;  %v2455_v50 = vmul.f32 %v6521_v41, %v6516_v11  ;;  %v2465_v62 = vadd.f32 %v2464_v17, %v2463_v36  ;;  %v2485_v0 = vmul.f32 %v6521_v41, %v6517_v3 }
 0x1cd   :  { %v2495_v22 = vadd.f32 %v2494_v44, %v2493_v12  ;;  %v2436_v10 = vsel %vm1678_vm2, %v2425_v15, 0.0  ;;  %v2515_v23 = vmul.f32 %v6521_v41, %v6518_v40  ;;  %v2525_v31 = vadd.f32 %v2524_v27, %v2523_v37  ;;  %v6522_v37 = vld [vmem:[#allocation65_spill] sm:$0xff] }
 0x1ce   :  { %v2545_v9 = vmul.f32 %v6521_v41, %v6519_v43  ;;  %v5322_v4 = vadd.f32 %v2436_v10, %v2435_v28  ;;  %v2466_v16 = vsel %vm1678_vm2, %v2455_v50, 0.0  ;;  %v2496_v63 = vsel %vm1678_vm2, %v2485_v0, 0.0 }
 0x1cf   :  { %v2555_v17 = vadd.f32 %v2554_v38, %v2553_v61  ;;  %v5326_v32 = vadd.f32 %v2466_v16, %v2465_v62  ;;  %v5328_v36 = vadd.f32 %v2496_v63, %v2495_v22  ;;  %v2526_v44 = vsel %vm1678_vm2, %v2515_v23, 0.0 }
 0x1d0   :  { %v2556_v12 = vsel %vm1678_vm2, %v2545_v9, 0.0  ;;  %v5332_v11 = vadd.f32 %v2526_v44, %v2525_v31  ;;  %v2278_v3 = vmul.f32 %v6522_v37, %v4264_v5  ;;  %v2308_v2 = vmul.f32 %v6522_v37, %v4304_v25 }
 0x1d1   :  { %v5334_v27 = vadd.f32 %v2556_v12, %v2555_v17  ;;  %v2338_v38 = vmul.f32 %v6522_v37, %v4322_v34  ;;  %v2368_v61 = vmul.f32 %v6522_v37, %v4344_v45  ;;  %v2398_v40 = vmul.f32 %v6522_v37, %v4360_v53  ;;  %v6524_v37 = vld [vmem:[#allocation52_spill] sm:$0xff] }
 0x1d2   :  { %v2277_v39 = vmul.f32 %v6523_v59, %v6463_v1  ;;  %v2292_v43 = vsel %vm1678_vm2, %v2278_v3, 0.0  ;;  %v2322_v19 = vsel %vm1678_vm2, %v2308_v2, 0.0  ;;  %v2289_v26 = vadd.f32 %v2288_v42, %v2287_v54  ;;  %v6525_v3 = vld [vmem:[#allocation50_spill] sm:$0xff] }
 0x1d3   :  { %v2307_v55 = vmul.f32 %v6523_v59, %v6465_v13  ;;  %v2352_v52 = vsel %vm1678_vm2, %v2338_v38, 0.0  ;;  %v2382_v46 = vsel %vm1678_vm2, %v2368_v61, 0.0  ;;  %v2412_v41 = vsel %vm1678_vm2, %v2398_v40, 0.0 }
 0x1d4   :  { %v2290_v15 = vsel %vm1678_vm2, %v2277_v39, 0.0  ;;  %v2319_v50 = vadd.f32 %v5270_v48, %v2317_v49  ;;  %v2337_v0 = vmul.f32 %v6523_v59, %v6411_v20  ;;  %v2349_v42 = vadd.f32 %v5275_v56, %v2347_v60 }
 0x1d5   :  { %v2291_v28 = vadd.f32 %v2290_v15, %v2289_v26  ;;  %v2320_v62 = vsel %vm1678_vm2, %v2307_v55, 0.0  ;;  %v2367_v54 = vmul.f32 %v6523_v59, %v6412_v18  ;;  %v2379_v22 = vadd.f32 %v2378_v57, %v2377_v7  ;;  %v6529_v26 = vld [vmem:[#allocation51_spill] sm:$0xff]  ;;  %v6530_v55 = vld [vmem:[#allocation42_spill] sm:$0xff] }
 0x1d6   :  { %v2397_v10 = vmul.f32 %v6523_v59, %v6414_v35  ;;  %v2321_v31 = vadd.f32 %v2320_v62, %v2319_v50  ;;  %v2350_v9 = vsel %vm1678_vm2, %v2337_v0, 0.0  ;;  %v2409_v16 = vadd.f32 %v2408_v14, %v2407_v6  ;;  %v6526_v14 = vld [vmem:[#allocation3_spill] sm:$0xff]  ;;  %v6527_v6 = vld [vmem:[#allocation49_spill] sm:$0xff] }
 0x1d7   :  { %v2293_v23 = vadd.f32 %v2292_v43, %v2291_v28  ;;  %v2351_v48 = vadd.f32 %v2350_v9, %v2349_v42  ;;  %v2380_v49 = vsel %vm1678_vm2, %v2367_v54, 0.0  ;;  %v2573_v56 = vmax.f32 %v5081_v33, %v5157_v47  ;;  %v6528_v33 = vld [vmem:[#allocation54_spill] sm:$0xff] }
 0x1d8   :  { %v2410_v63 = vsel %vm1678_vm2, %v2397_v10, 0.0  ;;  %v2323_v17 = vadd.f32 %v2322_v19, %v2321_v31  ;;  %v2381_v44 = vadd.f32 %v2380_v49, %v2379_v22  ;;  %v2609_v12 = vmax.f32 %v5089_v58, %v5163_v51 }
 0x1d9   :  { %v2294_v60 = vrot.slane %v2293_v23, 4  ;;  %v2411_v7 = vadd.f32 %v2410_v63, %v2409_v16  ;;  %v2353_v57 = vadd.f32 %v2352_v52, %v2351_v48  ;;  %v2645_v2 = vmax.f32 %v6525_v3, %v6524_v37 }
 0x1da   :  { %v2681_v38 = vmax.f32 %v6527_v6, %v6526_v14  ;;  %v2324_v40 = vrot.slane %v2323_v17, 4  ;;  %v2383_v59 = vadd.f32 %v2382_v46, %v2381_v44  ;;  %v2717_v19 = vmax.f32 %v6529_v26, %v6528_v33 }
 0x1db   :  { %v2295_v61 = vadd.f32 %v2294_v60, %v2293_v23  ;;  %v2413_v39 = vadd.f32 %v2412_v41, %v2411_v7  ;;  %v2354_v43 = vrot.slane %v2353_v57, 4  ;;  %v2428_v52 = vmul.f32 %v6530_v55, %v4264_v5  ;;  %v6531_v60 = vld [vmem:[#allocation43_spill] sm:$0xff] }
 0x1dc   :  { %v2458_v58 = vmul.f32 %v6530_v55, %v4304_v25  ;;  %v2325_v28 = vadd.f32 %v2324_v40, %v2323_v17  ;;  %v2384_v50 = vrot.slane %v2383_v59, 4  ;;  %v2528_v0 = vsel %vm1678_vm2, %v5294_v29, 0.0 }
 0x1dd   :  { %v2296_v15 = vrot.slane %v2295_v61, 2  ;;  %v2414_v62 = vrot.slane %v2413_v39, 4  ;;  %v2558_v46 = vsel %vm1678_vm2, %v5298_v24, 0.0  ;;  %v2355_v41 = vadd.f32 %v2354_v43, %v2353_v57 }
 0x1de   :  { %v2488_v42 = vmul.f32 %v6530_v55, %v4322_v34  ;;  %v2326_v22 = vrot.slane %v2325_v28, 2  ;;  %v2385_v5 = vadd.f32 %v2384_v50, %v2383_v59  ;;  %v2442_v25 = vsel %vm1678_vm2, %v2428_v52, 0.0 }
 0x1df   :  { %v2297_v54 = vadd.f32 %v2296_v15, %v2295_v61  ;;  %v2415_v10 = vadd.f32 %v2414_v62, %v2413_v39  ;;  %v2356_v23 = vrot.slane %v2355_v41, 2  ;;  %v2518_v31 = vmul.f32 %v6530_v55, %v4344_v45 }
 0x1e0   :  { %v2548_v29 = vmul.f32 %v6530_v55, %v4360_v53  ;;  %v2327_v16 = vadd.f32 %v2326_v22, %v2325_v28  ;;  %v2386_v24 = vrot.slane %v2385_v5, 2  ;;  %v2472_v34 = vsel %vm1678_vm2, %v2458_v58, 0.0 }
 0x1e1   :  { %v2298_v9 = vrot.slane %v2297_v54, 1  ;;  %v2416_v48 = vrot.slane %v2415_v10, 2  ;;  %v2357_v49 = vadd.f32 %v2356_v23, %v2355_v41  ;;  %v2502_v63 = vsel %vm1678_vm2, %v2488_v42, 0.0 }
 0x1e2   :  { %v2427_v17 = vmul.f32 %v6531_v60, %v6463_v1  ;;  %v2328_v7 = vrot.slane %v2327_v16, 1  ;;  %v2387_v57 = vadd.f32 %v2386_v24, %v2385_v5  ;;  %v2439_v53 = vadd.f32 %v5303_v21, %v5322_v4 }
 0x1e3   :  { %v2299_v44 = vadd.f32 %v2298_v9, %v2297_v54  ;;  %v2417_v3 = vadd.f32 %v2416_v48, %v2415_v10  ;;  %v2358_v45 = vrot.slane %v2357_v49, 1  ;;  %v2457_v40 = vmul.f32 %v6531_v60, %v6465_v13 }
 0x1e4   :  { %v2440_v61 = vsel %vm1678_vm2, %v2427_v17, 0.0  ;;  %v2329_v39 = vadd.f32 %v2328_v7, %v2327_v16  ;;  %v2388_v43 = vrot.slane %v2387_v57, 1  ;;  %v2469_v52 = vadd.f32 %v5306_v30, %v5326_v32 }
 0x1e5   :  { %v5402_v59 = vmul.f32 0.0625, %v2299_v44  ;;  %v2418_v26 = vrot.slane %v2417_v3, 1  ;;  %v2359_v55 = vadd.f32 %v2358_v45, %v2357_v49  ;;  %v2441_v1 = vadd.f32 %v2440_v61, %v2439_v53 }
 0x1e6   :  { %v2470_v58 = vsel %vm1678_vm2, %v2457_v40, 0.0  ;;  %v5407_v15 = vmul.f32 0.0625, %v2329_v39  ;;  %v2389_v21 = vadd.f32 %v2388_v43, %v2387_v57  ;;  %v2487_v41 = vmul.f32 %v6531_v60, %v6411_v20 }
 0x1e7   :  { %v2419_v4 = vadd.f32 %v2418_v26, %v2417_v3  ;;  %v2574_v28 = vmax.f32 %v2573_v56, %v5402_v59  ;;  %v5410_v50 = vmul.f32 0.0625, %v2359_v55  ;;  %v2443_v13 = vadd.f32 %v2442_v25, %v2441_v1 }
 0x1e8   :  { %v2471_v62 = vadd.f32 %v2470_v58, %v2469_v52  ;;  %v5414_v42 = vmul.f32 0.0625, %v2389_v21  ;;  %v5419_v30 = vmax.f32 %v2609_v12, %v5407_v15  ;;  %v2499_v32 = vadd.f32 %v5309_v8, %v5328_v36 }
 0x1e9   :  { %v5416_v54 = vmul.f32 0.0625, %v2419_v4  ;;  %v5424_v22 = vmax.f32 %v2645_v2, %v5410_v50  ;;  %v2444_v56 = vrot.slane %v2443_v13, 4  ;;  %v2500_v10 = vsel %vm1678_vm2, %v2487_v41, 0.0 }
 0x1ea   :  { %v2473_v5 = vadd.f32 %v2472_v34, %v2471_v62  ;;  %v5431_v20 = vmax.f32 %v2681_v38, %v5414_v42  ;;  %v2501_v12 = vadd.f32 %v2500_v10, %v2499_v32  ;;  %v2517_v8 = vmul.f32 %v6531_v60, %v6412_v18  ;;  %v6532_v62 = vld [vmem:[#allocation41_spill] sm:$0xff] }
 0x1eb   :  { %v5434_v23 = vmax.f32 %v2717_v19, %v5416_v54  ;;  %v2445_v36 = vadd.f32 %v2444_v56, %v2443_v13  ;;  %v2529_v25 = vadd.f32 %v2528_v0, %v5332_v11  ;;  %v2547_v9 = vmul.f32 %v6531_v60, %v6414_v35  ;;  %v6533_v32 = vld [vmem:[#allocation69_spill] sm:$0xff] }
 0x1ec   :  { %v2474_v2 = vrot.slane %v2473_v5, 4  ;;  %v2503_v16 = vadd.f32 %v2502_v63, %v2501_v12  ;;  %v2530_v24 = vsel %vm1678_vm2, %v2517_v8, 0.0  ;;  %v2559_v6 = vadd.f32 %v2558_v46, %v5334_v27 }
 0x1ed   :  { %v2446_v38 = vrot.slane %v2445_v36, 2  ;;  %v2531_v19 = vadd.f32 %v2530_v24, %v2529_v25  ;;  %v2560_v49 = vsel %vm1678_vm2, %v2547_v9, 0.0  ;;  %v2532_v34 = vsel %vm1678_vm2, %v2518_v31, 0.0 }
 0x1ee   :  { %v2475_v48 = vadd.f32 %v2474_v2, %v2473_v5  ;;  %v2504_v18 = vrot.slane %v2503_v16, 4  ;;  %v2561_v17 = vadd.f32 %v2560_v49, %v2559_v6  ;;  %v2562_v44 = vsel %vm1678_vm2, %v2548_v29, 0.0  ;;  %v6534_v5 = vld [vmem:[#allocation44_spill] sm:$0xff] }
 0x1ef   :  { %v2447_v11 = vadd.f32 %v2446_v38, %v2445_v36  ;;  %v2533_v7 = vadd.f32 %v2532_v34, %v2531_v19 }
 0x1f0   :  { %v2476_v0 = vrot.slane %v2475_v48, 2  ;;  %v2505_v35 = vadd.f32 %v2504_v18, %v2503_v16  ;;  %v2563_v63 = vadd.f32 %v2562_v44, %v2561_v17  ;;  %v6536_v44 = vld [vmem:[#allocation70_spill] sm:$0xff] }
 0x1f1   :  { %v2448_v60 = vrot.slane %v2447_v11, 1  ;;  %v2534_v3 = vrot.slane %v2533_v7, 4 }
 0x1f2   :  { %v2477_v57 = vadd.f32 %v2476_v0, %v2475_v48  ;;  %v2506_v27 = vrot.slane %v2505_v35, 2  ;;  %v2564_v46 = vrot.slane %v2563_v63, 4  ;;  %v6537_v0 = vld [vmem:[#allocation46_spill] sm:$0xff] }
 0x1f3   :  { %v2449_v45 = vadd.f32 %v2448_v60, %v2447_v11  ;;  %v2535_v61 = vadd.f32 %v2534_v3, %v2533_v7 }
 0x1f4   :  { %v2478_v53 = vrot.slane %v2477_v57, 1  ;;  %v2507_v40 = vadd.f32 %v2506_v27, %v2505_v35  ;;  %v2565_v39 = vadd.f32 %v2564_v46, %v2563_v63 }
 0x1f5   :  { %v2450_v31 = vmul.f32 0.0625, %v2449_v45  ;;  %v2536_v26 = vrot.slane %v2535_v61, 2  ;;  %v6538_v45 = vld [vmem:[#allocation64_spill] sm:$0xff] }
 0x1f6   :  { %v2479_v43 = vadd.f32 %v2478_v53, %v2477_v57  ;;  %v2508_v55 = vrot.slane %v2507_v40, 1  ;;  %v2566_v29 = vrot.slane %v2565_v39, 2 }
 0x1f7   :  { %v2537_v1 = vadd.f32 %v2536_v26, %v2535_v61  ;;  %v2575_v52 = vmax.f32 %v2574_v28, %v2450_v31  ;;  %v6539_v61 = vld [vmem:[#allocation71_spill] sm:$0xff] }
 0x1f8   :  { %v2480_v58 = vmul.f32 0.0625, %v2479_v43  ;;  %v2509_v21 = vadd.f32 %v2508_v55, %v2507_v40  ;;  %v2567_v4 = vadd.f32 %v2566_v29, %v2565_v39  ;;  %v6540_v39 = vld [vmem:[#allocation45_spill] sm:$0xff] }
 0x1f9   :  { %v2538_v13 = vrot.slane %v2537_v1, 1  ;;  %v2576_v41 = vsub.f32 %v6532_v62, %v2575_v52  ;;  %v2579_v56 = vsub.f32 %v6533_v32, %v2575_v52  ;;  %v2582_v10 = vsub.f32 %v6534_v5, %v2575_v52  ;;  %v6541_v62 = vld [vmem:[#allocation66_spill] sm:$0xff]  ;;  %v6542_v32 = vld [vmem:[#allocation72_spill] sm:$0xff] }
 0x1fa   :  { %v5449_v12 = vmul.f32 0.0625, %v2509_v21  ;;  %v2568_v8 = vrot.slane %v2567_v4, 1  ;;  %v2585_v36 = vsub.f32 %v5157_v47, %v2575_v52  ;;  %v2588_v2 = vsub.f32 %v5402_v59, %v2575_v52  ;;  %v6535_v59 = vld [vmem:[#allocation63_spill] sm:$0xff] }
 0x1fb   :  { %v2539_v25 = vadd.f32 %v2538_v13, %v2537_v1  ;;  %v2577_v9 = vmul.f32 1.442695, %v2576_v41  ;;  %v2580_v28 = vmul.f32 1.442695, %v2579_v56  ;;  %v2583_v16 = vmul.f32 1.442695, %v2582_v10 }
 0x1fc   :  { %v2569_v24 = vadd.f32 %v2568_v8, %v2567_v4  ;;  %v2586_v6 = vmul.f32 1.442695, %v2585_v36  ;;  %v2591_v38 = vsub.f32 %v2450_v31, %v2575_v52  ;;  %v2589_v48 = vmul.f32 1.442695, %v2588_v2 }
 0x1fd   :  { %3792 = vpow2.f32 %v2577_v9  ;;  %v2611_v19 = vmax.f32 %v5419_v30, %v2480_v58  ;;  %v2647_v49 = vmax.f32 %v5424_v22, %v5449_v12  ;;  %v5456_v34 = vmul.f32 0.0625, %v2539_v25 }
 0x1fe   :  { %v5458_v18 = vmul.f32 0.0625, %v2569_v24  ;;  %3794 = vpow2.f32 %v2580_v28  ;;  %v2592_v47 = vmul.f32 1.442695, %v2591_v38 }
 0x1ff   :  { %3796 = vpow2.f32 %v2583_v16  ;;  %v2612_v17 = vsub.f32 %v6535_v59, %v2611_v19  ;;  %v2615_v11 = vsub.f32 %v6536_v44, %v2611_v19  ;;  %v2618_v7 = vsub.f32 %v6537_v0, %v2611_v19 }
 0x200   :  { %3798 = vpow2.f32 %v2586_v6  ;;  %v2621_v35 = vsub.f32 %v5163_v51, %v2611_v19  ;;  %v2624_v30 = vsub.f32 %v5407_v15, %v2611_v19  ;;  %v2627_v63 = vsub.f32 %v2480_v58, %v2611_v19  ;;  %v6545_v19 = vld [vmem:[#allocation73_spill] sm:$0xff] }
 0x201   :  { %3800 = vpow2.f32 %v2589_v48  ;;  %v2613_v22 = vmul.f32 1.442695, %v2612_v17  ;;  %v2616_v60 = vmul.f32 1.442695, %v2615_v11  ;;  %v2619_v57 = vmul.f32 1.442695, %v2618_v7 }
 0x202   :  { %3802 = vpow2.f32 %v2592_v47  ;;  %v2622_v3 = vmul.f32 1.442695, %v2621_v35  ;;  %v2625_v27 = vmul.f32 1.442695, %v2624_v30  ;;  %v2628_v46 = vmul.f32 1.442695, %v2627_v63 }
 0x203   :  { %3804 = vpow2.f32 %v2613_v22  ;;  %v2648_v53 = vsub.f32 %v6538_v45, %v2647_v49  ;;  %v2651_v40 = vsub.f32 %v6539_v61, %v2647_v49  ;;  %v2654_v31 = vsub.f32 %v6540_v39, %v2647_v49  ;;  %v6546_v47 = vld [vmem:[#allocation48_spill] sm:$0xff] }
 0x204   :  { %3806 = vpow2.f32 %v2616_v60  ;;  %v2657_v51 = vsub.f32 %v6524_v37, %v2647_v49  ;;  %v2660_v15 = vsub.f32 %v5410_v50, %v2647_v49  ;;  %v2663_v43 = vsub.f32 %v5449_v12, %v2647_v49 }
 0x205   :  { %3808 = vpow2.f32 %v2619_v57  ;;  %v2649_v26 = vmul.f32 1.442695, %v2648_v53  ;;  %v2652_v55 = vmul.f32 1.442695, %v2651_v40  ;;  %v2655_v1 = vmul.f32 1.442695, %v2654_v31 }
 0x206   :  { %3810 = vpow2.f32 %v2622_v3  ;;  %v2683_v52 = vmax.f32 %v5431_v20, %v5456_v34  ;;  %v5477_v58 = vmax.f32 %v5434_v23, %v5458_v18  ;;  %v2658_v50 = vmul.f32 1.442695, %v2657_v51  ;;  %v6543_v23 = vld [vmem:[#allocation47_spill] sm:$0xff] }
 0x207   :  { %v5471_v29 = vpop.eup %3792  ;;  %3812 = vpow2.f32 %v2625_v27  ;;  %v2661_v21 = vmul.f32 1.442695, %v2660_v15  ;;  %v2664_v9 = vmul.f32 1.442695, %v2663_v43 }
 0x208   :  { %v5479_v37 = vpop.eup %3794  ;;  %3814 = vpow2.f32 %v2628_v46  ;;  %v2684_v41 = vsub.f32 %v6541_v62, %v2683_v52  ;;  %v2687_v56 = vsub.f32 %v6542_v32, %v2683_v52  ;;  %v2690_v5 = vsub.f32 %v6543_v23, %v2683_v52 }
 0x209   :  { %v5481_v4 = vpop.eup %3796  ;;  %v2594_v13 = vadd.f32 %v5479_v37, %v5471_v29  ;;  %3816 = vpow2.f32 %v2649_v26  ;;  %v2693_v10 = vsub.f32 %v6526_v14, %v2683_v52  ;;  %v2696_v12 = vsub.f32 %v5414_v42, %v2683_v52  ;;  %v6544_v42 = vld [vmem:[#allocation67_spill] sm:$0xff] }
 0x20a   :  { %v5487_v20 = vpop.eup %3798  ;;  %3818 = vpow2.f32 %v2652_v55  ;;  %v2685_v2 = vmul.f32 1.442695, %v2684_v41  ;;  %v2688_v28 = vmul.f32 1.442695, %v2687_v56  ;;  %v2691_v6 = vmul.f32 1.442695, %v2690_v5 }
 0x20b   :  { %v5492_v8 = vpop.eup %3800  ;;  %v2595_v36 = vadd.f32 %v5481_v4, %v2594_v13  ;;  %3820 = vpow2.f32 %v2655_v1  ;;  %v2699_v14 = vsub.f32 %v5456_v34, %v2683_v52  ;;  %v2720_v38 = vsub.f32 %v6544_v42, %v5477_v58 }
 0x20c   :  { %v5495_v25 = vpop.eup %3802  ;;  %3822 = vpow2.f32 %v2658_v50  ;;  %v2723_v49 = vsub.f32 %v6545_v19, %v5477_v58  ;;  %v2726_v59 = vsub.f32 %v6546_v47, %v5477_v58  ;;  %v2729_v17 = vsub.f32 %v6528_v33, %v5477_v58 }
 0x20d   :  { %v5497_v16 = vpop.eup %3804  ;;  %v2596_v24 = vadd.f32 %v5487_v20, %v2595_v36  ;;  %3824 = vpow2.f32 %v2661_v21  ;;  %v2694_v7 = vmul.f32 1.442695, %v2693_v10  ;;  %v2697_v33 = vmul.f32 1.442695, %v2696_v12 }
 0x20e   :  { %v5503_v48 = vpop.eup %3806  ;;  %3826 = vpow2.f32 %v2685_v2  ;;  %v2721_v60 = vmul.f32 1.442695, %v2720_v38  ;;  %v2732_v57 = vsub.f32 %v5416_v54, %v5477_v58  ;;  %v2735_v3 = vsub.f32 %v5458_v18, %v5477_v58 }
 0x20f   :  { %v5511_v44 = vpop.eup %3808  ;;  %v2597_v11 = vadd.f32 %v5492_v8, %v2596_v24  ;;  %v2630_v34 = vadd.f32 %v5503_v48, %v5497_v16  ;;  %3828 = vpow2.f32 %v2688_v28  ;;  %v2724_v45 = vmul.f32 1.442695, %v2723_v49 }
 0x210   :  { %v5516_v0 = vpop.eup %3810  ;;  %3830 = vpow2.f32 %v2664_v9  ;;  %v2700_v61 = vmul.f32 1.442695, %v2699_v14  ;;  %v2727_v18 = vmul.f32 1.442695, %v2726_v59  ;;  %v2730_v26 = vmul.f32 1.442695, %v2729_v17 }
 0x211   :  { %v5518_v35 = vpop.eup %3812  ;;  %v2598_v30 = vadd.f32 %v5495_v25, %v2597_v11  ;;  %v2631_v63 = vadd.f32 %v5511_v44, %v2630_v34  ;;  %3832 = vpow2.f32 %v2691_v6  ;;  %v2733_v52 = vmul.f32 1.442695, %v2732_v57 }
 0x212   :  { %v5522_v22 = vpop.eup %3814  ;;  %v2736_v41 = vmul.f32 1.442695, %v2735_v3 }
 0x213   :  { %v5528_v27 = vpop.eup %3816  ;;  %3834 = vrcp.f32 %v2598_v30  ;;  %v2632_v46 = vadd.f32 %v5516_v0, %v2631_v63 }
 0x214   :  { %v5531_v53 = vpop.eup %3818  ;;  %3836 = vpow2.f32 %v2694_v7 }
 0x215   :  { %v5533_v40 = vpop.eup %3820  ;;  %v2633_v39 = vadd.f32 %v5518_v35, %v2632_v46  ;;  %v2666_v54 = vadd.f32 %v5531_v53, %v5528_v27  ;;  %3838 = vpow2.f32 %v2697_v33 }
 0x216   :  { %v5538_v31 = vpop.eup %3822  ;;  %3840 = vpow2.f32 %v2721_v60 }
 0x217   :  { %v2634_v51 = vadd.f32 %v5522_v22, %v2633_v39  ;;  %v2667_v15 = vadd.f32 %v5533_v40, %v2666_v54  ;;  %3842 = vpow2.f32 %v2724_v45  ;;  %v5542_v43 = vpop.eup %3824 }
 0x218   :  { %3844 = vpow2.f32 %v2700_v61  ;;  %v5544_v55 = vpop.eup %3826 }
 0x219   :  { %3846 = vrcp.f32 %v2634_v51  ;;  %v2668_v1 = vadd.f32 %v5538_v31, %v2667_v15  ;;  %v5547_v58 = vpop.eup %3828 }
 0x21a   :  { %3848 = vpow2.f32 %v2727_v18  ;;  %v5549_v50 = vpop.eup %3830  ;;  %v2702_v13 = vadd.f32 %v5547_v58, %v5544_v55 }
 0x21b   :  { %v2669_v21 = vadd.f32 %v5542_v43, %v2668_v1  ;;  %v5554_v62 = vpop.eup %3832  ;;  %3850 = vpow2.f32 %v2730_v26 }
 0x21c   :  { %v2703_v23 = vadd.f32 %v5554_v62, %v2702_v13  ;;  %3852 = vpow2.f32 %v2733_v52 }
 0x21d   :  { %v3835_v32 = vpop.eup %3834  ;;  %v2670_v56 = vadd.f32 %v5549_v50, %v2669_v21 }
 0x21e   :  { %v5558_v5 = vpop.eup %3836  ;;  %v2601_v10 = vmul.f32 %v3835_v32, %v5471_v29  ;;  %v2602_v12 = vmul.f32 %v3835_v32, %v5479_v37  ;;  %v2603_v36 = vmul.f32 %v3835_v32, %v5481_v4  ;;  %v2604_v2 = vmul.f32 %v3835_v32, %v5487_v20 }
 0x21f   :  { %v5564_v9 = vpop.eup %3838  ;;  %v2605_v28 = vmul.f32 %v3835_v32, %v5492_v8  ;;  %v2606_v24 = vmul.f32 %v3835_v32, %v5495_v25  ;;  %3854 = vrcp.f32 %v2670_v56  ;;  %v2704_v6 = vadd.f32 %v5558_v5, %v2703_v23 }
 0x220   :  { %v5569_v14 = vpop.eup %3840  ;;  %3856 = vpow2.f32 %v2736_v41  ;;  %v5578_v20 = vadd.f32 1e-08, %v2601_v10  ;;  %v5580_v8 = vadd.f32 1e-08, %v2602_v12  ;;  %v5582_v25 = vadd.f32 1e-08, %v2603_v36 }
 0x221   :  { %v5571_v42 = vpop.eup %3842  ;;  %v2705_v29 = vadd.f32 %v5564_v9, %v2704_v6  ;;  %v5585_v49 = vadd.f32 1e-08, %v2604_v2  ;;  %v5587_v47 = vadd.f32 1e-08, %v2605_v28  ;;  %v5589_v59 = vadd.f32 1e-08, %v2606_v24 }
 0x222   :  { %v5574_v37 = vpop.eup %3844  ;;  %v2738_v4 = vadd.f32 %v5571_v42, %v5569_v14 }
 0x223   :  { %v3847_v38 = vpop.eup %3846  ;;  %v2706_v19 = vadd.f32 %v5574_v37, %v2705_v29 }
 0x224   :  { %v5591_v17 = vpop.eup %3848  ;;  %v2637_v11 = vmul.f32 %v3847_v38, %v5497_v16  ;;  %v2638_v34 = vmul.f32 %v3847_v38, %v5503_v48  ;;  %v2639_v7 = vmul.f32 %v3847_v38, %v5511_v44  ;;  %v2640_v30 = vmul.f32 %v3847_v38, %v5516_v0 }
 0x225   :  { %v2641_v63 = vmul.f32 %v3847_v38, %v5518_v35  ;;  %v2642_v33 = vmul.f32 %v3847_v38, %v5522_v22  ;;  %3858 = vrcp.f32 %v2706_v19  ;;  %v2739_v60 = vadd.f32 %v5591_v17, %v2738_v4  ;;  %v3851_v57 = vpop.eup %3850 }
 0x226   :  { %v5600_v3 = vadd.f32 1e-08, %v2637_v11  ;;  %v5602_v46 = vadd.f32 1e-08, %v2638_v34  ;;  %v5604_v45 = vadd.f32 1e-08, %v2639_v7  ;;  %v3853_v16 = vpop.eup %3852 }
 0x227   :  { %v2740_v48 = vadd.f32 %v3851_v57, %v2739_v60  ;;  %v5606_v61 = vadd.f32 1e-08, %v2640_v30  ;;  %v5608_v44 = vadd.f32 1e-08, %v2641_v63  ;;  %v5610_v0 = vadd.f32 1e-08, %v2642_v33 }
 0x228   :  { %v2756_v35 = vadd.f32 %v5600_v3, %v5578_v20  ;;  %v2772_v22 = vadd.f32 %v5602_v46, %v5580_v8  ;;  %v2788_v39 = vadd.f32 %v5604_v45, %v5582_v25 }
 0x229   :  { %v3855_v54 = vpop.eup %3854  ;;  %v2741_v18 = vadd.f32 %v3853_v16, %v2740_v48  ;;  %v2804_v51 = vadd.f32 %v5606_v61, %v5585_v49  ;;  %v2820_v15 = vadd.f32 %v5608_v44, %v5587_v47  ;;  %v2836_v26 = vadd.f32 %v5610_v0, %v5589_v59 }
 0x22a   :  { %v3857_v1 = vpop.eup %3856  ;;  %v2673_v52 = vmul.f32 %v3855_v54, %v5528_v27  ;;  %v2674_v21 = vmul.f32 %v3855_v54, %v5531_v53  ;;  %v2675_v13 = vmul.f32 %v3855_v54, %v5533_v40  ;;  %v2676_v41 = vmul.f32 %v3855_v54, %v5538_v31 }
 0x22b   :  { %v2677_v32 = vmul.f32 %v3855_v54, %v5542_v43  ;;  %v2678_v56 = vmul.f32 %v3855_v54, %v5549_v50  ;;  %v2742_v23 = vadd.f32 %v3857_v1, %v2741_v18 }
 0x22c   :  { %v5630_v10 = vadd.f32 1e-08, %v2673_v52  ;;  %v5632_v12 = vadd.f32 1e-08, %v2674_v21  ;;  %v5634_v36 = vadd.f32 1e-08, %v2675_v13 }
 0x22d   :  { %3860 = vrcp.f32 %v2742_v23  ;;  %v5636_v2 = vadd.f32 1e-08, %v2676_v41  ;;  %v5638_v27 = vadd.f32 1e-08, %v2677_v32  ;;  %v5640_v53 = vadd.f32 1e-08, %v2678_v56 }
 0x22e   :  { %v2757_v40 = vadd.f32 %v2756_v35, %v5630_v10  ;;  %v2773_v31 = vadd.f32 %v2772_v22, %v5632_v12  ;;  %v2789_v43 = vadd.f32 %v2788_v39, %v5634_v36 }
 0x22f   :  { %v3859_v50 = vpop.eup %3858  ;;  %v2805_v28 = vadd.f32 %v2804_v51, %v5636_v2  ;;  %v2821_v24 = vadd.f32 %v2820_v15, %v5638_v27  ;;  %v2837_v6 = vadd.f32 %v2836_v26, %v5640_v53 }
 0x230   :  { %v2709_v29 = vmul.f32 %v3859_v50, %v5544_v55  ;;  %v2710_v4 = vmul.f32 %v3859_v50, %v5547_v58  ;;  %v2711_v38 = vmul.f32 %v3859_v50, %v5554_v62  ;;  %v2712_v19 = vmul.f32 %v3859_v50, %v5558_v5 }
 0x231   :  { %v2713_v11 = vmul.f32 %v3859_v50, %v5564_v9  ;;  %v2714_v34 = vmul.f32 %v3859_v50, %v5574_v37 }
 0x232   :  { %v2754_v7 = vadd.f32 1e-08, %v2709_v29  ;;  %v2770_v30 = vadd.f32 1e-08, %v2710_v4  ;;  %v2786_v63 = vadd.f32 1e-08, %v2711_v38 }
 0x233   :  { %v5654_v33 = vadd.f32 1e-08, %v2712_v19  ;;  %v5656_v60 = vadd.f32 1e-08, %v2713_v11  ;;  %v5658_v48 = vadd.f32 1e-08, %v2714_v34 }
 0x234   :  { %v2758_v55 = vadd.f32 %v2757_v40, %v2754_v7  ;;  %v2774_v35 = vadd.f32 %v2773_v31, %v2770_v30  ;;  %v2790_v58 = vadd.f32 %v2789_v43, %v2786_v63 }
 0x235   :  { %v2806_v62 = vadd.f32 %v2805_v28, %v5654_v33  ;;  %v2822_v5 = vadd.f32 %v2821_v24, %v5656_v60  ;;  %v2838_v9 = vadd.f32 %v2837_v6, %v5658_v48 }
 0x237   :  { %v3861_v22 = vpop.eup %3860 }
 0x238   :  { %v2745_v37 = vmul.f32 %v3861_v22, %v5569_v14  ;;  %v2746_v39 = vmul.f32 %v3861_v22, %v5571_v42  ;;  %v2747_v54 = vmul.f32 %v3861_v22, %v5591_v17  ;;  %v2748_v18 = vmul.f32 %v3861_v22, %v3851_v57 }
 0x239   :  { %v2749_v51 = vmul.f32 %v3861_v22, %v3853_v16  ;;  %v2750_v15 = vmul.f32 %v3861_v22, %v3857_v1  ;;  %v6548_v22 = vld [vmem:[#allocation5_spill] sm:$0xff] }
 0x23a   :  { %v2755_v26 = vadd.f32 1e-08, %v2745_v37  ;;  %v2771_v52 = vadd.f32 1e-08, %v2746_v39  ;;  %v2787_v21 = vadd.f32 1e-08, %v2747_v54 }
 0x23b   :  { %v2803_v13 = vadd.f32 1e-08, %v2748_v18  ;;  %v2819_v41 = vadd.f32 1e-08, %v2749_v51  ;;  %v5666_v32 = vadd.f32 1e-08, %v2750_v15 }
 0x23c   :  { %v2759_v56 = vadd.f32 %v2758_v55, %v2755_v26  ;;  %v2775_v23 = vadd.f32 %v2774_v35, %v2771_v52  ;;  %v2791_v40 = vadd.f32 %v2790_v58, %v2787_v21  ;;  %v6547_v58 = vld [vmem:[#allocation7_spill] sm:$0xff]  ;;  %v6549_v39 = vld [vmem:[#allocation13_spill] sm:$0xff]  ;;  %v6551_v15 = vld [vmem:[#allocation20_spill] sm:$0xff] }
 0x23d   :  { %v2807_v31 = vadd.f32 %v2806_v62, %v2803_v13  ;;  %v2823_v43 = vadd.f32 %v2822_v5, %v2819_v41  ;;  %v2839_v14 = vadd.f32 %v2838_v9, %v5666_v32  ;;  %v6550_v18 = vld [vmem:[#allocation11_spill] sm:$0xff] }
 0x23e   :  { %3862 = vrcp.f32 %v2759_v56 }
 0x23f   :  { %3864 = vrcp.f32 %v2775_v23  ;;  %v6554_v23 = vld [vmem:[#allocation26_spill] sm:$0xff] }
 0x240   :  { %3866 = vrcp.f32 %v2791_v40 }
 0x241   :  { %3868 = vrcp.f32 %v2807_v31  ;;  %v6555_v31 = vld [vmem:[#allocation36_spill] sm:$0xff] }
 0x242   :  { %3870 = vrcp.f32 %v2823_v43 }
 0x243   :  { %3872 = vrcp.f32 %v2839_v14 }
 0x248   :  { %v3863_v42 = vpop.eup %3862 }
 0x249   :  { %v3865_v17 = vpop.eup %3864  ;;  %v5670_v57 = vmul.f32 %v3863_v42, %v5578_v20  ;;  %v5673_v16 = vmul.f32 %v3863_v42, %v5600_v3  ;;  %v5676_v1 = vmul.f32 %v3863_v42, %v5630_v10  ;;  %v5678_v50 = vmul.f32 %v3863_v42, %v2754_v7 }
 0x24a   :  { %v3867_v28 = vpop.eup %3866  ;;  %v5680_v24 = vmul.f32 %v3863_v42, %v2755_v26  ;;  %v5683_v6 = vmul.f32 %v3865_v17, %v5580_v8  ;;  %v5686_v29 = vmul.f32 %v3865_v17, %v5602_v46  ;;  %v5689_v20 = vmul.f32 %v3865_v17, %v5632_v12  ;;  %v6556_v42 = vld [vmem:[#allocation35_spill] sm:$0xff] }
 0x24b   :  { %v3869_v4 = vpop.eup %3868  ;;  %v5691_v3 = vmul.f32 %v3865_v17, %v2770_v30  ;;  %v5693_v38 = vmul.f32 %v3865_v17, %v2771_v52  ;;  %v5696_v10 = vmul.f32 %v3867_v28, %v5582_v25  ;;  %v5699_v19 = vmul.f32 %v3867_v28, %v5604_v45  ;;  %2995 = vst.msk [vmem:[%s6209_s7] sm:$0x1] %vm2993_vm3, %v5670_v57  ;;  %v6552_v52 = vld [vmem:[#allocation19_spill] sm:$0xff] }
 0x24c   :  { %2996 = vst.msk [vmem:[%s6209_s7 + $0x1] sm:$0x1] %vm2993_vm3, %v5673_v16  ;;  %2997 = vst.msk [vmem:[%s6209_s7 + $0x2] sm:$0x1] %vm2993_vm3, %v5676_v1  ;;  %v3871_v8 = vpop.eup %3870  ;;  %v5722_v25 = vmul.f32 %v3867_v28, %v5634_v36  ;;  %v5724_v46 = vmul.f32 %v3867_v28, %v2786_v63  ;;  %v5726_v45 = vmul.f32 %v3867_v28, %v2787_v21 }
 0x24d   :  { %2998 = vst.msk [vmem:[%s6209_s7 + $0x3] sm:$0x1] %vm2993_vm3, %v5678_v50  ;;  %v5729_v12 = vmul.f32 %v3869_v4, %v5585_v49  ;;  %2999 = vst.msk [vmem:[%s6209_s7 + $0x4] sm:$0x1] %vm2993_vm3, %v5680_v24  ;;  %v3873_v49 = vpop.eup %3872  ;;  %v5752_v36 = vmul.f32 %v3869_v4, %v5606_v61  ;;  %v5755_v11 = vmul.f32 %v3869_v4, %v5636_v2 }
 0x24e   :  { %3290 = vst.msk [vmem:[%s6209_s7 + $0x8] sm:$0x1] %vm2993_vm3, %v5683_v6  ;;  %3291 = vst.msk [vmem:[%s6209_s7 + $0x9] sm:$0x1] %vm2993_vm3, %v5686_v29  ;;  %v5758_v34 = vmul.f32 %v3869_v4, %v5654_v33  ;;  %v5760_v7 = vmul.f32 %v3869_v4, %v2803_v13  ;;  %v5783_v61 = vmul.f32 %v3871_v8, %v5587_v47  ;;  %v6553_v13 = vld [vmem:[#allocation28_spill] sm:$0xff] }
 0x24f   :  { %3292 = vst.msk [vmem:[%s6209_s7 + $0xa] sm:$0x1] %vm2993_vm3, %v5689_v20  ;;  %3293 = vst.msk [vmem:[%s6209_s7 + $0xb] sm:$0x1] %vm2993_vm3, %v5691_v3  ;;  %v5786_v2 = vmul.f32 %v3871_v8, %v5608_v44  ;;  %v5789_v30 = vmul.f32 %v3871_v8, %v5638_v27  ;;  %v5792_v63 = vmul.f32 %v3871_v8, %v5656_v60  ;;  %v5855_v60 = vsub.f32 1.0, %v5693_v38 }
 0x250   :  { %3294 = vst.msk [vmem:[%s6209_s7 + $0xc] sm:$0x1] %vm2993_vm3, %v5693_v38  ;;  %3297 = vst.msk [vmem:[%s6209_s7 + $0x10] sm:$0x1] %vm2993_vm3, %v5696_v10  ;;  %v5814_v47 = vmul.f32 %v3871_v8, %v2819_v41  ;;  %v5817_v44 = vmul.f32 %v3873_v49, %v5589_v59  ;;  %v5820_v27 = vmul.f32 %v3873_v49, %v5610_v0  ;;  %v5881_v55 = vsub.f32 1.0, %v5760_v7 }
 0x251   :  { %3298 = vst.msk [vmem:[%s6209_s7 + $0x11] sm:$0x1] %vm2993_vm3, %v5699_v19  ;;  %3299 = vst.msk [vmem:[%s6209_s7 + $0x12] sm:$0x1] %vm2993_vm3, %v5722_v25  ;;  %v5823_v33 = vmul.f32 %v3873_v49, %v5640_v53  ;;  %v5846_v59 = vmul.f32 %v3873_v49, %v5658_v48  ;;  %v5849_v0 = vmul.f32 %v3873_v49, %v5666_v32  ;;  %v5852_v53 = vsub.f32 1.0, %v5680_v24 }
 0x252   :  { %3300 = vst.msk [vmem:[%s6209_s7 + $0x13] sm:$0x1] %vm2993_vm3, %v5724_v46  ;;  %3301 = vst.msk [vmem:[%s6209_s7 + $0x14] sm:$0x1] %vm2993_vm3, %v5726_v45  ;;  %v5878_v48 = vsub.f32 1.0, %v5726_v45  ;;  %v5884_v35 = vsub.f32 1.0, %v5814_v47  ;;  %v2971_v62 = vmul.f32 %v5670_v57, %v6547_v58  ;;  %v2972_v37 = vmul.f32 %v6548_v22, %v5670_v57 }
 0x253   :  { %3304 = vst.msk [vmem:[%s6209_s7 + $0x18] sm:$0x1] %vm2993_vm3, %v5729_v12  ;;  %3305 = vst.msk [vmem:[%s6209_s7 + $0x19] sm:$0x1] %vm2993_vm3, %v5752_v36  ;;  %v5909_v5 = vsub.f32 1.0, %v5849_v0  ;;  %v2860_v9 = vmax.f32 %v5852_v53, %v5855_v60  ;;  %v2973_v54 = vmul.f32 %v5673_v16, %v6549_v39  ;;  %v2974_v51 = vmul.f32 %v6550_v18, %v5673_v16 }
 0x254   :  { %3306 = vst.msk [vmem:[%s6209_s7 + $0x1a] sm:$0x1] %vm2993_vm3, %v5755_v11  ;;  %3307 = vst.msk [vmem:[%s6209_s7 + $0x1b] sm:$0x1] %vm2993_vm3, %v5758_v34  ;;  %v2977_v26 = vmul.f32 %v5676_v1, %v6551_v15  ;;  %v2978_v21 = vmul.f32 %v6552_v52, %v5676_v1  ;;  %v2981_v41 = vmul.f32 %v5678_v50, %v6553_v13 }
 0x255   :  { %3308 = vst.msk [vmem:[%s6209_s7 + $0x1c] sm:$0x1] %vm2993_vm3, %v5760_v7  ;;  %3311 = vst.msk [vmem:[%s6209_s7 + $0x20] sm:$0x1] %vm2993_vm3, %v5783_v61  ;;  %v2861_v32 = vmax.f32 %v2860_v9, %v5878_v48  ;;  %v2975_v56 = vadd.f32 %v2973_v54, %v2971_v62  ;;  %v2982_v40 = vmul.f32 %v6554_v23, %v5678_v50 }
 0x256   :  { %3312 = vst.msk [vmem:[%s6209_s7 + $0x21] sm:$0x1] %vm2993_vm3, %v5786_v2  ;;  %3313 = vst.msk [vmem:[%s6209_s7 + $0x22] sm:$0x1] %vm2993_vm3, %v5789_v30  ;;  %v2985_v43 = vmul.f32 %v5680_v24, %v6555_v31  ;;  %v2976_v14 = vadd.f32 %v2974_v51, %v2972_v37  ;;  %v2986_v17 = vmul.f32 %v6556_v42, %v5680_v24 }
 0x257   :  { %3314 = vst.msk [vmem:[%s6209_s7 + $0x23] sm:$0x1] %vm2993_vm3, %v5792_v63  ;;  %3315 = vst.msk [vmem:[%s6209_s7 + $0x24] sm:$0x1] %vm2993_vm3, %v5814_v47  ;;  %v3000_v57 = vmul.f32 %v5683_v6, %v6547_v58  ;;  %v3001_v16 = vmul.f32 %v6548_v22, %v5683_v6  ;;  %v2862_v1 = vmax.f32 %v2861_v32, %v5881_v55 }
 0x258   :  { %3318 = vst.msk [vmem:[%s6209_s7 + $0x28] sm:$0x1] %vm2993_vm3, %v5817_v44  ;;  %3319 = vst.msk [vmem:[%s6209_s7 + $0x29] sm:$0x1] %vm2993_vm3, %v5820_v27  ;;  %v2979_v28 = vadd.f32 %v2977_v26, %v2975_v56  ;;  %v3002_v4 = vmul.f32 %v5686_v29, %v6549_v39  ;;  %v3003_v50 = vmul.f32 %v6550_v18, %v5686_v29 }
 0x259   :  { %3320 = vst.msk [vmem:[%s6209_s7 + $0x2a] sm:$0x1] %vm2993_vm3, %v5823_v33  ;;  %3321 = vst.msk [vmem:[%s6209_s7 + $0x2b] sm:$0x1] %vm2993_vm3, %v5846_v59  ;;  %v2980_v8 = vadd.f32 %v2978_v21, %v2976_v14  ;;  %v3006_v49 = vmul.f32 %v5689_v20, %v6551_v15  ;;  %v3007_v24 = vmul.f32 %v6552_v52, %v5689_v20 }
 0x25a   :  { %3322 = vst.msk [vmem:[%s6209_s7 + $0x2c] sm:$0x1] %vm2993_vm3, %v5849_v0  ;;  %v3010_v62 = vmul.f32 %v5691_v3, %v6553_v13  ;;  %v2863_v6 = vmax.f32 %v2862_v1, %v5884_v35  ;;  %v2983_v9 = vadd.f32 %v2981_v41, %v2979_v28  ;;  %v3004_v37 = vadd.f32 %v3002_v4, %v3000_v57 }
 0x25b   :  { %v3005_v54 = vadd.f32 %v3003_v50, %v3001_v16  ;;  %v2984_v51 = vadd.f32 %v2982_v40, %v2980_v8  ;;  %v3011_v26 = vmul.f32 %v6554_v23, %v5691_v3  ;;  %v3014_v29 = vmul.f32 %v5693_v38, %v6555_v31 }
 0x25c   :  { %v3015_v21 = vmul.f32 %v6556_v42, %v5693_v38  ;;  %v2864_v20 = vmax.f32 %v2863_v6, %v5909_v5  ;;  %v5965_v32 = vadd.f32 %v2985_v43, %v2983_v9  ;;  %v3008_v56 = vadd.f32 %v3006_v49, %v3004_v37 }
 0x25d   :  { %v3009_v14 = vadd.f32 %v3007_v24, %v3005_v54  ;;  %v5967_v1 = vadd.f32 %v2986_v17, %v2984_v51  ;;  %v3030_v41 = vmul.f32 %v5696_v10, %v6547_v58  ;;  %v3031_v3 = vmul.f32 %v6548_v22, %v5696_v10 }
 0x25e   :  { %v3032_v40 = vmul.f32 %v5699_v19, %v6549_v39  ;;  %vm2865_vm4 = vcmp.eq.f32.partialorder %v5909_v5, %v2864_v20  ;;  %vm2867_vm5 = vcmp.eq.f32.partialorder %v5884_v35, %v2864_v20  ;;  %vm2869_vm6 = vcmp.eq.f32.partialorder %v5881_v55, %v2864_v20 }
 0x25f   :  { %vm2871_vm7 = vcmp.eq.f32.partialorder %v5878_v48, %v2864_v20  ;;  %v6346_v38 = vmov 6.0   ;;  %vm2873_vm8 = vcmp.eq.f32.partialorder %v5855_v60, %v2864_v20  ;;  %vm2875_vm9 = vcmp.eq.f32.partialorder %v5852_v53, %v2864_v20 }
 0x260   :  { %v2866_v43 = vsel %vm2865_vm4, 5.0, %v6346_v38  ;;  %v3012_v17 = vadd.f32 %v3010_v62, %v3008_v56  ;;  %v3013_v57 = vadd.f32 %v3011_v26, %v3009_v14  ;;  %v3033_v16 = vmul.f32 %v6550_v18, %v5699_v19 }
 0x261   :  { %v2868_v10 = vsel %vm2867_vm5, 4.0, %v2866_v43  ;;  %v3034_v28 = vadd.f32 %v3032_v40, %v3030_v41  ;;  %v3036_v8 = vmul.f32 %v5722_v25, %v6551_v15  ;;  %v3037_v49 = vmul.f32 %v6552_v52, %v5722_v25 }
 0x262   :  { %v2870_v4 = vsel %vm2869_vm6, 3.0, %v2868_v10  ;;  %v5984_v50 = vadd.f32 %v3014_v29, %v3012_v17  ;;  %v5990_v6 = vadd.f32 %v3015_v21, %v3013_v57  ;;  %v3035_v9 = vadd.f32 %v3033_v16, %v3031_v3 }
 0x263   :  { %v2872_v24 = vsel %vm2871_vm7, 2.0, %v2870_v4  ;;  %v3040_v62 = vmul.f32 %v5724_v46, %v6553_v13  ;;  %v3038_v54 = vadd.f32 %v3036_v8, %v3034_v28  ;;  %v3041_v19 = vmul.f32 %v6554_v23, %v5724_v46 }
 0x264   :  { %6557 = vst [vmem:[#allocation17_spill] sm:$0xff] %v5990_v6  ;;  %v2874_v37 = vsel %vm2873_vm8, 1.0, %v2872_v24  ;;  %v3044_v51 = vmul.f32 %v5726_v45, %v6555_v31  ;;  %v3039_v29 = vadd.f32 %v3037_v49, %v3035_v9  ;;  %v3045_v25 = vmul.f32 %v6556_v42, %v5726_v45 }
 0x265   :  { %v2876_v26 = vsel %vm2875_vm9, 0.0, %v2874_v37  ;;  %v3060_v21 = vmul.f32 %v5729_v12, %v6547_v58  ;;  %v3875_v56 = vmov 0.0   ;;  %v3042_v4 = vadd.f32 %v3040_v62, %v3038_v54 }
 0x266   :  { %vm2877_vm10 = vcmp.eq.f32.partialorder %v2876_v26, 0.0  ;;  %vm2879_vm11 = vcmp.eq.f32.partialorder %v2876_v26, 1.0  ;;  %vm2881_vm12 = vcmp.eq.f32.partialorder %v2876_v26, 2.0  ;;  %vm2883_vm13 = vcmp.eq.f32.partialorder %v2876_v26, 3.0 }
 0x267   :  { %v6004_v14 = vsel %vm2877_vm10, 1.0, %v3875_v56  ;;  %v6006_v46 = vsel %vm2879_vm11, 1.0, %v3875_v56  ;;  %v6008_v41 = vsel %vm2881_vm12, 1.0, %v3875_v56  ;;  %v6010_v20 = vsel %vm2883_vm13, 1.0, %v3875_v56 }
 0x268   :  { %vm2885_vm14 = vcmp.eq.f32.partialorder %v2876_v26, 4.0  ;;  %vm2887_vm15 = vcmp.eq.f32.partialorder %v2876_v26, 5.0  ;;  %vm2889_vm0 = vcmp.gt.f32.partialorder %v6004_v14, 0.0  ;;  %vm2891_vm1 = vcmp.gt.f32.partialorder %v6006_v46, 0.0 }
 0x269   :  { %v6014_v45 = vsel %vm2885_vm14, 1.0, %v3875_v56  ;;  %v6016_v3 = vsel %vm2887_vm15, 1.0, %v3875_v56  ;;  %v6019_v40 = vsel %vm2889_vm0, -inf, %v5852_v53  ;;  %v6022_v43 = vsel %vm2891_vm1, -inf, %v5855_v60 }
 0x26a   :  { %vm2893_vm4 = vcmp.gt.f32.partialorder %v6008_v41, 0.0  ;;  %vm2895_vm5 = vcmp.gt.f32.partialorder %v6010_v20, 0.0  ;;  %vm2897_vm6 = vcmp.gt.f32.partialorder %v6014_v45, 0.0  ;;  %vm2899_vm7 = vcmp.gt.f32.partialorder %v6016_v3, 0.0 }
 0x26b   :  { %v2894_v17 = vsel %vm2893_vm4, -inf, %v5878_v48  ;;  %v2896_v10 = vsel %vm2895_vm5, -inf, %v5881_v55  ;;  %v2898_v57 = vsel %vm2897_vm6, -inf, %v5884_v35  ;;  %v2900_v16 = vsel %vm2899_vm7, -inf, %v5909_v5 }
 0x26c   :  { %v2901_v28 = vmax.f32 %v6019_v40, %v6022_v43  ;;  %v3043_v8 = vadd.f32 %v3041_v19, %v3039_v29  ;;  %v3061_v49 = vmul.f32 %v6548_v22, %v5729_v12  ;;  %v3062_v24 = vmul.f32 %v5752_v36, %v6549_v39 }
 0x26d   :  { %v3063_v9 = vmul.f32 %v6550_v18, %v5752_v36  ;;  %v3066_v37 = vmul.f32 %v5755_v11, %v6551_v15  ;;  %v3067_v26 = vmul.f32 %v6552_v52, %v5755_v11  ;;  %v6044_v38 = vadd.f32 %v3044_v51, %v3042_v4 }
 0x26e   :  { %v2902_v56 = vmax.f32 %v2901_v28, %v2894_v17  ;;  %v6046_v62 = vadd.f32 %v3045_v25, %v3043_v8  ;;  %v3070_v12 = vmul.f32 %v5758_v34, %v6553_v13  ;;  %v3064_v54 = vadd.f32 %v3062_v24, %v3060_v21 }
 0x26f   :  { %6558 = vst [vmem:[#allocation53_spill] sm:$0xff] %v6044_v38  ;;  %v3065_v19 = vadd.f32 %v3063_v9, %v3061_v49  ;;  %v3071_v29 = vmul.f32 %v6554_v23, %v5758_v34  ;;  %v3074_v36 = vmul.f32 %v5760_v7, %v6555_v31  ;;  %v3075_v11 = vmul.f32 %v6556_v42, %v5760_v7 }
 0x270   :  { %6559 = vst [vmem:[#allocation55_spill] sm:$0xff] %v6046_v62  ;;  %v2903_v6 = vmax.f32 %v2902_v56, %v2896_v10  ;;  %v3090_v51 = vmul.f32 %v5783_v61, %v6547_v58  ;;  %v3091_v25 = vmul.f32 %v6548_v22, %v5783_v61  ;;  %v3068_v28 = vadd.f32 %v3066_v37, %v3064_v54 }
 0x271   :  { %v3069_v4 = vadd.f32 %v3067_v26, %v3065_v19  ;;  %v3092_v21 = vmul.f32 %v5786_v2, %v6549_v39  ;;  %v3093_v34 = vmul.f32 %v6550_v18, %v5786_v2  ;;  %v3096_v49 = vmul.f32 %v5789_v30, %v6551_v15 }
 0x272   :  { %v2904_v8 = vmax.f32 %v2903_v6, %v2898_v57  ;;  %v3097_v7 = vmul.f32 %v6552_v52, %v5789_v30  ;;  %v3100_v24 = vmul.f32 %v5792_v63, %v6553_v13  ;;  %v3072_v9 = vadd.f32 %v3070_v12, %v3068_v28 }
 0x273   :  { %v3073_v61 = vadd.f32 %v3071_v29, %v3069_v4  ;;  %v3094_v37 = vadd.f32 %v3092_v21, %v3090_v51  ;;  %v3095_v26 = vadd.f32 %v3093_v34, %v3091_v25  ;;  %v3101_v54 = vmul.f32 %v6554_v23, %v5792_v63 }
 0x274   :  { %v2905_v56 = vmax.f32 %v2904_v8, %v2900_v16  ;;  %v3104_v2 = vmul.f32 %v5814_v47, %v6555_v31  ;;  %v3105_v6 = vmul.f32 %v6556_v42, %v5814_v47  ;;  %v6076_v19 = vadd.f32 %v3074_v36, %v3072_v9 }
 0x275   :  { %v6078_v30 = vadd.f32 %v3075_v11, %v3073_v61  ;;  %v3098_v62 = vadd.f32 %v3096_v49, %v3094_v37  ;;  %v3099_v38 = vadd.f32 %v3097_v7, %v3095_v26  ;;  %v6560_v12 = vmov 6.0  }
 0x276   :  { %vm2906_vm8 = vcmp.eq.f32.partialorder %v2900_v16, %v2905_v56  ;;  %vm2908_vm9 = vcmp.eq.f32.partialorder %v2898_v57, %v2905_v56  ;;  %vm2910_vm10 = vcmp.eq.f32.partialorder %v2896_v10, %v2905_v56  ;;  %vm2912_vm11 = vcmp.eq.f32.partialorder %v2894_v17, %v2905_v56 }
 0x277   :  { %v2907_v29 = vsel %vm2906_vm8, 5.0, %v6560_v12  ;;  %vm2914_vm12 = vcmp.eq.f32.partialorder %v6022_v43, %v2905_v56  ;;  %vm2916_vm13 = vcmp.eq.f32.partialorder %v6019_v40, %v2905_v56  ;;  %v3102_v63 = vadd.f32 %v3100_v24, %v3098_v62 }
 0x278   :  { %v2909_v51 = vsel %vm2908_vm9, 4.0, %v2907_v29  ;;  %v3103_v25 = vadd.f32 %v3101_v54, %v3099_v38  ;;  %v3120_v47 = vmul.f32 %v5817_v44, %v6547_v58  ;;  %v3121_v36 = vmul.f32 %v6548_v22, %v5817_v44 }
 0x279   :  { %v2911_v11 = vsel %vm2910_vm10, 3.0, %v2909_v51  ;;  %v6087_v16 = vadd.f32 %v3104_v2, %v3102_v63  ;;  %v3122_v17 = vmul.f32 %v5820_v27, %v6549_v39  ;;  %v3123_v43 = vmul.f32 %v6550_v18, %v5820_v27  ;;  %v6562_v63 = vld [vmem:[#allocation53_spill] sm:$0xff] }
 0x27a   :  { %v2913_v10 = vsel %vm2912_vm11, 2.0, %v2911_v11  ;;  %v6093_v57 = vadd.f32 %v3105_v6, %v3103_v25  ;;  %v3126_v38 = vmul.f32 %v5823_v33, %v6551_v15  ;;  %v3127_v58 = vmul.f32 %v6552_v52, %v5823_v33  ;;  %v6563_v25 = vld [vmem:[#allocation55_spill] sm:$0xff] }
 0x27b   :  { %v2915_v62 = vsel %vm2914_vm12, 1.0, %v2913_v10  ;;  %v3124_v44 = vadd.f32 %v3122_v17, %v3120_v47  ;;  %v3125_v22 = vadd.f32 %v3123_v43, %v3121_v36  ;;  %v3130_v28 = vmul.f32 %v5846_v59, %v6553_v13 }
 0x27c   :  { %v2917_v39 = vsel %vm2916_vm13, 0.0, %v2915_v62  ;;  %v3131_v27 = vmul.f32 %v6554_v23, %v5846_v59  ;;  %v3134_v18 = vmul.f32 %v5849_v0, %v6555_v31  ;;  %v3135_v15 = vmul.f32 %v6556_v42, %v5849_v0 }
 0x27d   :  { %vm2918_vm14 = vcmp.eq.f32.partialorder %v2917_v39, 0.0  ;;  %vm2920_vm15 = vcmp.eq.f32.partialorder %v2917_v39, 1.0  ;;  %vm2922_vm0 = vcmp.eq.f32.partialorder %v2917_v39, 2.0  ;;  %vm2924_vm1 = vcmp.eq.f32.partialorder %v2917_v39, 3.0 }
 0x27e   :  { %v2919_v33 = vsel %vm2918_vm14, 1.0, %v6004_v14  ;;  %v2921_v52 = vsel %vm2920_vm15, 1.0, %v6006_v46  ;;  %v2923_v13 = vsel %vm2922_vm0, 1.0, %v6008_v41  ;;  %v2925_v40 = vsel %vm2924_vm1, 1.0, %v6010_v20 }
 0x27f   :  { %vm2926_vm4 = vcmp.eq.f32.partialorder %v2917_v39, 4.0  ;;  %vm2928_vm5 = vcmp.eq.f32.partialorder %v2917_v39, 5.0  ;;  %vm2930_vm6 = vcmp.gt.f32.partialorder %v2919_v33, 0.0  ;;  %vm2932_vm7 = vcmp.gt.f32.partialorder %v2921_v52, 0.0 }
 0x280   :  { %v2927_v59 = vsel %vm2926_vm4, 1.0, %v6014_v45  ;;  %v2929_v0 = vsel %vm2928_vm5, 1.0, %v6016_v3  ;;  %v2931_v23 = vsel %vm2930_vm6, -inf, %v5852_v53  ;;  %v2933_v31 = vsel %vm2932_vm7, -inf, %v5855_v60 }
 0x281   :  { %vm2934_vm8 = vcmp.gt.f32.partialorder %v2923_v13, 0.0  ;;  %vm2936_vm9 = vcmp.gt.f32.partialorder %v2925_v40, 0.0  ;;  %vm2938_vm10 = vcmp.gt.f32.partialorder %v2927_v59, 0.0  ;;  %vm2940_vm11 = vcmp.gt.f32.partialorder %v2929_v0, 0.0 }
 0x282   :  { %v2935_v42 = vsel %vm2934_vm8, -inf, %v5878_v48  ;;  %v2937_v14 = vsel %vm2936_vm9, -inf, %v5881_v55  ;;  %v2939_v46 = vsel %vm2938_vm10, -inf, %v5884_v35  ;;  %v2941_v41 = vsel %vm2940_vm11, -inf, %v5909_v5 }
 0x283   :  { %v2942_v20 = vmax.f32 %v2931_v23, %v2933_v31  ;;  %v3128_v45 = vadd.f32 %v3126_v38, %v3124_v44  ;;  %v3129_v4 = vadd.f32 %v3127_v58, %v3125_v22 }
 0x285   :  { %v2943_v3 = vmax.f32 %v2942_v20, %v2935_v42  ;;  %v3132_v21 = vadd.f32 %v3130_v28, %v3128_v45  ;;  %v3133_v53 = vadd.f32 %v3131_v27, %v3129_v4 }
 0x287   :  { %v2944_v34 = vmax.f32 %v2943_v3, %v2937_v14  ;;  %v3136_v60 = vadd.f32 %v3134_v18, %v3132_v21  ;;  %v3137_v8 = vadd.f32 %v3135_v15, %v3133_v53 }
 0x289   :  { %v2945_v49 = vmax.f32 %v2944_v34, %v2939_v46 }
 0x28b   :  { %v2946_v7 = vmax.f32 %v2945_v49, %v2941_v41 }
 0x28d   :  { %vm2947_vm12 = vcmp.eq.f32.partialorder %v2941_v41, %v2946_v7  ;;  %vm2949_vm13 = vcmp.eq.f32.partialorder %v2939_v46, %v2946_v7  ;;  %vm2951_vm14 = vcmp.eq.f32.partialorder %v2937_v14, %v2946_v7  ;;  %vm2953_vm15 = vcmp.eq.f32.partialorder %v2935_v42, %v2946_v7 }
 0x28e   :  { %v2948_v48 = vsel %vm2947_vm12, 5.0, %v6560_v12  ;;  %vm2955_vm0 = vcmp.eq.f32.partialorder %v2933_v31, %v2946_v7  ;;  %vm2957_vm1 = vcmp.eq.f32.partialorder %v2931_v23, %v2946_v7  ;;  %v6561_v12 = vld [vmem:[#allocation17_spill] sm:$0xff] }
 0x28f   :  { %v2950_v55 = vsel %vm2949_vm13, 4.0, %v2948_v48 }
 0x290   :  { %v2952_v35 = vsel %vm2951_vm14, 3.0, %v2950_v55 }
 0x291   :  { %v2954_v5 = vsel %vm2953_vm15, 2.0, %v2952_v35 }
 0x292   :  { %v2956_v24 = vsel %vm2955_vm0, 1.0, %v2954_v5 }
 0x293   :  { %v2958_v9 = vsel %vm2957_vm1, 0.0, %v2956_v24 }
 0x294   :  { %vm2959_vm4 = vcmp.eq.f32.partialorder %v2958_v9, 0.0  ;;  %vm2961_vm5 = vcmp.eq.f32.partialorder %v2958_v9, 1.0  ;;  %vm2963_vm6 = vcmp.eq.f32.partialorder %v2958_v9, 2.0  ;;  %vm2965_vm7 = vcmp.eq.f32.partialorder %v2958_v9, 3.0 }
 0x295   :  { %v2960_v61 = vsel %vm2959_vm4, 1.0, %v2919_v33  ;;  %v2962_v37 = vsel %vm2961_vm5, 1.0, %v2921_v52  ;;  %v2964_v26 = vsel %vm2963_vm6, 1.0, %v2923_v13  ;;  %v2966_v56 = vsel %vm2965_vm7, 1.0, %v2925_v40 }
 0x296   :  { %vm2967_vm8 = vcmp.eq.f32.partialorder %v2958_v9, 4.0  ;;  %vm2969_vm9 = vcmp.eq.f32.partialorder %v2958_v9, 5.0  ;;  %v2989_v54 = vmul.f32 %v5965_v32, %v2960_v61  ;;  %v2990_v2 = vmul.f32 %v5967_v1, %v2960_v61  ;;  %2994 = vst.msk [vmem:[%s6210_s6] sm:$0x1] %vm2993_vm3, %v2960_v61  ;;  %3023 = vst.msk [vmem:[%s6210_s6 + $0x1] sm:$0x1] %vm2993_vm3, %v2962_v37 }
 0x297   :  { %3053 = vst.msk [vmem:[%s6210_s6 + $0x2] sm:$0x1] %vm2993_vm3, %v2964_v26  ;;  %3083 = vst.msk [vmem:[%s6210_s6 + $0x3] sm:$0x1] %vm2993_vm3, %v2966_v56  ;;  %v2968_v32 = vsel %vm2967_vm8, 1.0, %v2927_v59  ;;  %v2970_v1 = vsel %vm2969_vm9, 1.0, %v2929_v0  ;;  %v3018_v6 = vmul.f32 %v5984_v50, %v2962_v37  ;;  %v3019_v29 = vmul.f32 %v6561_v12, %v2962_v37 }
 0x298   :  { %2991 = vst.msk [vmem:[%s6211_s5] sm:$0xff] %vm1678_vm2, %v2989_v54  ;;  %2992 = vst.msk [vmem:[%s6211_s5 + $0x8] sm:$0xff] %vm1678_vm2, %v2990_v2  ;;  %v3048_v51 = vmul.f32 %v6562_v63, %v2964_v26  ;;  %v3049_v47 = vmul.f32 %v6563_v25, %v2964_v26  ;;  %v3078_v36 = vmul.f32 %v6076_v19, %v2966_v56 }
 0x299   :  { %v3079_v50 = vmul.f32 %v6078_v30, %v2966_v56  ;;  %3113 = vst.msk [vmem:[%s6210_s6 + $0x4] sm:$0x1] %vm2993_vm3, %v2968_v32  ;;  %3143 = vst.msk [vmem:[%s6210_s6 + $0x5] sm:$0x1] %vm2993_vm3, %v2970_v1  ;;  %v3108_v19 = vmul.f32 %v6087_v16, %v2968_v32  ;;  %v3109_v30 = vmul.f32 %v6093_v57, %v2968_v32 }
 0x29a   :  { %3288 = vst.msk [vmem:[%s6211_s5 + $0x10] sm:$0xff] %vm1678_vm2, %v3018_v6  ;;  %3289 = vst.msk [vmem:[%s6211_s5 + $0x18] sm:$0xff] %vm1678_vm2, %v3019_v29  ;;  %v3138_v11 = vmul.f32 %v3136_v60, %v2970_v1  ;;  %v3139_v17 = vmul.f32 %v3137_v8, %v2970_v1 }
 0x29b   :  { %3295 = vst.msk [vmem:[%s6211_s5 + $0x20] sm:$0xff] %vm1678_vm2, %v3048_v51  ;;  %3296 = vst.msk [vmem:[%s6211_s5 + $0x28] sm:$0xff] %vm1678_vm2, %v3049_v47 }
 0x29c   :  { %3302 = vst.msk [vmem:[%s6211_s5 + $0x30] sm:$0xff] %vm1678_vm2, %v3078_v36  ;;  %3303 = vst.msk [vmem:[%s6211_s5 + $0x38] sm:$0xff] %vm1678_vm2, %v3079_v50 }
 0x29d   :  { %3309 = vst.msk [vmem:[%s6211_s5 + $0x40] sm:$0xff] %vm1678_vm2, %v3108_v19  ;;  %3310 = vst.msk [vmem:[%s6211_s5 + $0x48] sm:$0xff] %vm1678_vm2, %v3109_v30 }
 0x29e   :  { %3316 = vst.msk [vmem:[%s6211_s5 + $0x50] sm:$0xff] %vm1678_vm2, %v3138_v11  ;;  %3317 = vst.msk [vmem:[%s6211_s5 + $0x58] sm:$0xff] %vm1678_vm2, %v3139_v17 }

</bundles_post_ra>
